<compile_context>
chip_gen: v6e
topology: v6e:2x2x1
jax: 0.10.0
libtpu: 0.0.40
codegen_flags: <defaults>
</compile_context>

<pallas_src>
import jax
import jax.numpy as jnp
from jax import lax
from jax.experimental import pallas as pl
from jax.experimental.pallas import tpu as pltpu

# ---- small, TPU-friendly config consistent with the 32-layer decoder structure ----
NUM_LAYERS = 32            # the torch forward unpacks 64 past-KV tensors -> 32 layers
NUM_HEADS = 2
HEAD_DIM = 128
HIDDEN = NUM_HEADS * HEAD_DIM     # 256
INTER = 512
VOCAB = 512
S_PAST = 7                 # past sequence length held in the KV cache
S_NEW = S_PAST + 1         # after appending the new token
EPS = 1e-6
SCALE = 1.0 / (HEAD_DIM ** 0.5)
ROPE_THETA = 10000.0


def _rmsnorm(x, w):
    var = jnp.mean(x * x, axis=-1, keepdims=True)
    return x * lax.rsqrt(var + EPS) * w


# ------------------------------ fused Pallas kernel ------------------------------

def fused_decoder_kernel(x0_ref, cos_ref, sin_ref,
                         ln1_ref, ln2_ref, wqkv_ref, wo_ref, wgu_ref, wd_ref,
                         pk_ref, pv_ref, lnf_ref, wlm_ref,
                         logits_ref, ko_ref, vo_ref,
                         x_scr):
    l = pl.program_id(0)

    @pl.when(l == 0)
    def _():
        x_scr[...] = x0_ref[...]               # load the embedded token once

    x = x_scr[...]                             # (1, HIDDEN) f32, carried across layers

    # --- self-attention block ---
    h = _rmsnorm(x, ln1_ref[...])
    # fused QKV projection: one bf16 matmul, f32 accumulation
    qkv = jnp.dot(h.astype(jnp.bfloat16), wqkv_ref[...],
                  preferred_element_type=jnp.float32)          # (1, 3*HIDDEN)
    cos = cos_ref[...]                                          # (1, HEAD_DIM)
    sin = sin_ref[...]                                          # sign-folded sin

    # Bulk-copy the past cache rows into the output caches (one slab per layer);
    # the new-token rows are appended per head below.
    ko_ref[:, 0:S_PAST, :] = pk_ref[...]
    vo_ref[:, 0:S_PAST, :] = pv_ref[...]

    ctx_heads = []
    for hh in range(NUM_HEADS):                # statically unrolled, NUM_HEADS == 2
        lo = hh * HEAD_DIM
        qh = qkv[:, lo:lo + HEAD_DIM]                           # (1, D) lane slices
        kh = qkv[:, HIDDEN + lo:HIDDEN + lo + HEAD_DIM]
        vh = qkv[:, 2 * HIDDEN + lo:2 * HIDDEN + lo + HEAD_DIM]

        # RoPE: rotate_half(x) == roll(x, D/2, lanes) * sign; sign folded into `sin`.
        qh = qh * cos + pltpu.roll(qh, HEAD_DIM // 2, axis=1) * sin
        kh = kh * cos + pltpu.roll(kh, HEAD_DIM // 2, axis=1) * sin

        # Append the new K/V row to the per-layer cache output (single-row stores).
        ko_ref[hh, S_PAST:S_NEW, :] = kh
        vo_ref[hh, S_PAST:S_NEW, :] = vh

        # Keep the full K/V in registers (past-cache VMEM read + new row) so the
        # score matmul does not depend on the masked partial stores above.
        k_full = jnp.concatenate([pk_ref[hh], kh], axis=0)      # (S_NEW, D)
        v_full = jnp.concatenate([pv_ref[hh], vh], axis=0)

        # Single-query attention (new token is the last position -> no causal mask).
        scores = lax.dot_general(qh * SCALE, k_full, (((1,), (1,)), ((), ())),
                                 preferred_element_type=jnp.float32)  # (1, S_NEW)
        scores = scores - jnp.max(scores, axis=-1, keepdims=True)
        p = jnp.exp(scores)
        p = p * pl.reciprocal(jnp.sum(p, axis=-1, keepdims=True), approx=True)
        ctx_heads.append(jnp.dot(p, v_full, preferred_element_type=jnp.float32))  # (1, D)

    attn = jnp.concatenate(ctx_heads, axis=-1)                  # (1, HIDDEN)
    attn = jnp.dot(attn.astype(jnp.bfloat16), wo_ref[...],
                   preferred_element_type=jnp.float32)
    x = x + attn

    # --- MLP block (SwiGLU), gate+up fused into one matmul ---
    h2 = _rmsnorm(x, ln2_ref[...])
    gu = jnp.dot(h2.astype(jnp.bfloat16), wgu_ref[...],
                 preferred_element_type=jnp.float32)            # (1, 2*INTER)
    g = gu[:, 0:INTER]
    u = gu[:, INTER:2 * INTER]
    act = g * lax.logistic(g)                                   # SiLU (f32)
    mlp = jnp.dot((act * u).astype(jnp.bfloat16), wd_ref[...],
                  preferred_element_type=jnp.float32)
    x = x + mlp
    x_scr[...] = x

    # --- final RMSNorm + LM head folded into the last layer step ---
    @pl.when(l == pl.num_programs(0) - 1)
    def _():
        hf = _rmsnorm(x, lnf_ref[...])
        logits_ref[...] = jnp.dot(hf.astype(jnp.bfloat16), wlm_ref[...],
                                  preferred_element_type=jnp.float32)

    # TODO(synk): v7x-only — split the weight stream across the 2 TensorCores via
    # core_map / CORE_PARALLEL; not implemented here (no-op on v5e/v6e).


# ------------------------------ pallas_call wrapper ------------------------------

def _full_spec(shape):
    return pl.BlockSpec(shape, lambda l, shape=shape: (0,) * len(shape))


def _per_layer_spec(shape):
    return pl.BlockSpec((None,) + shape,
                        lambda l, shape=shape: (l,) + (0,) * len(shape))


def run_fused_decoder(x0, cos, sin, ln1, ln2, wqkv, wo, wgu, wd, pk, pv, lnf, wlm):
    in_specs = [
        _full_spec((1, HIDDEN)),                          # x0
        _full_spec((1, HEAD_DIM)),                        # cos
        _full_spec((1, HEAD_DIM)),                        # sin (sign folded)
        _per_layer_spec((1, HIDDEN)),                     # ln1
        _per_layer_spec((1, HIDDEN)),                     # ln2
        _per_layer_spec((HIDDEN, 3 * HIDDEN)),            # wqkv (bf16)
        _per_layer_spec((HIDDEN, HIDDEN)),                # wo   (bf16)
        _per_layer_spec((HIDDEN, 2 * INTER)),             # wgu  (bf16)
        _per_layer_spec((INTER, HIDDEN)),                 # wd   (bf16)
        _per_layer_spec((NUM_HEADS, S_PAST, HEAD_DIM)),   # past K
        _per_layer_spec((NUM_HEADS, S_PAST, HEAD_DIM)),   # past V
        _full_spec((1, HIDDEN)),                          # final norm weight
        _full_spec((HIDDEN, VOCAB)),                      # LM head (bf16)
    ]
    out_shape = (
        jax.ShapeDtypeStruct((1, VOCAB), jnp.float32),
        jax.ShapeDtypeStruct((NUM_LAYERS, NUM_HEADS, S_NEW, HEAD_DIM), jnp.float32),
        jax.ShapeDtypeStruct((NUM_LAYERS, NUM_HEADS, S_NEW, HEAD_DIM), jnp.float32),
    )
    out_specs = (
        _full_spec((1, VOCAB)),
        _per_layer_spec((NUM_HEADS, S_NEW, HEAD_DIM)),
        _per_layer_spec((NUM_HEADS, S_NEW, HEAD_DIM)),
    )
    return pl.pallas_call(
        fused_decoder_kernel,
        out_shape=out_shape,
        grid=(NUM_LAYERS,),
        in_specs=in_specs,
        out_specs=out_specs,
        scratch_shapes=[pltpu.VMEM((1, HIDDEN), jnp.float32)],   # carried activation
        compiler_params=pltpu.CompilerParams(
            dimension_semantics=("arbitrary",)),
    )(x0, cos, sin, ln1, ln2, wqkv, wo, wgu, wd, pk, pv, lnf, wlm)


# ------------------------------ model glue (plain JAX) ------------------------------

def rope_cos_sin(pos):
    half = HEAD_DIM // 2
    inv_freq = 1.0 / (ROPE_THETA ** (jnp.arange(half, dtype=jnp.float32) * 2.0 / HEAD_DIM))
    freqs = pos * inv_freq                                   # (half,)
    emb = jnp.concatenate([freqs, freqs])                    # (D,)
    cos = jnp.cos(emb)[None, :]
    sin = jnp.sin(emb)[None, :]
    sign = jnp.concatenate([-jnp.ones((half,), jnp.float32),
                            jnp.ones((half,), jnp.float32)])[None, :]
    return cos, sin * sign                                   # sign folded into sin


@jax.jit
def second_vicuna_forward(params, token, *past_kv_flat):
    """token: (1,1) int32; past_kv_flat: 64 arrays (1, NUM_HEADS, S_PAST, HEAD_DIM).
    Returns (logits (1,1,VOCAB), k_1, v_1, ..., k_32, v_32) each (1, NUM_HEADS, S_NEW, HEAD_DIM)."""
    embed, lnf, wlm, layers = params

    x = jnp.take(embed, token[0, 0], axis=0)[None, :]        # (1, HIDDEN)
    # new token position = past length (fixed here, matching the fixed S_PAST cache)
    cos, sin = rope_cos_sin(jnp.float32(S_PAST))

    pk = jnp.stack([past_kv_flat[2 * l][0] for l in range(NUM_LAYERS)])      # (L, NH, S_PAST, D)
    pv = jnp.stack([past_kv_flat[2 * l + 1][0] for l in range(NUM_LAYERS)])

    logits, k_all, v_all = run_fused_decoder(
        x, cos, sin, layers['ln1'], layers['ln2'],
        layers['wqkv'], layers['wo'], layers['wgu'], layers['wd'],
        pk, pv, lnf, wlm)

    outs = [logits[None]]                                    # (1, 1, VOCAB)
    for l in range(NUM_LAYERS):
        outs.append(k_all[l][None])                          # (1, NH, S_NEW, D)
        outs.append(v_all[l][None])
    return tuple(outs)


def init_params(key):
    k_embed, k_lm, k_layers = jax.random.split(key, 3)

    def w(k, shape):
        return jax.random.normal(k, shape, jnp.float32) * 0.02

    lk = jax.random.split(k_layers, 7)
    wq = w(lk[0], (NUM_LAYERS, HIDDEN, HIDDEN))
    wk = w(lk[1], (NUM_LAYERS, HIDDEN, HIDDEN))
    wv = w(lk[2], (NUM_LAYERS, HIDDEN, HIDDEN))
    wo = w(lk[3], (NUM_LAYERS, HIDDEN, HIDDEN))
    wg = w(lk[4], (NUM_LAYERS, HIDDEN, INTER))
    wu = w(lk[5], (NUM_LAYERS, HIDDEN, INTER))
    wd = w(lk[6], (NUM_LAYERS, INTER, HIDDEN))

    layers = {
        'ln1': jnp.ones((NUM_LAYERS, 1, HIDDEN), jnp.float32),
        'ln2': jnp.ones((NUM_LAYERS, 1, HIDDEN), jnp.float32),
        # weights are streamed as bf16; activations/accumulation stay f32
        'wqkv': jnp.concatenate([wq, wk, wv], axis=-1).astype(jnp.bfloat16),
        'wo': wo.astype(jnp.bfloat16),
        'wgu': jnp.concatenate([wg, wu], axis=-1).astype(jnp.bfloat16),
        'wd': wd.astype(jnp.bfloat16),
    }
    embed = w(k_embed, (VOCAB, HIDDEN))
    lnf = jnp.ones((1, HIDDEN), jnp.float32)
    wlm = w(k_lm, (HIDDEN, VOCAB)).astype(jnp.bfloat16)
    # TODO(synk): weights are synthetic/deterministic here; no HF checkpoint is loaded.
    return embed, lnf, wlm, layers


if __name__ == "__main__":
    key = jax.random.PRNGKey(0)
    k_params, k_data = jax.random.split(key)
    params = init_params(k_params)

    token = jnp.array([[11]], dtype=jnp.int32)               # i0
    kv_keys = jax.random.split(k_data, 2 * NUM_LAYERS)
    past_kv = tuple(
        jax.random.normal(k, (1, NUM_HEADS, S_PAST, HEAD_DIM), jnp.float32)
        for k in kv_keys)                                    # i1 .. i64

    outs = second_vicuna_forward(params, token, *past_kv)
    outs = jax.block_until_ready(outs)

    assert len(outs) == 1 + 2 * NUM_LAYERS
    assert outs[0].shape == (1, 1, VOCAB)
    for t in outs[1:]:
        assert t.shape == (1, NUM_HEADS, S_NEW, HEAD_DIM)
    assert all(bool(jnp.all(jnp.isfinite(t))) for t in outs)
    print("KERNEL_OK")
</pallas_src>

<mosaic_0001>
module attributes {stable_mosaic.version = 11 : i64} {
  func.func @fused_decoder_kernel(%arg0: i32, %arg1: memref<1x256xf32, #tpu.memory_space<vmem>>, %arg2: memref<1x128xf32, #tpu.memory_space<vmem>>, %arg3: memref<1x128xf32, #tpu.memory_space<vmem>>, %arg4: memref<1x1x256xf32, #tpu.memory_space<vmem>>, %arg5: memref<1x1x256xf32, #tpu.memory_space<vmem>>, %arg6: memref<1x256x768xbf16, #tpu.memory_space<vmem>>, %arg7: memref<1x256x256xbf16, #tpu.memory_space<vmem>>, %arg8: memref<1x256x1024xbf16, #tpu.memory_space<vmem>>, %arg9: memref<1x512x256xbf16, #tpu.memory_space<vmem>>, %arg10: memref<1x2x7x128xf32, #tpu.memory_space<vmem>>, %arg11: memref<1x2x7x128xf32, #tpu.memory_space<vmem>>, %arg12: memref<1x256xf32, #tpu.memory_space<vmem>>, %arg13: memref<256x512xbf16, #tpu.memory_space<vmem>>, %arg14: memref<1x512xf32, #tpu.memory_space<vmem>>, %arg15: memref<1x2x8x128xf32, #tpu.memory_space<vmem>>, %arg16: memref<1x2x8x128xf32, #tpu.memory_space<vmem>>, %arg17: memref<1x256xf32, #tpu.memory_space<vmem>>) attributes {dimension_semantics = [#tpu.dimension_semantics<arbitrary>], iteration_bounds = array<i64: 32>, scalar_prefetch = 0 : i64, scratch_operands = 1 : i64, tpu.core_type = #tpu.core_type<tc>, window_params = [{pipeline_mode = #tpu.pipeline_mode<synchronous>, transform_indices = @transform_0, window_bounds = array<i64: 1, 256>}, {pipeline_mode = #tpu.pipeline_mode<synchronous>, transform_indices = @transform_1, window_bounds = array<i64: 1, 128>}, {pipeline_mode = #tpu.pipeline_mode<synchronous>, transform_indices = @transform_2, window_bounds = array<i64: 1, 128>}, {transform_indices = @transform_3, window_bounds = array<i64: 1, 1, 256>}, {transform_indices = @transform_4, window_bounds = array<i64: 1, 1, 256>}, {transform_indices = @transform_5, window_bounds = array<i64: 1, 256, 768>}, {transform_indices = @transform_6, window_bounds = array<i64: 1, 256, 256>}, {transform_indices = @transform_7, window_bounds = array<i64: 1, 256, 1024>}, {transform_indices = @transform_8, window_bounds = array<i64: 1, 512, 256>}, {transform_indices = @transform_9, window_bounds = array<i64: 1, 2, 7, 128>}, {transform_indices = @transform_10, window_bounds = array<i64: 1, 2, 7, 128>}, {pipeline_mode = #tpu.pipeline_mode<synchronous>, transform_indices = @transform_11, window_bounds = array<i64: 1, 256>}, {pipeline_mode = #tpu.pipeline_mode<synchronous>, transform_indices = @transform_12, window_bounds = array<i64: 256, 512>}, {pipeline_mode = #tpu.pipeline_mode<synchronous>, transform_indices = @transform_13, window_bounds = array<i64: 1, 512>}, {transform_indices = @transform_14, window_bounds = array<i64: 1, 2, 8, 128>}, {transform_indices = @transform_15, window_bounds = array<i64: 1, 2, 8, 128>}]} {
    %c0_i32 = arith.constant 0 : i32
    %0 = arith.cmpi eq, %arg0, %c0_i32 : i32
    %1 = arith.extui %0 : i1 to i32
    %c0_i32_0 = arith.constant 0 : i32
    %2 = arith.cmpi ne, %1, %c0_i32_0 : i32
    scf.if %2 {
      %c0_96 = arith.constant 0 : index
      %c0_97 = arith.constant 0 : index
      %148 = vector.load %arg1[%c0_96, %c0_97] : memref<1x256xf32, #tpu.memory_space<vmem>>, vector<1x256xf32>
      %c0_98 = arith.constant 0 : index
      %c0_99 = arith.constant 0 : index
      %149 = vector.load %arg17[%c0_98, %c0_99] : memref<1x256xf32, #tpu.memory_space<vmem>>, vector<1x256xf32>
      tpu.vector_store %arg17[%c0_98, %c0_99], %148 {strides = array<i32>} : memref<1x256xf32, #tpu.memory_space<vmem>>, vector<1x256xf32>,
    } else {
    }
    %c0 = arith.constant 0 : index
    %c0_1 = arith.constant 0 : index
    %3 = vector.load %arg17[%c0, %c0_1] : memref<1x256xf32, #tpu.memory_space<vmem>>, vector<1x256xf32>
    %c0_2 = arith.constant 0 : index
    %c0_3 = arith.constant 0 : index
    %c0_4 = arith.constant 0 : index
    %4 = vector.load %arg4[%c0_2, %c0_3, %c0_4] : memref<1x1x256xf32, #tpu.memory_space<vmem>>, vector<1x1x256xf32>
    %5 = vector.shape_cast %4 : vector<1x1x256xf32> to vector<1x256xf32>
    %6 = arith.mulf %3, %3 : vector<1x256xf32>
    %cst = arith.constant dense<0.000000e+00> : vector<1xf32>
    %7 = vector.multi_reduction <add>, %6, %cst [1] : vector<1x256xf32> to vector<1xf32>
    %8 = vector.shape_cast %7 : vector<1xf32> to vector<1x1xf32>
    %cst_5 = arith.constant 2.560000e+02 : f32
    %9 = vector.broadcast %cst_5 : f32 to vector<1x1xf32>
    %10 = arith.divf %8, %9 : vector<1x1xf32>
    %cst_6 = arith.constant 9.99999997E-7 : f32
    %11 = vector.broadcast %cst_6 : f32 to vector<1x1xf32>
    %12 = arith.addf %10, %11 : vector<1x1xf32>
    %13 = math.rsqrt %12 : vector<1x1xf32>
    %14 = vector.broadcast %13 : vector<1x1xf32> to vector<1x256xf32>
    %15 = arith.mulf %3, %14 : vector<1x256xf32>
    %16 = arith.mulf %15, %5 : vector<1x256xf32>
    %17 = arith.truncf %16 : vector<1x256xf32> to vector<1x256xbf16>
    %c0_7 = arith.constant 0 : index
    %c0_8 = arith.constant 0 : index
    %c0_9 = arith.constant 0 : index
    %18 = vector.load %arg6[%c0_7, %c0_8, %c0_9] : memref<1x256x768xbf16, #tpu.memory_space<vmem>>, vector<1x256x768xbf16>
    %19 = vector.shape_cast %18 : vector<1x256x768xbf16> to vector<256x768xbf16>
    %cst_10 = arith.constant dense<0.000000e+00> : vector<1x768xf32>
    %20 = tpu.matmul %17, %19, %cst_10 {dimension_numbers = #tpu.dot_dimension_numbers<[1], [0], [0], [1], [0, 0, 1, 1], [], []>} : vector<1x256xbf16>, vector<256x768xbf16>, vector<1x768xf32> -> vector<1x768xf32>
    %c0_11 = arith.constant 0 : index
    %c0_12 = arith.constant 0 : index
    %21 = vector.load %arg2[%c0_11, %c0_12] : memref<1x128xf32, #tpu.memory_space<vmem>>, vector<1x128xf32>
    %c0_13 = arith.constant 0 : index
    %c0_14 = arith.constant 0 : index
    %22 = vector.load %arg3[%c0_13, %c0_14] : memref<1x128xf32, #tpu.memory_space<vmem>>, vector<1x128xf32>
    %c0_15 = arith.constant 0 : index
    %c0_16 = arith.constant 0 : index
    %c0_17 = arith.constant 0 : index
    %c0_18 = arith.constant 0 : index
    %23 = vector.load %arg10[%c0_15, %c0_16, %c0_17, %c0_18] : memref<1x2x7x128xf32, #tpu.memory_space<vmem>>, vector<1x2x7x128xf32>
    %24 = vector.shape_cast %23 : vector<1x2x7x128xf32> to vector<2x7x128xf32>
    %c0_19 = arith.constant 0 : index
    %c0_20 = arith.constant 0 : index
    %c0_21 = arith.constant 0 : index
    %c0_22 = arith.constant 0 : index
    %25 = vector.load %arg15[%c0_19, %c0_20, %c0_21, %c0_22] : memref<1x2x8x128xf32, #tpu.memory_space<vmem>>, vector<1x2x7x128xf32>
    %26 = vector.shape_cast %25 : vector<1x2x7x128xf32> to vector<2x7x128xf32>
    %27 = vector.shape_cast %24 : vector<2x7x128xf32> to vector<1x2x7x128xf32>
    tpu.vector_store %arg15[%c0_19, %c0_20, %c0_21, %c0_22], %27 {strides = array<i32>} : memref<1x2x8x128xf32, #tpu.memory_space<vmem>>, vector<1x2x7x128xf32>,
    %c0_23 = arith.constant 0 : index
    %c0_24 = arith.constant 0 : index
    %c0_25 = arith.constant 0 : index
    %c0_26 = arith.constant 0 : index
    %28 = vector.load %arg11[%c0_23, %c0_24, %c0_25, %c0_26] : memref<1x2x7x128xf32, #tpu.memory_space<vmem>>, vector<1x2x7x128xf32>
    %29 = vector.shape_cast %28 : vector<1x2x7x128xf32> to vector<2x7x128xf32>
    %c0_27 = arith.constant 0 : index
    %c0_28 = arith.constant 0 : index
    %c0_29 = arith.constant 0 : index
    %c0_30 = arith.constant 0 : index
    %30 = vector.load %arg16[%c0_27, %c0_28, %c0_29, %c0_30] : memref<1x2x8x128xf32, #tpu.memory_space<vmem>>, vector<1x2x7x128xf32>
    %31 = vector.shape_cast %30 : vector<1x2x7x128xf32> to vector<2x7x128xf32>
    %32 = vector.shape_cast %29 : vector<2x7x128xf32> to vector<1x2x7x128xf32>
    tpu.vector_store %arg16[%c0_27, %c0_28, %c0_29, %c0_30], %32 {strides = array<i32>} : memref<1x2x8x128xf32, #tpu.memory_space<vmem>>, vector<1x2x7x128xf32>,
    %33 = vector.extract_strided_slice %20 {offsets = [0, 0], sizes = [1, 128], strides = [1, 1]} : vector<1x768xf32> to vector<1x128xf32>
    %34 = vector.extract_strided_slice %20 {offsets = [0, 256], sizes = [1, 128], strides = [1, 1]} : vector<1x768xf32> to vector<1x128xf32>
    %35 = vector.extract_strided_slice %20 {offsets = [0, 512], sizes = [1, 128], strides = [1, 1]} : vector<1x768xf32> to vector<1x128xf32>
    %36 = arith.mulf %33, %21 : vector<1x128xf32>
    %c64_i32 = arith.constant 64 : i32
    %37 = tpu.dynamic_rotate %33 by %c64_i32 dim 1 : vector<1x128xf32>, i32 -> vector<1x128xf32>
    %38 = arith.mulf %37, %22 : vector<1x128xf32>
    %39 = arith.addf %36, %38 : vector<1x128xf32>
    %40 = arith.mulf %34, %21 : vector<1x128xf32>
    %c64_i32_31 = arith.constant 64 : i32
    %41 = tpu.dynamic_rotate %34 by %c64_i32_31 dim 1 : vector<1x128xf32>, i32 -> vector<1x128xf32>
    %42 = arith.mulf %41, %22 : vector<1x128xf32>
    %43 = arith.addf %40, %42 : vector<1x128xf32>
    %c0_32 = arith.constant 0 : index
    %c0_33 = arith.constant 0 : index
    %c7 = arith.constant 7 : index
    %c0_34 = arith.constant 0 : index
    %44 = vector.load %arg15[%c0_32, %c0_33, %c7, %c0_34] : memref<1x2x8x128xf32, #tpu.memory_space<vmem>>, vector<1x1x1x128xf32>
    %45 = vector.shape_cast %44 : vector<1x1x1x128xf32> to vector<1x128xf32>
    %46 = vector.shape_cast %43 : vector<1x128xf32> to vector<1x1x1x128xf32>
    tpu.vector_store %arg15[%c0_32, %c0_33, %c7, %c0_34], %46 {strides = array<i32>} : memref<1x2x8x128xf32, #tpu.memory_space<vmem>>, vector<1x1x1x128xf32>,
    %c0_35 = arith.constant 0 : index
    %c0_36 = arith.constant 0 : index
    %c7_37 = arith.constant 7 : index
    %c0_38 = arith.constant 0 : index
    %47 = vector.load %arg16[%c0_35, %c0_36, %c7_37, %c0_38] : memref<1x2x8x128xf32, #tpu.memory_space<vmem>>, vector<1x1x1x128xf32>
    %48 = vector.shape_cast %47 : vector<1x1x1x128xf32> to vector<1x128xf32>
    %49 = vector.shape_cast %35 : vector<1x128xf32> to vector<1x1x1x128xf32>
    tpu.vector_store %arg16[%c0_35, %c0_36, %c7_37, %c0_38], %49 {strides = array<i32>} : memref<1x2x8x128xf32, #tpu.memory_space<vmem>>, vector<1x1x1x128xf32>,
    %c0_39 = arith.constant 0 : index
    %c0_40 = arith.constant 0 : index
    %c0_41 = arith.constant 0 : index
    %c0_42 = arith.constant 0 : index
    %50 = vector.load %arg10[%c0_39, %c0_40, %c0_41, %c0_42] : memref<1x2x7x128xf32, #tpu.memory_space<vmem>>, vector<1x1x7x128xf32>
    %51 = vector.shape_cast %50 : vector<1x1x7x128xf32> to vector<7x128xf32>
    %52 = tpu.concatenate %51, %43 in 0 : vector<7x128xf32>, vector<1x128xf32> -> vector<8x128xf32>
    %c0_43 = arith.constant 0 : index
    %c0_44 = arith.constant 0 : index
    %c0_45 = arith.constant 0 : index
    %c0_46 = arith.constant 0 : index
    %53 = vector.load %arg11[%c0_43, %c0_44, %c0_45, %c0_46] : memref<1x2x7x128xf32, #tpu.memory_space<vmem>>, vector<1x1x7x128xf32>
    %54 = vector.shape_cast %53 : vector<1x1x7x128xf32> to vector<7x128xf32>
    %55 = tpu.concatenate %54, %35 in 0 : vector<7x128xf32>, vector<1x128xf32> -> vector<8x128xf32>
    %cst_47 = arith.constant 0.0883883461 : f32
    %56 = vector.broadcast %cst_47 : f32 to vector<1x128xf32>
    %57 = arith.mulf %39, %56 : vector<1x128xf32>
    %cst_48 = arith.constant dense<0.000000e+00> : vector<1x8xf32>
    %58 = tpu.matmul %57, %52, %cst_48 {dimension_numbers = #tpu.dot_dimension_numbers<[1], [1], [0], [0], [0, 0, 1, 0], [], []>} : vector<1x128xf32>, vector<8x128xf32>, vector<1x8xf32> -> vector<1x8xf32>
    %cst_49 = arith.constant dense<0xFF800000> : vector<1xf32>
    %59 = vector.multi_reduction <maximumf>, %58, %cst_49 [1] : vector<1x8xf32> to vector<1xf32>
    %60 = vector.shape_cast %59 : vector<1xf32> to vector<1x1xf32>
    %61 = vector.broadcast %60 : vector<1x1xf32> to vector<1x8xf32>
    %62 = arith.subf %58, %61 : vector<1x8xf32>
    %63 = math.exp %62 : vector<1x8xf32>
    %cst_50 = arith.constant dense<0.000000e+00> : vector<1xf32>
    %64 = vector.multi_reduction <add>, %63, %cst_50 [1] : vector<1x8xf32> to vector<1xf32>
    %65 = vector.shape_cast %64 : vector<1xf32> to vector<1x1xf32>
    %66 = tpu.reciprocal %65 {approx = true} : vector<1x1xf32> -> vector<1x1xf32>
    %67 = vector.broadcast %66 : vector<1x1xf32> to vector<1x8xf32>
    %68 = arith.mulf %63, %67 : vector<1x8xf32>
    %cst_51 = arith.constant dense<0.000000e+00> : vector<1x128xf32>
    %69 = tpu.matmul %68, %55, %cst_51 {dimension_numbers = #tpu.dot_dimension_numbers<[1], [0], [0], [1], [0, 0, 1, 1], [], []>} : vector<1x8xf32>, vector<8x128xf32>, vector<1x128xf32> -> vector<1x128xf32>
    %70 = vector.extract_strided_slice %20 {offsets = [0, 128], sizes = [1, 128], strides = [1, 1]} : vector<1x768xf32> to vector<1x128xf32>
    %71 = vector.extract_strided_slice %20 {offsets = [0, 384], sizes = [1, 128], strides = [1, 1]} : vector<1x768xf32> to vector<1x128xf32>
    %72 = vector.extract_strided_slice %20 {offsets = [0, 640], sizes = [1, 128], strides = [1, 1]} : vector<1x768xf32> to vector<1x128xf32>
    %73 = arith.mulf %70, %21 : vector<1x128xf32>
    %c64_i32_52 = arith.constant 64 : i32
    %74 = tpu.dynamic_rotate %70 by %c64_i32_52 dim 1 : vector<1x128xf32>, i32 -> vector<1x128xf32>
    %75 = arith.mulf %74, %22 : vector<1x128xf32>
    %76 = arith.addf %73, %75 : vector<1x128xf32>
    %77 = arith.mulf %71, %21 : vector<1x128xf32>
    %c64_i32_53 = arith.constant 64 : i32
    %78 = tpu.dynamic_rotate %71 by %c64_i32_53 dim 1 : vector<1x128xf32>, i32 -> vector<1x128xf32>
    %79 = arith.mulf %78, %22 : vector<1x128xf32>
    %80 = arith.addf %77, %79 : vector<1x128xf32>
    %c0_54 = arith.constant 0 : index
    %c1 = arith.constant 1 : index
    %c7_55 = arith.constant 7 : index
    %c0_56 = arith.constant 0 : index
    %81 = vector.load %arg15[%c0_54, %c1, %c7_55, %c0_56] : memref<1x2x8x128xf32, #tpu.memory_space<vmem>>, vector<1x1x1x128xf32>
    %82 = vector.shape_cast %81 : vector<1x1x1x128xf32> to vector<1x128xf32>
    %83 = vector.shape_cast %80 : vector<1x128xf32> to vector<1x1x1x128xf32>
    tpu.vector_store %arg15[%c0_54, %c1, %c7_55, %c0_56], %83 {strides = array<i32>} : memref<1x2x8x128xf32, #tpu.memory_space<vmem>>, vector<1x1x1x128xf32>,
    %c0_57 = arith.constant 0 : index
    %c1_58 = arith.constant 1 : index
    %c7_59 = arith.constant 7 : index
    %c0_60 = arith.constant 0 : index
    %84 = vector.load %arg16[%c0_57, %c1_58, %c7_59, %c0_60] : memref<1x2x8x128xf32, #tpu.memory_space<vmem>>, vector<1x1x1x128xf32>
    %85 = vector.shape_cast %84 : vector<1x1x1x128xf32> to vector<1x128xf32>
    %86 = vector.shape_cast %72 : vector<1x128xf32> to vector<1x1x1x128xf32>
    tpu.vector_store %arg16[%c0_57, %c1_58, %c7_59, %c0_60], %86 {strides = array<i32>} : memref<1x2x8x128xf32, #tpu.memory_space<vmem>>, vector<1x1x1x128xf32>,
    %c0_61 = arith.constant 0 : index
    %c1_62 = arith.constant 1 : index
    %c0_63 = arith.constant 0 : index
    %c0_64 = arith.constant 0 : index
    %87 = vector.load %arg10[%c0_61, %c1_62, %c0_63, %c0_64] : memref<1x2x7x128xf32, #tpu.memory_space<vmem>>, vector<1x1x7x128xf32>
    %88 = vector.shape_cast %87 : vector<1x1x7x128xf32> to vector<7x128xf32>
    %89 = tpu.concatenate %88, %80 in 0 : vector<7x128xf32>, vector<1x128xf32> -> vector<8x128xf32>
    %c0_65 = arith.constant 0 : index
    %c1_66 = arith.constant 1 : index
    %c0_67 = arith.constant 0 : index
    %c0_68 = arith.constant 0 : index
    %90 = vector.load %arg11[%c0_65, %c1_66, %c0_67, %c0_68] : memref<1x2x7x128xf32, #tpu.memory_space<vmem>>, vector<1x1x7x128xf32>
    %91 = vector.shape_cast %90 : vector<1x1x7x128xf32> to vector<7x128xf32>
    %92 = tpu.concatenate %91, %72 in 0 : vector<7x128xf32>, vector<1x128xf32> -> vector<8x128xf32>
    %cst_69 = arith.constant 0.0883883461 : f32
    %93 = vector.broadcast %cst_69 : f32 to vector<1x128xf32>
    %94 = arith.mulf %76, %93 : vector<1x128xf32>
    %cst_70 = arith.constant dense<0.000000e+00> : vector<1x8xf32>
    %95 = tpu.matmul %94, %89, %cst_70 {dimension_numbers = #tpu.dot_dimension_numbers<[1], [1], [0], [0], [0, 0, 1, 0], [], []>} : vector<1x128xf32>, vector<8x128xf32>, vector<1x8xf32> -> vector<1x8xf32>
    %cst_71 = arith.constant dense<0xFF800000> : vector<1xf32>
    %96 = vector.multi_reduction <maximumf>, %95, %cst_71 [1] : vector<1x8xf32> to vector<1xf32>
    %97 = vector.shape_cast %96 : vector<1xf32> to vector<1x1xf32>
    %98 = vector.broadcast %97 : vector<1x1xf32> to vector<1x8xf32>
    %99 = arith.subf %95, %98 : vector<1x8xf32>
    %100 = math.exp %99 : vector<1x8xf32>
    %cst_72 = arith.constant dense<0.000000e+00> : vector<1xf32>
    %101 = vector.multi_reduction <add>, %100, %cst_72 [1] : vector<1x8xf32> to vector<1xf32>
    %102 = vector.shape_cast %101 : vector<1xf32> to vector<1x1xf32>
    %103 = tpu.reciprocal %102 {approx = true} : vector<1x1xf32> -> vector<1x1xf32>
    %104 = vector.broadcast %103 : vector<1x1xf32> to vector<1x8xf32>
    %105 = arith.mulf %100, %104 : vector<1x8xf32>
    %cst_73 = arith.constant dense<0.000000e+00> : vector<1x128xf32>
    %106 = tpu.matmul %105, %92, %cst_73 {dimension_numbers = #tpu.dot_dimension_numbers<[1], [0], [0], [1], [0, 0, 1, 1], [], []>} : vector<1x8xf32>, vector<8x128xf32>, vector<1x128xf32> -> vector<1x128xf32>
    %107 = tpu.concatenate %69, %106 in 1 : vector<1x128xf32>, vector<1x128xf32> -> vector<1x256xf32>
    %108 = arith.truncf %107 : vector<1x256xf32> to vector<1x256xbf16>
    %c0_74 = arith.constant 0 : index
    %c0_75 = arith.constant 0 : index
    %c0_76 = arith.constant 0 : index
    %109 = vector.load %arg7[%c0_74, %c0_75, %c0_76] : memref<1x256x256xbf16, #tpu.memory_space<vmem>>, vector<1x256x256xbf16>
    %110 = vector.shape_cast %109 : vector<1x256x256xbf16> to vector<256x256xbf16>
    %cst_77 = arith.constant dense<0.000000e+00> : vector<1x256xf32>
    %111 = tpu.matmul %108, %110, %cst_77 {dimension_numbers = #tpu.dot_dimension_numbers<[1], [0], [0], [1], [0, 0, 1, 1], [], []>} : vector<1x256xbf16>, vector<256x256xbf16>, vector<1x256xf32> -> vector<1x256xf32>
    %112 = arith.addf %3, %111 : vector<1x256xf32>
    %c0_78 = arith.constant 0 : index
    %c0_79 = arith.constant 0 : index
    %c0_80 = arith.constant 0 : index
    %113 = vector.load %arg5[%c0_78, %c0_79, %c0_80] : memref<1x1x256xf32, #tpu.memory_space<vmem>>, vector<1x1x256xf32>
    %114 = vector.shape_cast %113 : vector<1x1x256xf32> to vector<1x256xf32>
    %115 = arith.mulf %112, %112 : vector<1x256xf32>
    %cst_81 = arith.constant dense<0.000000e+00> : vector<1xf32>
    %116 = vector.multi_reduction <add>, %115, %cst_81 [1] : vector<1x256xf32> to vector<1xf32>
    %117 = vector.shape_cast %116 : vector<1xf32> to vector<1x1xf32>
    %cst_82 = arith.constant 2.560000e+02 : f32
    %118 = vector.broadcast %cst_82 : f32 to vector<1x1xf32>
    %119 = arith.divf %117, %118 : vector<1x1xf32>
    %cst_83 = arith.constant 9.99999997E-7 : f32
    %120 = vector.broadcast %cst_83 : f32 to vector<1x1xf32>
    %121 = arith.addf %119, %120 : vector<1x1xf32>
    %122 = math.rsqrt %121 : vector<1x1xf32>
    %123 = vector.broadcast %122 : vector<1x1xf32> to vector<1x256xf32>
    %124 = arith.mulf %112, %123 : vector<1x256xf32>
    %125 = arith.mulf %124, %114 : vector<1x256xf32>
    %126 = arith.truncf %125 : vector<1x256xf32> to vector<1x256xbf16>
    %c0_84 = arith.constant 0 : index
    %c0_85 = arith.constant 0 : index
    %c0_86 = arith.constant 0 : index
    %127 = vector.load %arg8[%c0_84, %c0_85, %c0_86] : memref<1x256x1024xbf16, #tpu.memory_space<vmem>>, vector<1x256x1024xbf16>
    %128 = vector.shape_cast %127 : vector<1x256x1024xbf16> to vector<256x1024xbf16>
    %cst_87 = arith.constant dense<0.000000e+00> : vector<1x1024xf32>
    %129 = tpu.matmul %126, %128, %cst_87 {dimension_numbers = #tpu.dot_dimension_numbers<[1], [0], [0], [1], [0, 0, 1, 1], [], []>} : vector<1x256xbf16>, vector<256x1024xbf16>, vector<1x1024xf32> -> vector<1x1024xf32>
    %130 = vector.extract_strided_slice %129 {offsets = [0, 0], sizes = [1, 512], strides = [1, 1]} : vector<1x1024xf32> to vector<1x512xf32>
    %131 = vector.extract_strided_slice %129 {offsets = [0, 512], sizes = [1, 512], strides = [1, 1]} : vector<1x1024xf32> to vector<1x512xf32>
    %132 = arith.negf %130 : vector<1x512xf32>
    %133 = math.exp %132 : vector<1x512xf32>
    %cst_88 = arith.constant 1.000000e+00 : f32
    %134 = vector.broadcast %cst_88 : f32 to vector<1x512xf32>
    %135 = arith.addf %134, %133 : vector<1x512xf32>
    %136 = arith.divf %134, %135 : vector<1x512xf32>
    %137 = arith.mulf %130, %136 : vector<1x512xf32>
    %138 = arith.mulf %137, %131 : vector<1x512xf32>
    %139 = arith.truncf %138 : vector<1x512xf32> to vector<1x512xbf16>
    %c0_89 = arith.constant 0 : index
    %c0_90 = arith.constant 0 : index
    %c0_91 = arith.constant 0 : index
    %140 = vector.load %arg9[%c0_89, %c0_90, %c0_91] : memref<1x512x256xbf16, #tpu.memory_space<vmem>>, vector<1x512x256xbf16>
    %141 = vector.shape_cast %140 : vector<1x512x256xbf16> to vector<512x256xbf16>
    %cst_92 = arith.constant dense<0.000000e+00> : vector<1x256xf32>
    %142 = tpu.matmul %139, %141, %cst_92 {dimension_numbers = #tpu.dot_dimension_numbers<[1], [0], [0], [1], [0, 0, 1, 1], [], []>} : vector<1x512xbf16>, vector<512x256xbf16>, vector<1x256xf32> -> vector<1x256xf32>
    %143 = arith.addf %112, %142 : vector<1x256xf32>
    %c0_93 = arith.constant 0 : index
    %c0_94 = arith.constant 0 : index
    %144 = vector.load %arg17[%c0_93, %c0_94] : memref<1x256xf32, #tpu.memory_space<vmem>>, vector<1x256xf32>
    tpu.vector_store %arg17[%c0_93, %c0_94], %143 {strides = array<i32>} : memref<1x256xf32, #tpu.memory_space<vmem>>, vector<1x256xf32>,
    %c31_i32 = arith.constant 31 : i32
    %145 = arith.cmpi eq, %arg0, %c31_i32 : i32
    %146 = arith.extui %145 : i1 to i32
    %c0_i32_95 = arith.constant 0 : i32
    %147 = arith.cmpi ne, %146, %c0_i32_95 : i32
    scf.if %147 {
      %c0_96 = arith.constant 0 : index
      %c0_97 = arith.constant 0 : index
      %148 = vector.load %arg12[%c0_96, %c0_97] : memref<1x256xf32, #tpu.memory_space<vmem>>, vector<1x256xf32>
      %149 = arith.mulf %143, %143 : vector<1x256xf32>
      %cst_98 = arith.constant dense<0.000000e+00> : vector<1xf32>
      %150 = vector.multi_reduction <add>, %149, %cst_98 [1] : vector<1x256xf32> to vector<1xf32>
      %151 = vector.shape_cast %150 : vector<1xf32> to vector<1x1xf32>
      %cst_99 = arith.constant 2.560000e+02 : f32
      %152 = vector.broadcast %cst_99 : f32 to vector<1x1xf32>
      %153 = arith.divf %151, %152 : vector<1x1xf32>
      %cst_100 = arith.constant 9.99999997E-7 : f32
      %154 = vector.broadcast %cst_100 : f32 to vector<1x1xf32>
      %155 = arith.addf %153, %154 : vector<1x1xf32>
      %156 = math.rsqrt %155 : vector<1x1xf32>
      %157 = vector.broadcast %156 : vector<1x1xf32> to vector<1x256xf32>
      %158 = arith.mulf %143, %157 : vector<1x256xf32>
      %159 = arith.mulf %158, %148 : vector<1x256xf32>
      %160 = arith.truncf %159 : vector<1x256xf32> to vector<1x256xbf16>
      %c0_101 = arith.constant 0 : index
      %c0_102 = arith.constant 0 : index
      %161 = vector.load %arg13[%c0_101, %c0_102] : memref<256x512xbf16, #tpu.memory_space<vmem>>, vector<256x512xbf16>
      %cst_103 = arith.constant dense<0.000000e+00> : vector<1x512xf32>
      %162 = tpu.matmul %160, %161, %cst_103 {dimension_numbers = #tpu.dot_dimension_numbers<[1], [0], [0], [1], [0, 0, 1, 1], [], []>} : vector<1x256xbf16>, vector<256x512xbf16>, vector<1x512xf32> -> vector<1x512xf32>
      %c0_104 = arith.constant 0 : index
      %c0_105 = arith.constant 0 : index
      %163 = vector.load %arg14[%c0_104, %c0_105] : memref<1x512xf32, #tpu.memory_space<vmem>>, vector<1x512xf32>
      tpu.vector_store %arg14[%c0_104, %c0_105], %162 {strides = array<i32>} : memref<1x512xf32, #tpu.memory_space<vmem>>, vector<1x512xf32>,
    } else {
    }
    return
  }
  func.func @transform_0(%arg0: i32) -> (i32, i32) {
    %c0_i32 = arith.constant 0 : i32
    %c0_i32_0 = arith.constant 0 : i32
    %c0_i32_1 = arith.constant 0 : i32
    return %c0_i32, %c0_i32_0 : i32, i32
  }
  func.func @transform_1(%arg0: i32) -> (i32, i32) {
    %c0_i32 = arith.constant 0 : i32
    %c0_i32_0 = arith.constant 0 : i32
    %c0_i32_1 = arith.constant 0 : i32
    return %c0_i32, %c0_i32_0 : i32, i32
  }
  func.func @transform_2(%arg0: i32) -> (i32, i32) {
    %c0_i32 = arith.constant 0 : i32
    %c0_i32_0 = arith.constant 0 : i32
    %c0_i32_1 = arith.constant 0 : i32
    return %c0_i32, %c0_i32_0 : i32, i32
  }
  func.func @transform_3(%arg0: i32) -> (i32, i32, i32) {
    %c0_i32 = arith.constant 0 : i32
    %c0_i32_0 = arith.constant 0 : i32
    %c0_i32_1 = arith.constant 0 : i32
    return %arg0, %c0_i32, %c0_i32_0 : i32, i32, i32
  }
  func.func @transform_4(%arg0: i32) -> (i32, i32, i32) {
    %c0_i32 = arith.constant 0 : i32
    %c0_i32_0 = arith.constant 0 : i32
    %c0_i32_1 = arith.constant 0 : i32
    return %arg0, %c0_i32, %c0_i32_0 : i32, i32, i32
  }
  func.func @transform_5(%arg0: i32) -> (i32, i32, i32) {
    %c0_i32 = arith.constant 0 : i32
    %c0_i32_0 = arith.constant 0 : i32
    %c0_i32_1 = arith.constant 0 : i32
    return %arg0, %c0_i32, %c0_i32_0 : i32, i32, i32
  }
  func.func @transform_6(%arg0: i32) -> (i32, i32, i32) {
    %c0_i32 = arith.constant 0 : i32
    %c0_i32_0 = arith.constant 0 : i32
    %c0_i32_1 = arith.constant 0 : i32
    return %arg0, %c0_i32, %c0_i32_0 : i32, i32, i32
  }
  func.func @transform_7(%arg0: i32) -> (i32, i32, i32) {
    %c0_i32 = arith.constant 0 : i32
    %c0_i32_0 = arith.constant 0 : i32
    %c0_i32_1 = arith.constant 0 : i32
    return %arg0, %c0_i32, %c0_i32_0 : i32, i32, i32
  }
  func.func @transform_8(%arg0: i32) -> (i32, i32, i32) {
    %c0_i32 = arith.constant 0 : i32
    %c0_i32_0 = arith.constant 0 : i32
    %c0_i32_1 = arith.constant 0 : i32
    return %arg0, %c0_i32, %c0_i32_0 : i32, i32, i32
  }
  func.func @transform_9(%arg0: i32) -> (i32, i32, i32, i32) {
    %c0_i32 = arith.constant 0 : i32
    %c0_i32_0 = arith.constant 0 : i32
    %c0_i32_1 = arith.constant 0 : i32
    %c0_i32_2 = arith.constant 0 : i32
    return %arg0, %c0_i32, %c0_i32_0, %c0_i32_1 : i32, i32, i32, i32
  }
  func.func @transform_10(%arg0: i32) -> (i32, i32, i32, i32) {
    %c0_i32 = arith.constant 0 : i32
    %c0_i32_0 = arith.constant 0 : i32
    %c0_i32_1 = arith.constant 0 : i32
    %c0_i32_2 = arith.constant 0 : i32
    return %arg0, %c0_i32, %c0_i32_0, %c0_i32_1 : i32, i32, i32, i32
  }
  func.func @transform_11(%arg0: i32) -> (i32, i32) {
    %c0_i32 = arith.constant 0 : i32
    %c0_i32_0 = arith.constant 0 : i32
    %c0_i32_1 = arith.constant 0 : i32
    return %c0_i32, %c0_i32_0 : i32, i32
  }
  func.func @transform_12(%arg0: i32) -> (i32, i32) {
    %c0_i32 = arith.constant 0 : i32
    %c0_i32_0 = arith.constant 0 : i32
    %c0_i32_1 = arith.constant 0 : i32
    return %c0_i32, %c0_i32_0 : i32, i32
  }
  func.func @transform_13(%arg0: i32) -> (i32, i32) {
    %c0_i32 = arith.constant 0 : i32
    %c0_i32_0 = arith.constant 0 : i32
    %c0_i32_1 = arith.constant 0 : i32
    return %c0_i32, %c0_i32_0 : i32, i32
  }
  func.func @transform_14(%arg0: i32) -> (i32, i32, i32, i32) {
    %c0_i32 = arith.constant 0 : i32
    %c0_i32_0 = arith.constant 0 : i32
    %c0_i32_1 = arith.constant 0 : i32
    %c0_i32_2 = arith.constant 0 : i32
    return %arg0, %c0_i32, %c0_i32_0, %c0_i32_1 : i32, i32, i32, i32
  }
  func.func @transform_15(%arg0: i32) -> (i32, i32, i32, i32) {
    %c0_i32 = arith.constant 0 : i32
    %c0_i32_0 = arith.constant 0 : i32
    %c0_i32_1 = arith.constant 0 : i32
    %c0_i32_2 = arith.constant 0 : i32
    return %arg0, %c0_i32, %c0_i32_0, %c0_i32_1 : i32, i32, i32, i32
  }
}

</mosaic_0001>

<bundles_post_ra>
// kernel: second_vicuna_forward.1
= control target key start
LH: loop header
LB: loop body
LE: loop exit
PB: predicated region body
PF: predicated region fallthrough
CT: control target
= control target key end

     0   :  { %s6695_s0 = inlined_call_operand.vmem [shape: f32[1,256], index: 0, kind: input, shape index: {}]   ;;  %s6696_s1 = inlined_call_operand.vmem [shape: f32[1,128], index: 1, kind: input, shape index: {}]   ;;  %s6697_s2 = inlined_call_operand.vmem [shape: f32[1,128], index: 2, kind: input, shape index: {}]   ;;  %s6698_s3 = inlined_call_operand.hbm [shape: f32[32,1,256], index: 3, kind: input, shape index: {}]   ;;  %s6699_s4 = inlined_call_operand.hbm [shape: f32[32,1,256], index: 4, kind: input, shape index: {}]   ;;  %s6700_s5 = inlined_call_operand.hbm [shape: bf16[32,256,768], index: 5, kind: input, shape index: {}]   ;;  %s6701_s6 = inlined_call_operand.hbm [shape: bf16[32,256,256], index: 6, kind: input, shape index: {}]   ;;  %s6702_s7 = inlined_call_operand.hbm [shape: bf16[32,256,1024], index: 7, kind: input, shape index: {}]   ;;  %s6703_s8 = inlined_call_operand.hbm [shape: bf16[32,512,256], index: 8, kind: input, shape index: {}]   ;;  %s6704_s9 = inlined_call_operand.vmem [shape: f32[32,2,7,128], index: 9, kind: input, shape index: {}]   ;;  %s6705_s10 = inlined_call_operand.vmem [shape: f32[32,2,7,128], index: 10, kind: input, shape index: {}]   ;;  %s6706_s11 = inlined_call_operand.hbm [shape: f32[1,256], index: 11, kind: input, shape index: {}]   ;;  %s6707_s12 = inlined_call_operand.hbm [shape: bf16[256,512], index: 12, kind: input, shape index: {}]   ;;  %s6708_s13 = inlined_call_operand.hbm [shape: f32[1,512], index: 13, kind: output, shape index: {0}]   ;;  %s6709_s14 = inlined_call_operand.vmem [shape: f32[32,2,8,128], index: 14, kind: output, shape index: {1}]   ;;  %s6710_s15 = inlined_call_operand.vmem [shape: f32[32,2,8,128], index: 15, kind: output, shape index: {2}]  }
   0x1   :  { %6724 = sst [smem:[#allocation28_spill]] %s6695_s0 }
   0x2   :  { %6725 = sst [smem:[#allocation29_spill]] %s6696_s1 }
   0x3   :  { %6726 = sst [smem:[#allocation30_spill]] %s6697_s2 }
   0x4   :  { %6727 = sst [smem:[#allocation31_spill]] %s6699_s4 }
   0x5   :  { %6728 = sst [smem:[#allocation32_spill]] %s6701_s6 }
   0x6   :  { %6729 = sst [smem:[#allocation33_spill]] %s6705_s10 }
   0x7   :  { %6730 = sst [smem:[#allocation34_spill]] %s6706_s11 }
   0x8   :  { %6731 = sst [smem:[#allocation35_spill]] %s6708_s13 }
   0x9   :  { %6732 = sst [smem:[#allocation36_spill]] %s6709_s14 }
   0xa   :  { %6733 = sst [smem:[#allocation37_spill]] %s6710_s15 }
   0xb   :  { %21 = vsyncpa [#allocation4], 0 }
   0xc   :  { %23 = vsyncpa [#allocation4 + $0x1], 0 }
   0xd   :  { %24 = vsyncpa [#allocation7], 0 }
   0xe   :  { %26 = vsyncpa [#allocation7 + $0x1], 0 }
   0xf   :  { %27 = vsyncpa [#allocation10], 0 }
  0x10   :  { %29 = vsyncpa [#allocation10 + $0x1], 0 }
  0x11   :  { %30 = vsyncpa [#allocation13], 0 }
  0x12   :  { %32 = vsyncpa [#allocation13 + $0x1], 0 }
  0x13   :  { %33 = vsyncpa [#allocation16], 0 }
  0x14   :  { %34 = vsyncpa [#allocation5], 0  ;;  %s5883_s18 = smov 0   ;;  %s5885_s19 = smov 0  }
  0x15   :  { %s5887_s20 = smov 0   ;;  %s5889_s21 = smov 0  }
  0x16 LB: > { %6734 = sst [smem:[#allocation25_spill]] %s5776_s20  ;;  %s5902_s22 = sadd.s32 4294967295, %s5780_s21   ;;  %s5780_s21 = sphi %s5889_s21, %s6770_s21   ;;  %s5776_s20 = sphi %s5887_s20, %s6772_s20   ;;  %s5772_s19 = sphi %s5885_s19, %s6774_s19   ;;  %s5768_s18 = sphi %s5883_s18, %s6773_s18  }
  0x17   : > { %s5905_s23 = sadd.s32 1, %s5780_s21   ;;  %s110_s25 = sadd.s32 1, %s5776_s20 }
  0x18   : > { %6735 = sst [smem:[#allocation26_spill]] %s5905_s23  ;;  %s107_s24 = ssub.s32 %s5780_s21, %s5905_s23 }
  0x19   : > { %p108_p0 = scmp.eq.s32.totalorder %s107_s24, 0  ;;  %p117_p1 = scmp.ne.s32.totalorder %s5776_s20, %s5772_s19 }
  0x1a   : > { %p118_p2 = scmp.eq.s32.totalorder %s5780_s21, 0  ;;  %p123_p3 = scmp.ne.s32.totalorder %s5772_s19, %s5768_s18 }
  0x1b   : > { %s5915_s26 = scalar_select %p108_p0, %s5776_s20, %s110_s25  }
  0x1c   : > { %p5917_p4 = por %p118_p2, %p117_p1  ;;  %p6712_p5 = scmp.eq.s32.totalorder %s5902_s22, 0 }
  0x1d   : > { %6736 = sst [smem:[#allocation27_spill]] %s5915_s26  ;;  %p4483_p6 = scmp.ge.s32.totalorder %s5780_s21, 1 }
  0x1e   : > { %p431_p7 = scmp.lt.s32.totalorder %s5780_s21, 33  ;;  %p5926_p8 = por %p6712_p5, %p123_p3 }
  0x1f   : > { %s5782_s30 = smov [#allocation14]   ;;  %p5011_p12 = scmp.lt.s32.totalorder %s5780_s21, 32 }
  0x20   : > { %s6738_s28 = scalar_select %p5926_p8, 1, 0 }
  0x21   : > { %p5931_p10 = pnand %p4483_p6, %p431_p7  ;;  %s453_s16 = sshll.u32 %s5782_s30, 4  ;;  %s454_s16 = int_to_ptr.vmem [resolvable:$true] %s453_s16 }
  0x22   : > { %s5939_s17 = sand.u32 1, %s5776_s20   ;;  %p5950_p0 = pnand %p5011_p12, %p5917_p4 }
  0x23   : > { %s6739_s29 = scalar_select %p5931_p10, 1, 0 }
  0x24   : > { %p4983_p11 = pneg %p5931_p10  ;;  %s6715_s30 = sshll.u32 %s5780_s21, 5 }
  0x25   : > { %s5956_s26 = sand.u32 1, %s5780_s21   ;;  %s5489_s20 = scalar_lea.vmem %s454_s16, 32 }
  0x26   : > { %p5943_p13 = pnand %p4983_p11, %p6712_p5  ;;  %p5490_p2 = scmp.ne.s32.totalorder %s454_s16, %s5489_s20 }
  0x27   : > { %p5497_p7 = scmp.lt.s32.totalorder %s454_s16, %s454_s16  ;;  %p5498_p11 = scmp.lt.s32.totalorder %s5489_s20, %s5489_s20 }
  0x28   : > { %s6740_s18 = scalar_select %p5943_p13, 1, 0 }
  0x29   : > { %p6716_p1 = pneg %p5943_p13  ;;  %p5499_p9 = por %p5498_p11, %p5497_p7 }
  0x2b   : > { %p5492_p3 = pnand %p5490_p2, %p6716_p1 }
  0x2d   : > { %p5493_p6 = pneg %p5492_p3 }
  0x2f   : > { %p5500_p5 = pnand %p5499_p9, %p5493_p6 }
  0x31   : > { %5503 = shalt.err (!%p5500_p5)
}
  0x32   : > { %s6742_s11 = sld [smem:[#allocation34_spill]]  ;;  %s6744_s20 = sshll.u32 %s5939_s17, 1 }
  0x33   : > { %s6743_s4 = sld [smem:[#allocation31_spill]]  ;;  %s500_s1 = scalar_lea.vmem [#allocation6], %s6744_s20 }
  0x34   : > { %s508_s0 = sshll.u32 %s500_s1, 4  ;;  %p5982_p5 = pneg %p5950_p0  ;;  %s509_s0 = int_to_ptr.vmem [resolvable:$true] %s508_s0 }
  0x38   : > { %4986 = dma.hbm_to_vmem [thread:$0]  (!%p5943_p13), %s6742_s11, 32, %s454_s16, [#allocation13]  }
  0x39   : > { %s5973_s2 = scalar_lea.hbm %s6743_s4, %s6715_s30  ;;  %s5509_s16 = scalar_lea.hbm %s6743_s4, 1024 }
  0x3a   : > { %s5504_s24 = scalar_lea.hbm %s5973_s2, 32  ;;  %p5510_p2 = scmp.lt.s32.totalorder %s5973_s2, %s6743_s4 }
  0x3b   : > { %p5505_p4 = scmp.ne.s32.totalorder %s5973_s2, %s5504_s24  ;;  %p5511_p3 = scmp.lt.s32.totalorder %s5509_s16, %s5504_s24 }
  0x3d   : > { %p5507_p9 = pnand %p5982_p5, %p5505_p4  ;;  %p5512_p6 = por %p5511_p3, %p5510_p2 }
  0x3f   : > { %p5508_p12 = pneg %p5507_p9 }
  0x41   : > { %p5513_p7 = pnand %p5512_p6, %p5508_p12 }
  0x43   : > { %5516 = shalt.err (!%p5513_p7)
}
  0x44   : > { %s5517_s1 = scalar_lea.vmem %s509_s0, 32  ;;  %s5783_s15 = smov [#allocation6]  }
  0x45   : > { %p5518_p11 = scmp.ne.s32.totalorder %s509_s0, %s5517_s1  ;;  %s5522_s11 = sshll.u32 %s5783_s15, 4  ;;  %s5523_s11 = int_to_ptr.vmem [resolvable:$false] %s5522_s11 }
  0x46   : > { %s5524_s14 = scalar_lea.vmem %s5523_s11, 64  ;;  %p5525_p4 = scmp.lt.s32.totalorder %s509_s0, %s5523_s11 }
  0x47   : > { %p5520_p1 = pnand %p5518_p11, %p5982_p5  ;;  %p5526_p9 = scmp.lt.s32.totalorder %s5524_s14, %s5517_s1 }
  0x49   : > { %p5521_p8 = pneg %p5520_p1  ;;  %p5527_p10 = por %p5526_p9, %p5525_p4 }
  0x4b   : > { %p5528_p13 = pnand %p5527_p10, %p5521_p8 }
  0x4d   : > { %5531 = shalt.err (!%p5528_p13)
}
  0x4e   : > { %s6746_s30 = scalar_lea.sflag [#allocation7], %s5956_s26  ;;  %s4494_s24 = sshll.u32 %s5939_s17, 8 }
  0x4f   : > { %4996 = dma.hbm_to_vmem [thread:$0]  (!%p5950_p0), %s5973_s2, 32, %s509_s0, %s6746_s30  }
  0x50   : > { %s4921_s13 = sshll.u32 %s5780_s21, 12  ;;  %s6747_s6 = sld [smem:[#allocation32_spill]] }
  0x51   : > { %s540_s14 = scalar_lea.vmem [#allocation9], %s4494_s24  ;;  %s6723_s20 = scalar_lea.sflag [#allocation10], %s5956_s26 }
  0x52   : > { %s547_s16 = sshll.u32 %s540_s14, 4  ;;  %s6009_s16 = int_to_ptr.vmem [resolvable:$true] %s547_s16 }
  0x56   : > { %s6007_s11 = scalar_lea.hbm %s6747_s6, %s4921_s13  ;;  %s5537_s30 = scalar_lea.hbm %s6747_s6, 131072 }
  0x57   : > { %s5532_s1 = scalar_lea.hbm %s6007_s11, 4096  ;;  %p5538_p1 = scmp.lt.s32.totalorder %s6007_s11, %s6747_s6 }
  0x58   : > { %p5533_p8 = scmp.ne.s32.totalorder %s6007_s11, %s5532_s1  ;;  %p5539_p12 = scmp.lt.s32.totalorder %s5537_s30, %s5532_s1 }
  0x5a   : > { %p5535_p10 = pnand %p5533_p8, %p5982_p5  ;;  %p5540_p2 = por %p5539_p12, %p5538_p1 }
  0x5c   : > { %p5536_p13 = pneg %p5535_p10 }
  0x5e   : > { %p5541_p3 = pnand %p5540_p2, %p5536_p13 }
  0x60   : > { %5544 = shalt.err (!%p5541_p3)
}
  0x61   : > { %s5545_s24 = scalar_lea.vmem %s6009_s16, 4096  ;;  %s5784_s23 = smov [#allocation9]  }
  0x62   : > { %p5546_p6 = scmp.ne.s32.totalorder %s6009_s16, %s5545_s24  ;;  %s5550_s14 = sshll.u32 %s5784_s23, 4  ;;  %s5551_s14 = int_to_ptr.vmem [resolvable:$false] %s5550_s14 }
  0x63   : > { %s5552_s0 = scalar_lea.vmem %s5551_s14, 8192  ;;  %p5553_p4 = scmp.lt.s32.totalorder %s6009_s16, %s5551_s14 }
  0x64   : > { %p5548_p7 = pnand %p5546_p6, %p5982_p5  ;;  %p5554_p9 = scmp.lt.s32.totalorder %s5552_s0, %s5545_s24 }
  0x66   : > { %p5549_p11 = pneg %p5548_p7  ;;  %p5555_p8 = por %p5554_p9, %p5553_p4 }
  0x68   : > { %p5556_p10 = pnand %p5555_p8, %p5549_p11 }
  0x6a   : > { %5559 = shalt.err (!%p5556_p10)
}
  0x6b   : > { %s6721_s1 = smov 128   ;;  %s6722_s2 = smov 8  }
  0x6c   : > { %5002 = dma.hbm_to_vmem [thread:$0]  (!%p5950_p0), %s6007_s11, 4096, %s6009_s16, %s6723_s20, %s6721_s1, %s6721_s1, %s6722_s2  }
  0x6d   : > { %s5787_s30 = smov [#allocation15]   ;;  %p6748_p1 = scmp.ne.s32.totalorder %s6740_s18, 0 }
  0x6e   : > { %s463_s15 = sshll.u32 %s5787_s30, 4  ;;  %s464_s15 = int_to_ptr.vmem [resolvable:$true] %s463_s15 }
  0x6f   : > { %s5571_s13 = scalar_lea.vmem %s464_s15, 8192  ;;  %p6749_p12 = pneg %p6748_p1 }
  0x70   : > { %p5572_p13 = scmp.ne.s32.totalorder %s464_s15, %s5571_s13  ;;  %p5579_p6 = scmp.lt.s32.totalorder %s464_s15, %s464_s15 }
  0x71   : > { %p5580_p7 = scmp.lt.s32.totalorder %s5571_s13, %s5571_s13 }
  0x72   : > { %p5574_p2 = pnand %p5572_p13, %p6749_p12 }
  0x73   : > { %p5581_p11 = por %p5580_p7, %p5579_p6 }
  0x74   : > { %p5575_p3 = pneg %p5574_p2 }
  0x76   : > { %p5582_p4 = pnand %p5581_p11, %p5575_p3 }
  0x78   : > { %5585 = shalt.err (!%p5582_p4)
}
  0x79   : > { %s5788_s24 = smov 256   ;;  %s5789_s11 = smov 16  }
  0x7a   : > { %4989 = dma.hbm_to_vmem [thread:$0]  (!%p6748_p1), %s6707_s12, 8192, %s464_s15, [#allocation16], %s5788_s24, %s5788_s24, %s5789_s11  }
  0x7b   : > { %s6750_s14 = sshll.u32 %s5780_s21, 5  ;;  %s6751_s1 = sshll.u32 %s5939_s17, 1 }
  0x7c   : > { %s6050_s13 = scalar_lea.hbm %s6698_s3, %s6750_s14  ;;  %s481_s2 = scalar_lea.vmem [#allocation3], %s6751_s1 }
  0x7d   : > { %s489_s20 = sshll.u32 %s481_s2, 4  ;;  %s4956_s4 = smul.u32 768, %s5939_s17  ;;  %s490_s20 = int_to_ptr.vmem [resolvable:$true] %s489_s20 }
  0x7e   : > { %s4957_s6 = smul.u32 12288, %s5780_s21  ;;  %s478_s18 = scalar_lea.sflag [#allocation4], %s5939_s17 }
  0x7f   : > { %s5586_s10 = scalar_lea.hbm %s6050_s13, 32  ;;  %s5591_s11 = scalar_lea.hbm %s6698_s3, 1024 }
  0x80   : > { %p5587_p9 = scmp.ne.s32.totalorder %s6050_s13, %s5586_s10  ;;  %p5592_p13 = scmp.lt.s32.totalorder %s6050_s13, %s6698_s3 }
  0x81   : > { %p5593_p1 = scmp.lt.s32.totalorder %s5591_s11, %s5586_s10 }
  0x82   : > { %p5589_p8 = pnand %p5587_p9, %p5982_p5 }
  0x83   : > { %p5594_p12 = por %p5593_p1, %p5592_p13 }
  0x84   : > { %p5590_p10 = pneg %p5589_p8 }
  0x86   : > { %p5595_p2 = pnand %p5594_p12, %p5590_p10 }
  0x88   : > { %5598 = shalt.err (!%p5595_p2)
}
  0x89   : > { %s5599_s1 = scalar_lea.vmem %s490_s20, 32  ;;  %s5790_s2 = smov [#allocation3]  }
  0x8a   : > { %p5600_p3 = scmp.ne.s32.totalorder %s490_s20, %s5599_s1  ;;  %s5604_s14 = sshll.u32 %s5790_s2, 4  ;;  %s5605_s14 = int_to_ptr.vmem [resolvable:$false] %s5604_s14 }
  0x8b   : > { %s5606_s0 = scalar_lea.vmem %s5605_s14, 64  ;;  %p5607_p11 = scmp.lt.s32.totalorder %s490_s20, %s5605_s14 }
  0x8c   : > { %p5602_p6 = pnand %p5600_p3, %p5982_p5  ;;  %p5608_p4 = scmp.lt.s32.totalorder %s5606_s0, %s5599_s1 }
  0x8e   : > { %p5603_p7 = pneg %p5602_p6  ;;  %p5609_p9 = por %p5608_p4, %p5607_p11 }
  0x90   : > { %p5610_p8 = pnand %p5609_p9, %p5603_p7 }
  0x92   : > { %5613 = shalt.err (!%p5610_p8)
}
  0x93   : > { %4993 = dma.hbm_to_vmem [thread:$0]  (!%p5950_p0), %s6050_s13, 32, %s490_s20, %s478_s18  }
  0x94   : > { %s6076_s15 = scalar_lea.hbm %s6700_s5, %s4957_s6  ;;  %s519_s24 = scalar_lea.vmem [#allocation8], %s4956_s4 }
  0x95   : > { %s526_s11 = sshll.u32 %s519_s24, 4  ;;  %s5614_s16 = scalar_lea.hbm %s6076_s15, 12288  ;;  %s6080_s11 = int_to_ptr.vmem [resolvable:$true] %s526_s11 }
  0x96   : > { %p5615_p10 = scmp.ne.s32.totalorder %s6076_s15, %s5614_s16  ;;  %s5619_s13 = scalar_lea.hbm %s6700_s5, 393216 }
  0x97   : > { %p5620_p12 = scmp.lt.s32.totalorder %s6076_s15, %s6700_s5  ;;  %p5621_p2 = scmp.lt.s32.totalorder %s5619_s13, %s5614_s16 }
  0x98   : > { %p5617_p13 = pnand %p5615_p10, %p5982_p5 }
  0x99   : > { %p5622_p3 = por %p5621_p2, %p5620_p12 }
  0x9a   : > { %p5618_p1 = pneg %p5617_p13 }
  0x9c   : > { %p5623_p6 = pnand %p5622_p3, %p5618_p1 }
  0x9e   : > { %5626 = shalt.err (!%p5623_p6)
}
  0x9f   : > { %s5627_s4 = scalar_lea.vmem %s6080_s11, 12288  ;;  %s5791_s1 = smov [#allocation8]  }
  0xa0   : > { %p5628_p7 = scmp.ne.s32.totalorder %s6080_s11, %s5627_s4  ;;  %s5632_s2 = sshll.u32 %s5791_s1, 4  ;;  %s5633_s2 = int_to_ptr.vmem [resolvable:$false] %s5632_s2 }
  0xa1   : > { %s5634_s14 = scalar_lea.vmem %s5633_s2, 24576  ;;  %p5635_p9 = scmp.lt.s32.totalorder %s6080_s11, %s5633_s2 }
  0xa2   : > { %p5630_p11 = pnand %p5628_p7, %p5982_p5  ;;  %p5636_p8 = scmp.lt.s32.totalorder %s5634_s14, %s5627_s4 }
  0xa4   : > { %p5631_p4 = pneg %p5630_p11  ;;  %p5637_p10 = por %p5636_p8, %p5635_p9 }
  0xa6   : > { %p5638_p13 = pnand %p5637_p10, %p5631_p4 }
  0xa8   : > { %5641 = shalt.err (!%p5638_p13)
}
  0xa9   : > { %s5792_s0 = smov 384   ;;  %s5793_s10 = smov 24  }
  0xaa   : > { %s6752_s30 = scalar_lea.sflag [#allocation7], %s5956_s26  ;;  %s4497_s24 = sshll.u32 %s5939_s17, 10 }
  0xab   : > { %4999 = dma.hbm_to_vmem [thread:$0]  (!%p5950_p0), %s6076_s15, 12288, %s6080_s11, %s6752_s30, %s5792_s0, %s5792_s0, %s5793_s10  }
  0xac   : > { %s4922_s16 = sshll.u32 %s5780_s21, 14  ;;  %s561_s18 = scalar_lea.vmem [#allocation11], %s4497_s24 }
  0xad   : > { %s6109_s13 = scalar_lea.hbm %s6702_s7, %s4922_s16  ;;  %s568_s6 = sshll.u32 %s561_s18, 4  ;;  %s6111_s6 = int_to_ptr.vmem [resolvable:$true] %s568_s6 }
  0xae   : > { %s5642_s4 = scalar_lea.hbm %s6109_s13, 16384  ;;  %s5647_s1 = scalar_lea.hbm %s6702_s7, 524288 }
  0xaf   : > { %p5643_p1 = scmp.ne.s32.totalorder %s6109_s13, %s5642_s4  ;;  %p5648_p3 = scmp.lt.s32.totalorder %s6109_s13, %s6702_s7 }
  0xb0   : > { %p5649_p6 = scmp.lt.s32.totalorder %s5647_s1, %s5642_s4 }
  0xb1   : > { %p5645_p12 = pnand %p5643_p1, %p5982_p5 }
  0xb2   : > { %p5650_p7 = por %p5649_p6, %p5648_p3 }
  0xb3   : > { %p5646_p2 = pneg %p5645_p12 }
  0xb5   : > { %p5651_p11 = pnand %p5650_p7, %p5646_p2 }
  0xb7   : > { %5654 = shalt.err (!%p5651_p11)
}
  0xb8   : > { %s5655_s0 = scalar_lea.vmem %s6111_s6, 16384  ;;  %s5794_s10 = smov [#allocation11]  }
  0xb9   : > { %p5656_p4 = scmp.ne.s32.totalorder %s6111_s6, %s5655_s0  ;;  %s5660_s30 = sshll.u32 %s5794_s10, 4  ;;  %s5661_s30 = int_to_ptr.vmem [resolvable:$false] %s5660_s30 }
  0xba   : > { %s5662_s24 = scalar_lea.vmem %s5661_s30, 32768  ;;  %p5663_p10 = scmp.lt.s32.totalorder %s6111_s6, %s5661_s30 }
  0xbb   : > { %p5658_p9 = pnand %p5656_p4, %p5982_p5  ;;  %p5664_p13 = scmp.lt.s32.totalorder %s5662_s24, %s5655_s0 }
  0xbd   : > { %p5659_p8 = pneg %p5658_p9  ;;  %p5665_p1 = por %p5664_p13, %p5663_p10 }
  0xbf   : > { %p5666_p12 = pnand %p5665_p1, %p5659_p8 }
  0xc1   : > { %5669 = shalt.err (!%p5666_p12)
}
  0xc2   : > { %s5795_s16 = smov 512   ;;  %s5796_s23 = smov 32  }
  0xc3   : > { %s6753_s20 = scalar_lea.sflag [#allocation10], %s5956_s26  ;;  %s4500_s18 = sshll.u32 %s5939_s17, 9 }
  0xc4   : > { %5005 = dma.hbm_to_vmem [thread:$0]  (!%p5950_p0), %s6109_s13, 16384, %s6111_s6, %s6753_s20, %s5795_s16, %s5795_s16, %s5796_s23  }
  0xc5   : > { %s4923_s4 = sshll.u32 %s5780_s21, 13  ;;  %s582_s2 = scalar_lea.vmem [#allocation12], %s4500_s18 }
  0xc6   : > { %s6140_s1 = scalar_lea.hbm %s6703_s8, %s4923_s4  ;;  %s589_s14 = sshll.u32 %s582_s2, 4  ;;  %s6142_s14 = int_to_ptr.vmem [resolvable:$true] %s589_s14 }
  0xc7   : > { %s579_s0 = scalar_lea.sflag [#allocation13], %s5956_s26  ;;  %s5670_s10 = scalar_lea.hbm %s6140_s1, 8192 }
  0xc8   : > { %p5671_p2 = scmp.ne.s32.totalorder %s6140_s1, %s5670_s10  ;;  %s5675_s13 = scalar_lea.hbm %s6703_s8, 262144 }
  0xc9   : > { %p5676_p7 = scmp.lt.s32.totalorder %s6140_s1, %s6703_s8  ;;  %p5677_p11 = scmp.lt.s32.totalorder %s5675_s13, %s5670_s10 }
  0xca   : > { %p5673_p3 = pnand %p5671_p2, %p5982_p5 }
  0xcb   : > { %p5678_p4 = por %p5677_p11, %p5676_p7 }
  0xcc   : > { %p5674_p6 = pneg %p5673_p3 }
  0xce   : > { %p5679_p9 = pnand %p5678_p4, %p5674_p6 }
  0xd0   : > { %5682 = shalt.err (!%p5679_p9)
}
  0xd1   : > { %s5683_s26 = scalar_lea.vmem %s6142_s14, 8192  ;;  %s5797_s24 = smov [#allocation12]  }
  0xd2   : > { %p5684_p8 = scmp.ne.s32.totalorder %s6142_s14, %s5683_s26  ;;  %s5688_s16 = sshll.u32 %s5797_s24, 4  ;;  %s5689_s16 = int_to_ptr.vmem [resolvable:$false] %s5688_s16 }
  0xd3   : > { %s5690_s23 = scalar_lea.vmem %s5689_s16, 16384  ;;  %p5691_p1 = scmp.lt.s32.totalorder %s6142_s14, %s5689_s16 }
  0xd4   : > { %p5686_p10 = pnand %p5684_p8, %p5982_p5  ;;  %p5692_p12 = scmp.lt.s32.totalorder %s5690_s23, %s5683_s26 }
  0xd6   : > { %p5687_p13 = pneg %p5686_p10  ;;  %p5693_p2 = por %p5692_p12, %p5691_p1 }
  0xd8   : > { %p5694_p3 = pnand %p5693_p2, %p5687_p13 }
  0xda   : > { %5697 = shalt.err (!%p5694_p3)
}
  0xdb   : > { %s6754_s20 = smov 8   ;;  %s6755_s18 = smov 128  }
  0xdc   : > { %5008 = dma.hbm_to_vmem [thread:$0]  (!%p5950_p0), %s6140_s1, 8192, %s6142_s14, %s579_s0, %s6755_s18, %s6755_s18, %s6754_s20  }
  0xdd   : > { %p6756_p5 = scmp.ne.s32.totalorder %s6739_s29, 0 }
  0xde   : > { %s619_s27 = sand.u32 (!%p6756_p5), 1, %s5772_s19   ;;  %p6757_p6 = scmp.ne.s32.totalorder (!%p6756_p5), %s6738_s28, 0 }
  0xdf   : > { %617 = sbr.rel (%p6756_p5) target bundleno = 2711 (0xa97), region = 72  ;;  %s4504_s4 = sshll.u32 (!%p6756_p5), %s619_s27, 1 }
  0xe0   : > { %s620_s15 = scalar_lea.sflag (!%p6756_p5), [#allocation4], %s619_s27  ;;  %s6171_s11 = scalar_lea.vmem (!%p6756_p5), [#allocation3], %s4504_s4 }
  0xe4   : > { %5739 = dma.done.wait (%p6757_p6), %s620_s15, 32  }
  0xe5   : > { %5741 = vsyncadd (%p6757_p6), %s620_s15, 4294967264  ;;  %s628_s25 = sand.u32 1, %s5902_s22   ;;  %s6178_s1 = scalar_lea.vmem [#allocation6], %s4504_s4 }
  0xe6   : > { %s629_s2 = scalar_lea.sflag [#allocation7], %s628_s25 }
  0xe7   : > { %5743 = dma.done.wait (%p6757_p6), %s629_s2, 12320  }
  0xe8   : > { %5745 = vsyncadd (%p6757_p6), %s629_s2, 4294954976  ;;  %s4958_s29 = smul.u32 768, %s619_s27  ;;  %s4506_s14 = sshll.u32 %s619_s27, 8 }
  0xe9   : > { %s647_s10 = scalar_lea.sflag [#allocation10], %s628_s25  ;;  %s6186_s17 = scalar_lea.vmem [#allocation9], %s4506_s14 }
  0xea   : > { %s6184_s0 = scalar_lea.vmem [#allocation8], %s4958_s29 }
  0xeb   : > { %5747 = dma.done.wait (%p6757_p6), %s647_s10, 20480  }
  0xec   : > { %5749 = vsyncadd (%p6757_p6), %s647_s10, 4294946816  ;;  %s4507_s21 = sshll.u32 %s619_s27, 10  ;;  %s4508_s13 = sshll.u32 %s619_s27, 9 }
  0xed   : > { %s6192_s6 = scalar_lea.vmem [#allocation11], %s4507_s21  ;;  %s665_s30 = scalar_lea.sflag [#allocation13], %s628_s25 }
  0xee   : > { %s6194_s26 = scalar_lea.vmem [#allocation12], %s4508_s13 }
  0xef   : > { %5751 = dma.done.wait (%p6757_p6), %s665_s30, 8192  }
  0xf0   : > { %5753 = vsyncadd (%p6757_p6), %s665_s30, 4294959104  ;;  %p6758_p0 = scmp.eq.s32.totalorder %s5902_s22, 0 }
  0xf2   : > { %5755 = dma.done.wait (%p6758_p0), [#allocation13], 32   ;;  %p6759_p7 = pmov %p6758_p0 }
  0xf3   : > { %p6760_p11 = pmov %p6758_p0 }
  0xf4   : > { %5757 = vsyncadd (%p6759_p7), [#allocation13], 4294967264 }
  0xf5   : > { %5759 = dma.done.wait (%p6760_p11), [#allocation16], 8192   ;;  %p6761_p4 = pmov %p6758_p0 }
  0xf6   : > { %p763_p9 = scmp.lt.s32.totalorder %s5902_s22, 31  ;;  %s6762_s4 = sld [smem:[#allocation33_spill]] }
  0xf7   : > { %5761 = vsyncadd (%p6761_p4), [#allocation16], 4294959104  ;;  %s6763_s29 = sld [smem:[#allocation36_spill]]  ;;  %p6765_p8 = scmp.ne.s32.totalorder %s5902_s22, 0 }
  0xf8   : > { %s764_s24 = scalar_select %p763_p9, %s5902_s22, 31 }
  0xf9   : > { %s6764_s13 = sld [smem:[#allocation37_spill]] }
  0xfa   : > { %s4924_s16 = sshll.u32 %s764_s24, 4  ;;  %s6766_s28 = sld [smem:[#allocation28_spill]] (!%p6765_p8) }
  0xfb   : > { %s6213_s20 = scalar_lea.vmem %s6704_s9, %s4924_s16  ;;  %786 = sbr.rel (%p6765_p8) target bundleno = 260 (0x104), region = 108 }
  0xfc   : > { %s6218_s15 = scalar_lea.vmem %s6762_s4, %s4924_s16 }
  0xfd   : > { %s6223_s14 = scalar_lea.vmem %s6763_s29, %s4924_s16 }
  0xff   : > { %s6228_s30 = scalar_lea.vmem %s6764_s13, %s4924_s16 }
 0x100   : > { %v787_v0 = vld [vmem:[%s6766_s28] sm:$0x3]  ;;  %v788_v1 = vlaneseq }
 0x102   : > { %vm790_vm0 = vcmp.lt.s32.totalorder %v788_v1, 256 }
 0x103   : > { %792 = vst.msk [vmem:[#allocation2] sm:$0x3] %vm790_vm0, %v787_v0 }
 0x104 PF: > { %v797_v3 = vlaneseq  ;;  %v5063_v4 = vld [vmem:[%s6184_s0 + $0x154] ss:$24 sps:$4 sm:$0xff]   ;;  %v5065_v5 = vld [vmem:[%s6184_s0 + $0x150] ss:$24 sps:$4 sm:$0xff]   ;;  %v5069_v10 = vld [vmem:[%s6184_s0 + $0x124] ss:$24 sps:$4 sm:$0xff]  }
 0x105   : > { %v5066_v8 = vld [vmem:[%s6184_s0 + $0x15c] ss:$24 sps:$4 sm:$0xff]   ;;  %v5068_v9 = vld [vmem:[%s6184_s0 + $0x158] ss:$24 sps:$4 sm:$0xff]   ;;  %1414 = vmatprep.subr.bf16.mxu0 %v5063_v4  ;;  %vm807_vm1 = vcmask 1040384   ;;  %vm5799_vm2 = vmmov 0  }
 0x106   : > { %v6242_v7 = vshrl.u32 %v797_v3, 7  ;;  %1415 = vmatpush1.bf16.msra.mxu0 %v5065_v5  ;;  %1455 = vmatprep.subr.bf16.mxu1 %v5066_v8  ;;  %v5071_v13 = vld [vmem:[%s6184_s0 + $0x120] ss:$24 sps:$4 sm:$0xff]   ;;  %v5072_v14 = vld [vmem:[%s6184_s0 + $0x12c] ss:$24 sps:$4 sm:$0xff]   ;;  %s6767_s18 = sld [smem:[#allocation29_spill]] }
 0x107   : > { %1456 = vmatpush1.bf16.msra.mxu1 %v5068_v9  ;;  %1416 = vmatprep.subr.bf16.mxu0 %v5069_v10  ;;  %v5074_v15 = vld [vmem:[%s6184_s0 + $0x128] ss:$24 sps:$4 sm:$0xff]   ;;  %v5075_v18 = vld [vmem:[%s6184_s0 + $0xf4] ss:$24 sps:$4 sm:$0xff]   ;;  %v5080_v24 = vld [vmem:[%s6184_s0 + $0xf8] ss:$24 sps:$4 sm:$0xff]  }
 0x108   : > { %v6248_v11 = vsub.s32 0, %v6242_v7  ;;  %v6251_v12 = vsub.s32 1, %v6242_v7  ;;  %1457 = vmatprep.subr.bf16.mxu1 %v5072_v14  ;;  %v5078_v19 = vld [vmem:[%s6184_s0 + $0xfc] ss:$24 sps:$4 sm:$0xff]   ;;  %v5077_v22 = vld [vmem:[%s6184_s0 + $0xf0] ss:$24 sps:$4 sm:$0xff]  }
 0x109   : > { %v5081_v25 = vld [vmem:[%s6184_s0 + $0xc4] ss:$24 sps:$4 sm:$0xff]   ;;  %v5083_v27 = vld [vmem:[%s6184_s0 + $0xc0] ss:$24 sps:$4 sm:$0xff]   ;;  %v5087_v29 = vld [vmem:[%s6184_s0 + $0x94] ss:$24 sps:$4 sm:$0xff]  }
 0x10a   : > { %v6235_v2 = vld [vmem:[#allocation2] sm:$0x3]  ;;  %1417 = vmatpush1.bf16.msra.mxu0 %v5071_v13  ;;  %v5084_v26 = vld [vmem:[%s6184_s0 + $0xcc] ss:$24 sps:$4 sm:$0xff]   ;;  %v5086_v28 = vld [vmem:[%s6184_s0 + $0xc8] ss:$24 sps:$4 sm:$0xff]  }
 0x10b   : > { %v795_v6 = vmul.f32 %v6235_v2, %v6235_v2  ;;  %1458 = vmatpush1.bf16.msra.mxu1 %v5074_v15  ;;  %1418 = vmatprep.subr.bf16.mxu0 %v5075_v18  ;;  %v5090_v30 = vld [vmem:[%s6184_s0 + $0x9c] ss:$24 sps:$4 sm:$0xff]   ;;  %v5089_v31 = vld [vmem:[%s6184_s0 + $0x90] ss:$24 sps:$4 sm:$0xff]   ;;  %v5096_v34 = vld [vmem:[%s6184_s0 + $0x6c] ss:$24 sps:$4 sm:$0xff]  }
 0x10c   : > { %1459 = vmatprep.subr.bf16.mxu1 %v5078_v19  ;;  %v5092_v32 = vld [vmem:[%s6184_s0 + $0x98] ss:$24 sps:$4 sm:$0xff]   ;;  %v5093_v33 = vld [vmem:[%s6184_s0 + $0x64] ss:$24 sps:$4 sm:$0xff]   ;;  %v5098_v36 = vld [vmem:[%s6184_s0 + $0x68] ss:$24 sps:$4 sm:$0xff]  }
 0x10d   : > { %v800_v16 = vrot.slane %v795_v6, %v6248_v11  ;;  %v804_v17 = vrot.slane %v795_v6, %v6251_v12  ;;  %v5095_v35 = vld [vmem:[%s6184_s0 + $0x60] ss:$24 sps:$4 sm:$0xff]   ;;  %v5099_v37 = vld [vmem:[%s6184_s0 + $0x34] ss:$24 sps:$4 sm:$0xff]   ;;  %v5101_v39 = vld [vmem:[%s6184_s0 + $0x30] ss:$24 sps:$4 sm:$0xff]  }
 0x10e   : > { %1419 = vmatpush1.bf16.msra.mxu0 %v5077_v22  ;;  %v5102_v38 = vld [vmem:[%s6184_s0 + $0x3c] ss:$24 sps:$4 sm:$0xff]   ;;  %v5104_v40 = vld [vmem:[%s6184_s0 + $0x38] ss:$24 sps:$4 sm:$0xff]   ;;  %v5108_v42 = vld [vmem:[%s6184_s0 + $0xc] ss:$24 sps:$4 sm:$0xff]  }
 0x10f   : > { %v808_v20 = vsel %vm807_vm1, %v800_v16, 0.0  ;;  %v809_v21 = vsel %vm807_vm1, %v804_v17, 0.0  ;;  %1460 = vmatpush1.bf16.msra.mxu1 %v5080_v24  ;;  %1420 = vmatprep.subr.bf16.mxu0 %v5081_v25  ;;  %v5105_v41 = vld [vmem:[%s6184_s0 + $0x4] ss:$24 sps:$4 sm:$0xff]   ;;  %v5107_v43 = vld [vmem:[%s6184_s0] ss:$24 sps:$4 sm:$0xff]  }
 0x110   : > { %v810_v23 = vadd.f32 %v809_v21, %v808_v20  ;;  %1461 = vmatprep.subr.bf16.mxu1 %v5084_v26  ;;  %v5110_v44 = vld [vmem:[%s6184_s0 + $0x8] ss:$24 sps:$4 sm:$0xff]   ;;  %v5111_v45 = vld [vmem:[%s6184_s0 + $0x2d4] ss:$24 sps:$4 sm:$0xff]   ;;  %v5116_v48 = vld [vmem:[%s6184_s0 + $0x2d8] ss:$24 sps:$4 sm:$0xff]  }
 0x111   : > { %v5114_v46 = vld [vmem:[%s6184_s0 + $0x2dc] ss:$24 sps:$4 sm:$0xff]   ;;  %v5113_v47 = vld [vmem:[%s6184_s0 + $0x2d0] ss:$24 sps:$4 sm:$0xff]   ;;  %v5120_v50 = vld [vmem:[%s6184_s0 + $0x2ac] ss:$24 sps:$4 sm:$0xff]  }
 0x112   : > { %811 = vadd.xlane.f32.xlu0 %v810_v23  ;;  %1421 = vmatpush1.bf16.msra.mxu0 %v5083_v27  ;;  %v5117_v49 = vld [vmem:[%s6184_s0 + $0x2a4] ss:$24 sps:$4 sm:$0xff]   ;;  %v5119_v51 = vld [vmem:[%s6184_s0 + $0x2a0] ss:$24 sps:$4 sm:$0xff]   ;;  %v5123_v53 = vld [vmem:[%s6184_s0 + $0x274] ss:$24 sps:$4 sm:$0xff]  }
 0x113   : > { %1462 = vmatpush1.bf16.msra.mxu1 %v5086_v28  ;;  %1422 = vmatprep.subr.bf16.mxu0 %v5087_v29  ;;  %v5122_v52 = vld [vmem:[%s6184_s0 + $0x2a8] ss:$24 sps:$4 sm:$0xff]   ;;  %v5126_v54 = vld [vmem:[%s6184_s0 + $0x27c] ss:$24 sps:$4 sm:$0xff]   ;;  %v5128_v56 = vld [vmem:[%s6184_s0 + $0x278] ss:$24 sps:$4 sm:$0xff]  }
 0x114   : > { %1463 = vmatprep.subr.bf16.mxu1 %v5090_v30  ;;  %v5125_v55 = vld [vmem:[%s6184_s0 + $0x270] ss:$24 sps:$4 sm:$0xff]   ;;  %v5129_v57 = vld [vmem:[%s6184_s0 + $0x244] ss:$24 sps:$4 sm:$0xff]   ;;  %v5131_v58 = vld [vmem:[%s6184_s0 + $0x240] ss:$24 sps:$4 sm:$0xff]  }
 0x115   : > { %v5132_v59 = vld [vmem:[%s6184_s0 + $0x24c] ss:$24 sps:$4 sm:$0xff]   ;;  %v5134_v60 = vld [vmem:[%s6184_s0 + $0x248] ss:$24 sps:$4 sm:$0xff]   ;;  %v5138_v62 = vld [vmem:[%s6184_s0 + $0x21c] ss:$24 sps:$4 sm:$0xff]  }
 0x116   : > { %1423 = vmatpush1.bf16.msra.mxu0 %v5089_v31  ;;  %v5135_v61 = vld [vmem:[%s6184_s0 + $0x214] ss:$24 sps:$4 sm:$0xff]   ;;  %v5137_v63 = vld [vmem:[%s6184_s0 + $0x210] ss:$24 sps:$4 sm:$0xff]   ;;  %v5141_v1 = vld [vmem:[%s6184_s0 + $0x1e4] ss:$24 sps:$4 sm:$0xff]  }
 0x117   : > { %1464 = vmatpush1.bf16.msra.mxu1 %v5092_v32  ;;  %1424 = vmatprep.subr.bf16.mxu0 %v5093_v33  ;;  %v5140_v0 = vld [vmem:[%s6184_s0 + $0x218] ss:$24 sps:$4 sm:$0xff]   ;;  %v5144_v4 = vld [vmem:[%s6184_s0 + $0x1ec] ss:$24 sps:$4 sm:$0xff]   ;;  %v5146_v6 = vld [vmem:[%s6184_s0 + $0x1e8] ss:$24 sps:$4 sm:$0xff]  }
 0x118   : > { %1465 = vmatprep.subr.bf16.mxu1 %v5096_v34  ;;  %v5143_v5 = vld [vmem:[%s6184_s0 + $0x1e0] ss:$24 sps:$4 sm:$0xff]   ;;  %v5147_v8 = vld [vmem:[%s6184_s0 + $0x1b4] ss:$24 sps:$4 sm:$0xff]   ;;  %v5149_v10 = vld [vmem:[%s6184_s0 + $0x1b0] ss:$24 sps:$4 sm:$0xff]  }
 0x119   : > { %v5150_v9 = vld [vmem:[%s6184_s0 + $0x1bc] ss:$24 sps:$4 sm:$0xff]   ;;  %v5152_v13 = vld [vmem:[%s6184_s0 + $0x1b8] ss:$24 sps:$4 sm:$0xff]   ;;  %v5156_v15 = vld [vmem:[%s6184_s0 + $0x18c] ss:$24 sps:$4 sm:$0xff]  }
 0x11a   : > { %1425 = vmatpush1.bf16.msra.mxu0 %v5095_v35  ;;  %v5153_v14 = vld [vmem:[%s6184_s0 + $0x184] ss:$24 sps:$4 sm:$0xff]   ;;  %v5155_v16 = vld [vmem:[%s6184_s0 + $0x180] ss:$24 sps:$4 sm:$0xff]   ;;  %v5164_v32 = vld [vmem:[%s6184_s0 + $0x134] ss:$24 sps:$4 sm:$0xff]  }
 0x11b   : > { %1466 = vmatpush1.bf16.msra.mxu1 %v5098_v36  ;;  %1426 = vmatprep.subr.bf16.mxu0 %v5099_v37  ;;  %v5158_v17 = vld [vmem:[%s6184_s0 + $0x188] ss:$24 sps:$4 sm:$0xff]   ;;  %v5161_v18 = vld [vmem:[%s6184_s0 + $0x164] ss:$24 sps:$4 sm:$0xff]   ;;  %v794_v24 = vld [vmem:[%s6171_s11] sm:$0x3] }
 0x11c   : > { %1467 = vmatprep.subr.bf16.mxu1 %v5102_v38  ;;  %v5159_v30 = vld [vmem:[%s6184_s0 + $0x160] ss:$24 sps:$4 sm:$0xff]   ;;  %v5167_v33 = vld [vmem:[%s6184_s0 + $0x104] ss:$24 sps:$4 sm:$0xff]   ;;  %v5170_v35 = vld [vmem:[%s6184_s0 + $0xd4] ss:$24 sps:$4 sm:$0xff]  }
 0x11d   : > { %v5165_v34 = vld [vmem:[%s6184_s0 + $0x100] ss:$24 sps:$4 sm:$0xff]   ;;  %v5168_v36 = vld [vmem:[%s6184_s0 + $0xd0] ss:$24 sps:$4 sm:$0xff]   ;;  %v5173_v37 = vld [vmem:[%s6184_s0 + $0xa4] ss:$24 sps:$4 sm:$0xff]  }
 0x11e   : > { %1427 = vmatpush1.bf16.msra.mxu0 %v5101_v39  ;;  %v5171_v38 = vld [vmem:[%s6184_s0 + $0xa0] ss:$24 sps:$4 sm:$0xff]   ;;  %v5176_v39 = vld [vmem:[%s6184_s0 + $0x74] ss:$24 sps:$4 sm:$0xff]   ;;  %s5800_s11 = smov 64   ;;  %s6768_s25 = sld [smem:[#allocation30_spill]] }
 0x11f   : > { %1468 = vmatpush1.bf16.msra.mxu1 %v5104_v40  ;;  %1428 = vmatprep.subr.bf16.mxu0 %v5105_v41  ;;  %v5174_v40 = vld [vmem:[%s6184_s0 + $0x70] ss:$24 sps:$4 sm:$0xff]   ;;  %v5179_v41 = vld [vmem:[%s6184_s0 + $0x44] ss:$24 sps:$4 sm:$0xff]   ;;  %vm1563_vm3 = vcmask 1046528   ;;  %vm1641_vm4 = vcmask 57344  }
 0x120   : > { %1469 = vmatprep.subr.bf16.mxu1 %v5108_v42  ;;  %v5177_v42 = vld [vmem:[%s6184_s0 + $0x40] ss:$24 sps:$4 sm:$0xff]   ;;  %vm1653_vm5 = vcmask 64512   ;;  %vm3659_vm6 = vcmp.lt.s32.totalorder %v797_v3, 256  ;;  %p4850_p10 = scmp.ne.s32.totalorder %s5902_s22, 31 }
 0x122   : > { %1429 = vmatpush1.bf16.msra.mxu0 %v5107_v43  ;;  %v5182_v43 = vld [vmem:[%s6184_s0 + $0x14] ss:$24 sps:$4 sm:$0xff]  }
 0x123   : > { %1470 = vmatpush1.bf16.msra.mxu1 %v5110_v44  ;;  %1430 = vmatprep.subr.bf16.mxu0 %v5111_v45  ;;  %v5180_v44 = vld [vmem:[%s6184_s0 + $0x10] ss:$24 sps:$4 sm:$0xff]   ;;  %v5185_v45 = vld [vmem:[%s6184_s0 + $0x2e4] ss:$24 sps:$4 sm:$0xff]  }
 0x124   : > { %1471 = vmatprep.subr.bf16.mxu1 %v5114_v46  ;;  %v5183_v46 = vld [vmem:[%s6184_s0 + $0x2e0] ss:$24 sps:$4 sm:$0xff]  }
 0x126   : > { %1431 = vmatpush2.bf16.msra.mxu0 %v5113_v47  ;;  %v5188_v47 = vld [vmem:[%s6184_s0 + $0x2b4] ss:$24 sps:$4 sm:$0xff]  }
 0x127   : > { %1472 = vmatpush2.bf16.msra.mxu1 %v5116_v48  ;;  %1432 = vmatprep.subr.bf16.mxu0 %v5117_v49  ;;  %v5186_v48 = vld [vmem:[%s6184_s0 + $0x2b0] ss:$24 sps:$4 sm:$0xff]   ;;  %v5191_v49 = vld [vmem:[%s6184_s0 + $0x284] ss:$24 sps:$4 sm:$0xff]  }
 0x128   : > { %1473 = vmatprep.subr.bf16.mxu1 %v5120_v50  ;;  %v5189_v50 = vld [vmem:[%s6184_s0 + $0x280] ss:$24 sps:$4 sm:$0xff]  }
 0x12a   : > { %1433 = vmatpush2.bf16.msra.mxu0 %v5119_v51  ;;  %v5194_v51 = vld [vmem:[%s6184_s0 + $0x254] ss:$24 sps:$4 sm:$0xff]  }
 0x12b   : > { %1474 = vmatpush2.bf16.msra.mxu1 %v5122_v52  ;;  %1434 = vmatprep.subr.bf16.mxu0 %v5123_v53  ;;  %v5192_v52 = vld [vmem:[%s6184_s0 + $0x250] ss:$24 sps:$4 sm:$0xff]   ;;  %v5197_v53 = vld [vmem:[%s6184_s0 + $0x224] ss:$24 sps:$4 sm:$0xff]  }
 0x12c   : > { %1475 = vmatprep.subr.bf16.mxu1 %v5126_v54  ;;  %v5195_v54 = vld [vmem:[%s6184_s0 + $0x220] ss:$24 sps:$4 sm:$0xff]  }
 0x12e   : > { %1435 = vmatpush2.bf16.msra.mxu0 %v5125_v55  ;;  %v5200_v55 = vld [vmem:[%s6184_s0 + $0x1f4] ss:$24 sps:$4 sm:$0xff]  }
 0x12f   : > { %1476 = vmatpush2.bf16.msra.mxu1 %v5128_v56  ;;  %1436 = vmatprep.subr.bf16.mxu0 %v5129_v57  ;;  %v5198_v56 = vld [vmem:[%s6184_s0 + $0x1f0] ss:$24 sps:$4 sm:$0xff]   ;;  %v5203_v57 = vld [vmem:[%s6184_s0 + $0x1c4] ss:$24 sps:$4 sm:$0xff]  }
 0x130   : > { %1477 = vmatprep.subr.bf16.mxu1 %v5132_v59  ;;  %v5206_v59 = vld [vmem:[%s6184_s0 + $0x194] ss:$24 sps:$4 sm:$0xff]  }
 0x132   : > { %1437 = vmatpush2.bf16.msra.mxu0 %v5131_v58  ;;  %v5201_v58 = vld [vmem:[%s6184_s0 + $0x1c0] ss:$24 sps:$4 sm:$0xff]  }
 0x133   : > { %1478 = vmatpush2.bf16.msra.mxu1 %v5134_v60  ;;  %1438 = vmatprep.subr.bf16.mxu0 %v5135_v61  ;;  %v5204_v60 = vld [vmem:[%s6184_s0 + $0x190] ss:$24 sps:$4 sm:$0xff]   ;;  %v5798_v61 = vmov 0.0  }
 0x134   : > { %1479 = vmatprep.subr.bf16.mxu1 %v5138_v62  ;;  %v1539_v62 = vld [vmem:[%s6213_s20] sm:$0x7f] }
 0x135   : > { %1541 = vst [vmem:[%s6223_s14] sm:$0x7f] %v1539_v62 }
 0x136   : > { %1439 = vmatpush2.bf16.msra.mxu0 %v5137_v63  ;;  %v1540_v63 = vld [vmem:[%s6213_s20 + $0x8] sm:$0x7f] }
 0x137   : > { %1480 = vmatpush2.bf16.msra.mxu1 %v5140_v0  ;;  %1440 = vmatprep.subr.bf16.mxu0 %v5141_v1  ;;  %v1543_v0 = vld [vmem:[%s6218_s15] sm:$0x7f]  ;;  %1542 = vst [vmem:[%s6223_s14 + $0x8] sm:$0x7f] %v1540_v63  ;;  %v1544_v1 = vld [vmem:[%s6218_s15 + $0x8] sm:$0x7f] }
 0x138   : > { %1481 = vmatprep.subr.bf16.mxu1 %v5144_v4  ;;  %1545 = vst [vmem:[%s6228_s30] sm:$0x7f] %v1543_v0  ;;  %1546 = vst [vmem:[%s6228_s30 + $0x8] sm:$0x7f] %v1544_v1 }
 0x13a   : > { %1441 = vmatpush2.bf16.msra.mxu0 %v5143_v5 }
 0x13b   : > { %1482 = vmatpush2.bf16.msra.mxu1 %v5146_v6  ;;  %1442 = vmatprep.subr.bf16.mxu0 %v5147_v8 }
 0x13c   : > { %1483 = vmatprep.subr.bf16.mxu1 %v5150_v9 }
 0x13e   : > { %1443 = vmatpush2.bf16.msra.mxu0 %v5149_v10 }
 0x13f   : > { %1484 = vmatpush2.bf16.msra.mxu1 %v5152_v13  ;;  %1444 = vmatprep.subr.bf16.mxu0 %v5153_v14 }
 0x140   : > { %1485 = vmatprep.subr.bf16.mxu1 %v5156_v15 }
 0x142   : > { %1445 = vmatpush2.bf16.msra.mxu0 %v5155_v16 }
 0x143   : > { %1486 = vmatpush2.bf16.msra.mxu1 %v5158_v17  ;;  %1496 = vmatprep.subr.bf16.mxu0 %v5161_v18 }
 0x144   : > { %4946 = vmatprep.subr.mxu1 %v5798_v61 }
 0x19b   : > { %v812_v19 = vpop.xlane.xlu0 %811 }
 0x19c   : > { %v814_v20 = vmul.f32 0.00390625, %v812_v19  ;;  %v1537_v19 = vld [vmem:[%s6767_s18] sm:$0x1] }
 0x19e   : > { %v815_v21 = vadd.f32 1e-06, %v814_v20  ;;  %v1538_v20 = vld [vmem:[%s6768_s25] sm:$0x1] }
 0x1a0   : > { %5351 = vrsqrt.f32 %v815_v21 }
 0x1ad   : > { %v5352_v22 = vpop.eup %5351 }
 0x1ae   : > { %v821_v23 = vrot.slane %v5352_v22, %v6248_v11 }
 0x1b0   : > { %v823_v25 = vmul.f32 %v821_v23, %v6235_v2  ;;  %v5162_v2 = vld [vmem:[%s6184_s0 + $0x130] ss:$24 sps:$4 sm:$0xff]  }
 0x1b2   : > { %v824_v26 = vmul.f32 %v823_v25, %v794_v24 }
 0x1b4   : > { %v833_v27 = vrot.slane %v824_v26, %v6251_v12  ;;  %v829_v28 = vrot.slane %v824_v26, %v6248_v11 }
 0x1b6   : > { %v837_v29 = vpack.c.bf16 %v833_v27, %v833_v27  ;;  %v6323_v31 = vpack.c.bf16 %v829_v28, %v829_v28 }
 0x1b8   : > { %1446 = vmatprep.mubr.bf16.mxu0 %v837_v29  ;;  %1487 = vmatprep.mubr.bf16.mxu1 %v837_v29 }
 0x1b9   : > { %1447 = vmatmul.mubr.bf16.vlgmr.msra.gmra.mxu0 %v6323_v31  ;;  %1488 = vmatmul.mubr.bf16.vlgmr.msra.gmra.mxu1 %v6323_v31 }
 0x1ba   : > { %1497 = vmatpush1.bf16.msra.mxu0 %v5159_v30  ;;  %1528 = vmatprep.mubr.bf16.mxu0 %v837_v29  ;;  %v1559_v29 = vld [vmem:[%s6213_s20] sm:$0x7f] }
 0x1bb   : > { %1498 = vmatprep.subr.bf16.mxu0 %v5164_v32  ;;  %4948 = vmatprep.mubr.msk.f32.mxu1 %vm5799_vm2, %v5798_v61 }
 0x1be   : > { %1499 = vmatpush1.bf16.msra.mxu0 %v5162_v2 }
 0x1bf   : > { %1500 = vmatprep.subr.bf16.mxu0 %v5167_v33  ;;  %v4619_v33 = vld [vmem:[%s6213_s20 + $0x8] sm:$0x7f] }
 0x1c2   : > { %1501 = vmatpush1.bf16.msra.mxu0 %v5165_v34 }
 0x1c3   : > { %1502 = vmatprep.subr.bf16.mxu0 %v5170_v35 }
 0x1c6   : > { %1503 = vmatpush1.bf16.msra.mxu0 %v5168_v36 }
 0x1c7   : > { %1504 = vmatprep.subr.bf16.mxu0 %v5173_v37 }
 0x1ca   : > { %1505 = vmatpush1.bf16.msra.mxu0 %v5171_v38 }
 0x1cb   : > { %1506 = vmatprep.subr.bf16.mxu0 %v5176_v39 }
 0x1ce   : > { %1507 = vmatpush1.bf16.msra.mxu0 %v5174_v40 }
 0x1cf   : > { %1508 = vmatprep.subr.bf16.mxu0 %v5179_v41 }
 0x1d2   : > { %1509 = vmatpush1.bf16.msra.mxu0 %v5177_v42  ;;  %v4620_v42 = vld [vmem:[%s6218_s15 + $0x8] sm:$0x7f] }
 0x1d3   : > { %1510 = vmatprep.subr.bf16.mxu0 %v5182_v43 }
 0x1d6   : > { %1511 = vmatpush1.bf16.msra.mxu0 %v5180_v44 }
 0x1d7   : > { %1512 = vmatprep.subr.bf16.mxu0 %v5185_v45 }
 0x1da   : > { %1513 = vmatpush2.bf16.msra.mxu0 %v5183_v46  ;;  %v1565_v46 = vld [vmem:[%s6218_s15] sm:$0x7f] }
 0x1db   : > { %1514 = vmatprep.subr.bf16.mxu0 %v5188_v47 }
 0x1de   : > { %1515 = vmatpush2.bf16.msra.mxu0 %v5186_v48 }
 0x1df   : > { %1516 = vmatprep.subr.bf16.mxu0 %v5191_v49 }
 0x1e2   : > { %1517 = vmatpush2.bf16.msra.mxu0 %v5189_v50 }
 0x1e3   : > { %1518 = vmatprep.subr.bf16.mxu0 %v5194_v51 }
 0x1e6   : > { %1519 = vmatpush2.bf16.msra.mxu0 %v5192_v52 }
 0x1e7   : > { %1520 = vmatprep.subr.bf16.mxu0 %v5197_v53 }
 0x1ea   : > { %1521 = vmatpush2.bf16.msra.mxu0 %v5195_v54 }
 0x1eb   : > { %1522 = vmatprep.subr.bf16.mxu0 %v5200_v55 }
 0x1ee   : > { %1523 = vmatpush2.bf16.msra.mxu0 %v5198_v56 }
 0x1ef   : > { %1524 = vmatprep.subr.bf16.mxu0 %v5203_v57 }
 0x1f2   : > { %1525 = vmatpush2.bf16.msra.mxu0 %v5201_v58 }
 0x1f3   : > { %1526 = vmatprep.subr.bf16.mxu0 %v5206_v59 }
 0x1f6   : > { %1527 = vmatpush2.bf16.msra.mxu0 %v5204_v60 }
 0x1f7   : > { %4936 = vmatprep.subr.mxu0 %v5798_v61 }
 0x1f9   : > { %1529 = vmatmul.mubr.bf16.vlgmr.msra.gmra.mxu0 %v6323_v31 }
 0x1fa   : > { %4938 = vmatprep.mubr.msk.f32.mxu0 %vm5799_vm2, %v5798_v61 }
 0x279   : > { %v1448_v4 = vpop.f32.mrf.mxu0  ;;  %v1489_v5 = vpop.f32.mrf.mxu1 }
 0x27a   : > { %1553 = vrot.lane.b32.xlu1 %v1489_v5, %s5800_s11  ;;  %v1552_v22 = vmul.f32 %v1537_v19, %v1489_v5  ;;  %v1547_v38 = vmul.f32 %v1537_v19, %v1448_v4 }
 0x27b   : > { %v1450_v6 = vpop.f32.mrf.mxu0  ;;  %v1491_v8 = vpop.f32.mrf.mxu1 }
 0x27c   : > { %1733 = vrot.lane.b32.xlu0 %v1491_v8, %s5800_s11  ;;  %v1732_v25 = vmul.f32 %v1537_v19, %v1491_v8  ;;  %v1727_v30 = vmul.f32 %v1537_v19, %v1450_v6  ;;  %v5218_v19 = vld [vmem:[%s6186_s17 + $0x44] ss:$8 sps:$4 sm:$0xff]  }
 0x27d   : > { %v1452_v9 = vpop.f32.mrf.mxu0  ;;  %v1493_v10 = vpop.f32.mrf.mxu1 }
 0x27e   : > { %1728 = vrot.lane.b32.xlu1 %v1450_v6, %s5800_s11  ;;  %v5207_v9 = vld [vmem:[%s6186_s17 + $0x70] ss:$8 sps:$4 sm:$0xff]  }
 0x27f   : > { %v1453_v13 = vpop.f32.mrf.mxu0  ;;  %v1494_v14 = vpop.f32.mrf.mxu1 }
 0x280   : > { %v5212_v13 = vld [vmem:[%s6186_s17 + $0x64] ss:$8 sps:$4 sm:$0xff]  }
 0x282   : > { %1548 = vrot.lane.b32.xlu1 %v1448_v4, %s5800_s11  ;;  %v5209_v4 = vld [vmem:[%s6186_s17 + $0x74] ss:$8 sps:$4 sm:$0xff]  }
 0x2b9   : > { %v1530_v15 = vpop.f32.mrf.mxu0 }
 0x2ba   : > { %1558 = vst [vmem:[%s6228_s30 + $0x7] sm:$0x1] %v1530_v15  ;;  %v1567_v43 = vrot.slane %v1530_v15, 1  ;;  %v5210_v15 = vld [vmem:[%s6186_s17 + $0x60] ss:$8 sps:$4 sm:$0xff]  }
 0x2bb   : > { %v1532_v16 = vpop.f32.mrf.mxu0 }
 0x2bc   : > { %4618 = vst [vmem:[%s6228_s30 + $0xf] sm:$0x1] %v1532_v16  ;;  %v1750_v39 = vrot.slane %v1532_v16, 1  ;;  %v1569_v49 = vsel %vm1563_vm3, %v1565_v46, %v1567_v43  ;;  %v5254_v43 = vld [vmem:[%s6186_s17 + $0x84] ss:$8 sps:$4 sm:$0xff]  }
 0x2bd   : > { %v1534_v17 = vpop.f32.mrf.mxu0 }
 0x2be   : > { %v1752_v48 = vsel %vm1563_vm3, %v4620_v42, %v1750_v39  ;;  %v5215_v17 = vld [vmem:[%s6186_s17 + $0x54] ss:$8 sps:$4 sm:$0xff]   ;;  %v5246_v39 = vld [vmem:[%s6186_s17 + $0xa0] ss:$8 sps:$4 sm:$0xff]  }
 0x2bf   : > { %v1535_v18 = vpop.f32.mrf.mxu0  ;;  %v5252_v42 = vld [vmem:[%s6186_s17 + $0x80] ss:$8 sps:$4 sm:$0xff]  }
 0x2c0   : > { %v5213_v18 = vld [vmem:[%s6186_s17 + $0x50] ss:$8 sps:$4 sm:$0xff]  }
 0x2ec   : > { %v1554_v21 = vpop.permute.xlu1 %1553 }
 0x2ed   : > { %v1555_v23 = vmul.f32 %v1554_v21, %v1538_v20  ;;  %v5221_v21 = vld [vmem:[%s6186_s17 + $0x34] ss:$8 sps:$4 sm:$0xff]  }
 0x2ee   : > { %v1734_v24 = vpop.permute.xlu0 %1733 }
 0x2ef   : > { %v1556_v26 = vadd.f32 %v1555_v23, %v1552_v22  ;;  %v1735_v27 = vmul.f32 %v1734_v24, %v1538_v20  ;;  %v5219_v22 = vld [vmem:[%s6186_s17 + $0x30] ss:$8 sps:$4 sm:$0xff]   ;;  %v5224_v23 = vld [vmem:[%s6186_s17 + $0x24] ss:$8 sps:$4 sm:$0xff]   ;;  %v5222_v24 = vld [vmem:[%s6186_s17 + $0x20] ss:$8 sps:$4 sm:$0xff]  }
 0x2f0   : > { %v1729_v28 = vpop.permute.xlu1 %1728 }
 0x2f1   : > { %1557 = vst [vmem:[%s6223_s14 + $0x7] sm:$0x1] %v1556_v26  ;;  %v1561_v31 = vrot.slane %v1556_v26, 1  ;;  %v1736_v32 = vadd.f32 %v1735_v27, %v1732_v25  ;;  %v1730_v2 = vmul.f32 %v1729_v28, %v1538_v20  ;;  %v5227_v25 = vld [vmem:[%s6186_s17 + $0x14] ss:$8 sps:$4 sm:$0xff]  }
 0x2f2   : > { %v5225_v26 = vld [vmem:[%s6186_s17 + $0x10] ss:$8 sps:$4 sm:$0xff]   ;;  %v5230_v27 = vld [vmem:[%s6186_s17 + $0x4] ss:$8 sps:$4 sm:$0xff]   ;;  %v5228_v28 = vld [vmem:[%s6186_s17] ss:$8 sps:$4 sm:$0xff]  }
 0x2f3   : > { %4617 = vst [vmem:[%s6223_s14 + $0xf] sm:$0x1] %v1736_v32  ;;  %v1744_v34 = vrot.slane %v1736_v32, 1  ;;  %v1731_v35 = vadd.f32 %v1730_v2, %v1727_v30  ;;  %v1564_v36 = vsel %vm1563_vm3, %v1559_v29, %v1561_v31  ;;  %v5233_v29 = vld [vmem:[%s6186_s17 + $0xf4] ss:$8 sps:$4 sm:$0xff]  }
 0x2f4   : > { %4937 = vmatpush3.xpose.msra.mxu0 %v1564_v36  ;;  %v1549_v37 = vpop.permute.xlu1 %1548  ;;  %v5231_v30 = vld [vmem:[%s6186_s17 + $0xf0] ss:$8 sps:$4 sm:$0xff]   ;;  %v5236_v31 = vld [vmem:[%s6186_s17 + $0xe4] ss:$8 sps:$4 sm:$0xff]   ;;  %v5234_v32 = vld [vmem:[%s6186_s17 + $0xe0] ss:$8 sps:$4 sm:$0xff]  }
 0x2f5   : > { %v1550_v40 = vmul.f32 %v1549_v37, %v1538_v20  ;;  %v1746_v41 = vsel %vm1563_vm3, %v4619_v33, %v1744_v34  ;;  %4941 = vmatprep.subr.mxu0 %v5798_v61  ;;  %v1753_v44 = vmul.f32 0.088388346, %v1731_v35  ;;  %v5216_v20 = vld [vmem:[%s6186_s17 + $0x40] ss:$8 sps:$4 sm:$0xff]   ;;  %v5239_v2 = vld [vmem:[%s6186_s17 + $0xd4] ss:$8 sps:$4 sm:$0xff]  }
 0x2f6   : > { %4947 = vmatpush3.xpose.msra.mxu1 %v1746_v41  ;;  %v5237_v33 = vld [vmem:[%s6186_s17 + $0xd0] ss:$8 sps:$4 sm:$0xff]   ;;  %v5242_v34 = vld [vmem:[%s6186_s17 + $0xc4] ss:$8 sps:$4 sm:$0xff]   ;;  %v5240_v35 = vld [vmem:[%s6186_s17 + $0xc0] ss:$8 sps:$4 sm:$0xff]  }
 0x2f7   : > { %v1551_v45 = vadd.f32 %v1550_v40, %v1547_v38  ;;  %4951 = vmatprep.subr.mxu1 %v5798_v61  ;;  %v5245_v36 = vld [vmem:[%s6186_s17 + $0xb4] ss:$8 sps:$4 sm:$0xff]   ;;  %v5243_v37 = vld [vmem:[%s6186_s17 + $0xb0] ss:$8 sps:$4 sm:$0xff]   ;;  %v5248_v38 = vld [vmem:[%s6186_s17 + $0xa4] ss:$8 sps:$4 sm:$0xff]  }
 0x2f8   : > { %v5251_v40 = vld [vmem:[%s6186_s17 + $0x94] ss:$8 sps:$4 sm:$0xff]   ;;  %v5249_v41 = vld [vmem:[%s6186_s17 + $0x90] ss:$8 sps:$4 sm:$0xff]  }
 0x2f9   : > { %v1570_v47 = vmul.f32 0.088388346, %v1551_v45  ;;  %4949 = vmatmul.mubr.f32.vlgmr.msra.gmra.mxu1 %v1753_v44 }
 0x2fa   : > { %4952 = vmatpush3.msra.mxu1 %v1752_v48  ;;  %4953 = vmatprep.mubr.msk.f32.mxu1 %vm5799_vm2, %v5798_v61 }
 0x2fb   : > { %4939 = vmatmul.mubr.f32.vlgmr.msra.gmra.mxu0 %v1570_v47  ;;  %2102 = vmatprep.subr.bf16.mxu1 %v5209_v4  ;;  %v2245_v4 = vld [vmem:[%s6192_s6 + $0x148] sm:$0xff] }
 0x2fc   : > { %4942 = vmatpush3.msra.mxu0 %v1569_v49  ;;  %4943 = vmatprep.mubr.msk.f32.mxu0 %vm5799_vm2, %v5798_v61 }
 0x3b9   : > { %v1820_v50 = vpop.f32.mrf.mxu1 }
 0x3ba   : > { %v1824_v51 = vsel %vm1641_vm4, %v1820_v50, -inf }
 0x3bb   : > { %1825 = vmax.xlane.f32.xlu1 %v1824_v51  ;;  %v1637_v52 = vpop.f32.mrf.mxu0  ;;  %v4950_v53 = vpop.f32.mrf.mxu1  ;;  %v2264_v51 = vld [vmem:[%s6192_s6 + $0x1e0] sm:$0xff] }
 0x3bc   : > { %v1642_v54 = vsel %vm1641_vm4, %v1637_v52, -inf }
 0x3bd   : > { %1643 = vmax.xlane.f32.xlu0 %v1642_v54  ;;  %v4940_v55 = vpop.f32.mrf.mxu0 }
 0x3be   : > { %v2265_v55 = vld [vmem:[%s6192_s6 + $0x1e8] sm:$0xff] }
 0x444   : > { %v1826_v56 = vpop.xlane.xlu1 %1825 }
 0x445   : > { %v1827_v57 = vsub.f32 %v1820_v50, %v1826_v56  ;;  %v2260_v50 = vld [vmem:[%s6192_s6 + $0x1c0] sm:$0xff] }
 0x446   : > { %v1644_v58 = vpop.xlane.xlu0 %1643  ;;  %v4710_v53 = vcombine.low %v2260_v50, %v2264_v51  ;;  %v4711_v54 = vcombine.high %v2260_v50, %v2264_v51  ;;  %v2252_v56 = vld [vmem:[%s6192_s6 + $0x180] sm:$0xff] }
 0x447   : > { %v1828_v59 = vmul.f32 1.442695, %v1827_v57  ;;  %v1645_v60 = vsub.f32 %v1637_v52, %v1644_v58  ;;  %v2261_v52 = vld [vmem:[%s6192_s6 + $0x1c8] sm:$0xff]  ;;  %v2256_v57 = vld [vmem:[%s6192_s6 + $0x1a0] sm:$0xff] }
 0x448   : > { %v4712_v58 = vcombine.low %v2261_v52, %v2265_v55  ;;  %2972 = vmatprep.subr.bf16.mxu0 %v4711_v54  ;;  %v2325_v54 = vld [vmem:[%s6192_s6 + $0x3c8] sm:$0xff] }
 0x449   : > { %5353 = vpow2.f32 %v1828_v59  ;;  %v1646_v62 = vmul.f32 1.442695, %v1645_v60  ;;  %v4713_v59 = vcombine.high %v2261_v52, %v2265_v55  ;;  %v4703_v60 = vcombine.high %v2252_v56, %v2256_v57  ;;  %v2324_v52 = vld [vmem:[%s6192_s6 + $0x3c0] sm:$0xff]  ;;  %v2329_v55 = vld [vmem:[%s6192_s6 + $0x3e8] sm:$0xff] }
 0x44b   : > { %5355 = vpow2.f32 %v1646_v62  ;;  %v2253_v62 = vld [vmem:[%s6192_s6 + $0x188] sm:$0xff] }
 0x456   : > { %v5354_v61 = vpop.eup %5353 }
 0x457   : > { %v1830_v63 = vsel %vm1641_vm4, %v5354_v61, 0.0 }
 0x458   : > { %v5356_v0 = vpop.eup %5355  ;;  %1831 = vadd.xlane.f32.xlu1 %v1830_v63  ;;  %v2244_v63 = vld [vmem:[%s6192_s6 + $0x140] sm:$0xff] }
 0x459   : > { %v1648_v1 = vsel %vm1641_vm4, %v5356_v0, 0.0 }
 0x45c   : > { %1649 = vadd.xlane.f32.xlu1 %v1648_v1  ;;  %v2248_v1 = vld [vmem:[%s6192_s6 + $0x160] sm:$0xff] }
 0x4e1   : > { %v1832_v5 = vpop.xlane.xlu1 %1831 }
 0x4e2   : > { %5357 = vrcp.f32 %v1832_v5  ;;  %v2249_v5 = vld [vmem:[%s6192_s6 + $0x168] sm:$0xff] }
 0x4e5   : > { %v1650_v6 = vpop.xlane.xlu1 %1649 }
 0x4e6   : > { %5359 = vrcp.f32 %v1650_v6  ;;  %v4702_v6 = vcombine.low %v2252_v56, %v2256_v57 }
 0x4ef   : > { %v5358_v8 = vpop.eup %5357 }
 0x4f0   : > { %v1834_v10 = vmul.f32 %v5358_v8, %v5354_v61  ;;  %v2257_v61 = vld [vmem:[%s6192_s6 + $0x1a8] sm:$0xff] }
 0x4f1   : > { %v4704_v8 = vcombine.low %v2253_v62, %v2257_v61 }
 0x4f2   : > { %4954 = vmatmul.mubr.msk.f32.vlgmr.msra.gmra.mxu1 %vm1653_vm5, %v1834_v10  ;;  %v4697_v10 = vcombine.high %v2245_v4, %v2249_v5 }
 0x4f3   : > { %v5360_v14 = vpop.eup %5359  ;;  %2103 = vmatpush1.bf16.msra.mxu1 %v5207_v9  ;;  %v4695_v9 = vcombine.high %v2244_v63, %v2248_v1 }
 0x4f4   : > { %v1652_v16 = vmul.f32 %v5360_v14, %v5356_v0  ;;  %2104 = vmatprep.subr.bf16.mxu1 %v5212_v13  ;;  %v4705_v0 = vcombine.high %v2253_v62, %v2257_v61  ;;  %v2236_v13 = vld [vmem:[%s6192_s6 + $0x100] sm:$0xff]  ;;  %v4776_v62 = vcombine.low %v2325_v54, %v2329_v55  ;;  %v5801_v61 = vmov 1966171168  }
 0x4f5   : > { %v2240_v14 = vld [vmem:[%s6192_s6 + $0x120] sm:$0xff] }
 0x4f6   : > { %4944 = vmatmul.mubr.msk.f32.vlgmr.msra.gmra.mxu0 %vm1653_vm5, %v1652_v16  ;;  %v2241_v16 = vld [vmem:[%s6192_s6 + $0x128] sm:$0xff] }
 0x4f7   : > { %2105 = vmatpush1.bf16.msra.mxu1 %v5210_v15  ;;  %2973 = vmatpush1.bf16.msra.mxu0 %v4710_v53  ;;  %v2237_v15 = vld [vmem:[%s6192_s6 + $0x108] sm:$0xff]  ;;  %v2328_v53 = vld [vmem:[%s6192_s6 + $0x3e0] sm:$0xff] }
 0x4f8   : > { %2106 = vmatprep.subr.bf16.mxu1 %v5215_v17  ;;  %2974 = vmatprep.subr.bf16.mxu0 %v4703_v60  ;;  %v4694_v17 = vcombine.low %v2244_v63, %v2248_v1  ;;  %v4774_v60 = vcombine.low %v2324_v52, %v2328_v53  ;;  %v2147_v63 = vunpack.c.l.s4 %v5801_v61 }
 0x4fb   : > { %2107 = vmatpush1.bf16.msra.mxu1 %v5213_v18  ;;  %2975 = vmatpush1.bf16.msra.mxu0 %v4702_v6  ;;  %v4696_v18 = vcombine.low %v2245_v4, %v2249_v5 }
 0x4fc   : > { %2108 = vmatprep.subr.bf16.mxu1 %v5218_v19  ;;  %2976 = vmatprep.subr.bf16.mxu0 %v4695_v9  ;;  %v4687_v19 = vcombine.high %v2236_v13, %v2240_v14 }
 0x4ff   : > { %2109 = vmatpush1.bf16.msra.mxu1 %v5216_v20  ;;  %v4689_v20 = vcombine.high %v2237_v15, %v2241_v16  ;;  %2977 = vmatpush1.bf16.msra.mxu0 %v4694_v17 }
 0x500   : > { %2110 = vmatprep.subr.bf16.mxu1 %v5221_v21  ;;  %v2228_v21 = vld [vmem:[%s6192_s6 + $0xc0] sm:$0xff]  ;;  %2978 = vmatprep.subr.bf16.mxu0 %v4687_v19 }
 0x503   : > { %2111 = vmatpush1.bf16.msra.mxu1 %v5219_v22  ;;  %v2232_v22 = vld [vmem:[%s6192_s6 + $0xe0] sm:$0xff] }
 0x504   : > { %2112 = vmatprep.subr.bf16.mxu1 %v5224_v23  ;;  %v2229_v23 = vld [vmem:[%s6192_s6 + $0xc8] sm:$0xff] }
 0x507   : > { %2113 = vmatpush1.bf16.msra.mxu1 %v5222_v24  ;;  %v2233_v24 = vld [vmem:[%s6192_s6 + $0xe8] sm:$0xff] }
 0x508   : > { %2114 = vmatprep.subr.bf16.mxu1 %v5227_v25  ;;  %v4686_v25 = vcombine.low %v2236_v13, %v2240_v14  ;;  %v5379_v14 = vld [vmem:[#allocation2] sm:$0x3] }
 0x50a   : > { %2979 = vmatpush1.bf16.msra.mxu0 %v4686_v25  ;;  %v2321_v25 = vld [vmem:[%s6192_s6 + $0x3a8] sm:$0xff] }
 0x50b   : > { %2115 = vmatpush1.bf16.msra.mxu1 %v5225_v26  ;;  %v4688_v26 = vcombine.low %v2237_v15, %v2241_v16 }
 0x50c   : > { %2116 = vmatprep.subr.bf16.mxu1 %v5230_v27  ;;  %v4679_v27 = vcombine.high %v2228_v21, %v2232_v22 }
 0x50e   : > { %2980 = vmatprep.subr.bf16.mxu0 %v4679_v27 }
 0x50f   : > { %2117 = vmatpush1.bf16.msra.mxu1 %v5228_v28  ;;  %v4681_v28 = vcombine.high %v2229_v23, %v2233_v24 }
 0x510   : > { %2118 = vmatprep.subr.bf16.mxu1 %v5233_v29  ;;  %v2220_v29 = vld [vmem:[%s6192_s6 + $0x80] sm:$0xff] }
 0x513   : > { %2119 = vmatpush2.bf16.msra.mxu1 %v5231_v30  ;;  %v2224_v30 = vld [vmem:[%s6192_s6 + $0xa0] sm:$0xff] }
 0x514   : > { %2120 = vmatprep.subr.bf16.mxu1 %v5236_v31  ;;  %v2221_v31 = vld [vmem:[%s6192_s6 + $0x88] sm:$0xff] }
 0x517   : > { %2121 = vmatpush2.bf16.msra.mxu1 %v5234_v32  ;;  %v2225_v32 = vld [vmem:[%s6192_s6 + $0xa8] sm:$0xff] }
 0x518   : > { %2122 = vmatprep.subr.bf16.mxu1 %v5239_v2  ;;  %v4678_v2 = vcombine.low %v2228_v21, %v2232_v22  ;;  %v2316_v21 = vld [vmem:[%s6192_s6 + $0x380] sm:$0xff] }
 0x519   : > { %v2320_v22 = vld [vmem:[%s6192_s6 + $0x3a0] sm:$0xff] }
 0x51a   : > { %2981 = vmatpush1.bf16.msra.mxu0 %v4678_v2  ;;  %v2313_v2 = vld [vmem:[%s6192_s6 + $0x368] sm:$0xff] }
 0x51b   : > { %2123 = vmatpush2.bf16.msra.mxu1 %v5237_v33  ;;  %v4680_v33 = vcombine.low %v2229_v23, %v2233_v24  ;;  %v2317_v23 = vld [vmem:[%s6192_s6 + $0x388] sm:$0xff]  ;;  %v4767_v24 = vcombine.high %v2316_v21, %v2320_v22 }
 0x51c   : > { %2124 = vmatprep.subr.bf16.mxu1 %v5242_v34  ;;  %v4671_v34 = vcombine.high %v2220_v29, %v2224_v30  ;;  %v4768_v27 = vcombine.low %v2317_v23, %v2321_v25 }
 0x51e   : > { %2982 = vmatprep.subr.bf16.mxu0 %v4671_v34 }
 0x51f   : > { %2125 = vmatpush2.bf16.msra.mxu1 %v5240_v35  ;;  %v4673_v35 = vcombine.high %v2221_v31, %v2225_v32 }
 0x520   : > { %2126 = vmatprep.subr.bf16.mxu1 %v5245_v36  ;;  %v2212_v36 = vld [vmem:[%s6192_s6 + $0x40] sm:$0xff] }
 0x523   : > { %2127 = vmatpush2.bf16.msra.mxu1 %v5243_v37  ;;  %v2216_v37 = vld [vmem:[%s6192_s6 + $0x60] sm:$0xff] }
 0x524   : > { %2128 = vmatprep.subr.bf16.mxu1 %v5248_v38  ;;  %v2213_v38 = vld [vmem:[%s6192_s6 + $0x48] sm:$0xff] }
 0x527   : > { %2129 = vmatpush2.bf16.msra.mxu1 %v5246_v39  ;;  %v2217_v39 = vld [vmem:[%s6192_s6 + $0x68] sm:$0xff] }
 0x528   : > { %2130 = vmatprep.subr.bf16.mxu1 %v5251_v40  ;;  %v4670_v40 = vcombine.low %v2220_v29, %v2224_v30  ;;  %v2308_v29 = vld [vmem:[%s6192_s6 + $0x340] sm:$0xff] }
 0x529   : > { %v2312_v30 = vld [vmem:[%s6192_s6 + $0x360] sm:$0xff] }
 0x52a   : > { %2983 = vmatpush1.bf16.msra.mxu0 %v4670_v40  ;;  %v2305_v40 = vld [vmem:[%s6192_s6 + $0x328] sm:$0xff] }
 0x52b   : > { %2131 = vmatpush2.bf16.msra.mxu1 %v5249_v41  ;;  %v4672_v41 = vcombine.low %v2221_v31, %v2225_v32  ;;  %v2309_v31 = vld [vmem:[%s6192_s6 + $0x348] sm:$0xff]  ;;  %v4759_v32 = vcombine.high %v2308_v29, %v2312_v30 }
 0x52c   : > { %2132 = vmatprep.subr.bf16.mxu1 %v5254_v43  ;;  %v4665_v43 = vcombine.high %v2213_v38, %v2217_v39  ;;  %v4760_v34 = vcombine.low %v2309_v31, %v2313_v2 }
 0x52f   : > { %2133 = vmatpush2.bf16.msra.mxu1 %v5252_v42  ;;  %v4663_v42 = vcombine.high %v2212_v36, %v2216_v37 }
 0x530   : > { %3013 = vmatprep.subr.bf16.mxu1 %v4713_v59  ;;  %v4777_v59 = vcombine.high %v2325_v54, %v2329_v55 }
 0x531   : > { %2984 = vmatprep.subr.bf16.mxu0 %v4663_v42  ;;  %v2296_v42 = vld [vmem:[%s6192_s6 + $0x2e0] sm:$0xff] }
 0x5b2   : > { %v1904_v44 = vpop.f32.mrf.mxu1 }
 0x5b3   : > { %v1909_v45 = vpack.c.bf16 %v1904_v44, %v1904_v44  ;;  %v2204_v44 = vld [vmem:[%s6192_s6] sm:$0xff] }
 0x5b4   : > { %v4955_v46 = vpop.f32.mrf.mxu1 }
 0x5b5   : > { %2134 = vmatprep.mubr.bf16.mxu1 %v1909_v45  ;;  %v2208_v45 = vld [vmem:[%s6192_s6 + $0x20] sm:$0xff]  ;;  %v2205_v46 = vld [vmem:[%s6192_s6 + $0x8] sm:$0xff] }
 0x5b6   : > { %v1723_v47 = vpop.f32.mrf.mxu0  ;;  %v4655_v50 = vcombine.high %v2204_v44, %v2208_v45  ;;  %v4654_v56 = vcombine.low %v2204_v44, %v2208_v45  ;;  %v2293_v45 = vld [vmem:[%s6192_s6 + $0x2c8] sm:$0xff] }
 0x5b7   : > { %v1908_v48 = vpack.c.bf16 %v1723_v47, %v1723_v47  ;;  %v2209_v47 = vld [vmem:[%s6192_s6 + $0x28] sm:$0xff] }
 0x5b8   : > { %v4945_v49 = vpop.f32.mrf.mxu0  ;;  %v4657_v51 = vcombine.high %v2205_v46, %v2209_v47  ;;  %v4656_v57 = vcombine.low %v2205_v46, %v2209_v47  ;;  %v2297_v46 = vld [vmem:[%s6192_s6 + $0x2e8] sm:$0xff] }
 0x5b9   : > { %2135 = vmatmul.mubr.bf16.vlgmr.msra.gmra.mxu1 %v1908_v48  ;;  %v4662_v48 = vcombine.low %v2212_v36, %v2216_v37  ;;  %v4664_v49 = vcombine.low %v2213_v38, %v2217_v39  ;;  %v2300_v36 = vld [vmem:[%s6192_s6 + $0x300] sm:$0xff]  ;;  %v2301_v38 = vld [vmem:[%s6192_s6 + $0x308] sm:$0xff]  ;;  %v4744_v55 = vcombine.low %v2293_v45, %v2297_v46 }
 0x5ba   : > { %3014 = vmatpush1.bf16.msra.mxu1 %v4712_v58  ;;  %v4775_v58 = vcombine.high %v2324_v52, %v2328_v53  ;;  %v2304_v37 = vld [vmem:[%s6192_s6 + $0x320] sm:$0xff]  ;;  %v4753_v44 = vcombine.high %v2301_v38, %v2305_v40  ;;  %v4752_v47 = vcombine.low %v2301_v38, %v2305_v40  ;;  %v2285_v52 = vld [vmem:[%s6192_s6 + $0x288] sm:$0xff]  ;;  %v2259_v38 = vld [vmem:[%s6192_s6 + $0x1b8] sm:$0xff] }
 0x5bb   : > { %3015 = vmatprep.subr.bf16.mxu1 %v4705_v0  ;;  %2985 = vmatpush1.bf16.msra.mxu0 %v4662_v48  ;;  %v2148_v0 = vunpack.c.0.s8 %v2147_v63  ;;  %v4751_v39 = vcombine.high %v2300_v36, %v2304_v37  ;;  %v2289_v53 = vld [vmem:[%s6192_s6 + $0x2a8] sm:$0xff] }
 0x5bc   : > { %2986 = vmatprep.subr.bf16.mxu0 %v4655_v50  ;;  %v2284_v50 = vld [vmem:[%s6192_s6 + $0x280] sm:$0xff]  ;;  %v4736_v63 = vcombine.low %v2285_v52, %v2289_v53 }
 0x5bd   : > { %v6469_v4 = vsub.s32 %v2148_v0, %v6242_v7 }
 0x5be   : > { %3016 = vmatpush1.bf16.msra.mxu1 %v4704_v8 }
 0x5bf   : > { %3017 = vmatprep.subr.bf16.mxu1 %v4697_v10  ;;  %2987 = vmatpush1.bf16.msra.mxu0 %v4654_v56 }
 0x5c0   : > { %2988 = vmatprep.subr.bf16.mxu0 %v4775_v58  ;;  %v2276_v58 = vld [vmem:[%s6192_s6 + $0x240] sm:$0xff] }
 0x5c2   : > { %3018 = vmatpush1.bf16.msra.mxu1 %v4696_v18 }
 0x5c3   : > { %3019 = vmatprep.subr.bf16.mxu1 %v4689_v20  ;;  %2989 = vmatpush2.bf16.msra.mxu0 %v4774_v60  ;;  %v2277_v60 = vld [vmem:[%s6192_s6 + $0x248] sm:$0xff] }
 0x5c4   : > { %2990 = vmatprep.subr.bf16.mxu0 %v4767_v24 }
 0x5c6   : > { %3020 = vmatpush1.bf16.msra.mxu1 %v4688_v26  ;;  %v4766_v26 = vcombine.low %v2316_v21, %v2320_v22  ;;  %v2267_v22 = vld [vmem:[%s6192_s6 + $0x1f8] sm:$0xff] }
 0x5c7   : > { %3021 = vmatprep.subr.bf16.mxu1 %v4681_v28  ;;  %v4769_v28 = vcombine.high %v2317_v23, %v2321_v25 }
 0x5c8   : > { %2991 = vmatpush2.bf16.msra.mxu0 %v4766_v26 }
 0x5c9   : > { %2992 = vmatprep.subr.bf16.mxu0 %v4759_v32 }
 0x5ca   : > { %3022 = vmatpush1.bf16.msra.mxu1 %v4680_v33  ;;  %v4758_v33 = vcombine.low %v2308_v29, %v2312_v30 }
 0x5cb   : > { %3023 = vmatprep.subr.bf16.mxu1 %v4673_v35  ;;  %v4761_v35 = vcombine.high %v2309_v31, %v2313_v2  ;;  %v2162_v31 = vld [vmem:[%s6178_s1] sm:$0x3] }
 0x5cc   : > { %2993 = vmatpush2.bf16.msra.mxu0 %v4758_v33 }
 0x5cd   : > { %2994 = vmatprep.subr.bf16.mxu0 %v4751_v39 }
 0x5ce   : > { %3024 = vmatpush1.bf16.msra.mxu1 %v4672_v41  ;;  %v2292_v41 = vld [vmem:[%s6192_s6 + $0x2c0] sm:$0xff] }
 0x5cf   : > { %3025 = vmatprep.subr.bf16.mxu1 %v4665_v43  ;;  %v4750_v43 = vcombine.low %v2300_v36, %v2304_v37  ;;  %v4743_v48 = vcombine.high %v2292_v41, %v2296_v42  ;;  %v4742_v54 = vcombine.low %v2292_v41, %v2296_v42  ;;  %v2258_v36 = vld [vmem:[%s6192_s6 + $0x1b0] sm:$0xff]  ;;  %v2255_v37 = vld [vmem:[%s6192_s6 + $0x198] sm:$0xff] }
 0x5d0   : > { %v2246_v41 = vld [vmem:[%s6192_s6 + $0x150] sm:$0xff] }
 0x5d1   : > { %2995 = vmatpush2.bf16.msra.mxu0 %v4750_v43  ;;  %v4709_v43 = vcombine.high %v2255_v37, %v2259_v38 }
 0x5d2   : > { %3026 = vmatpush1.bf16.msra.mxu1 %v4664_v49  ;;  %v4745_v49 = vcombine.high %v2293_v45, %v2297_v46  ;;  %2996 = vmatprep.subr.bf16.mxu0 %v4743_v48  ;;  %v2247_v45 = vld [vmem:[%s6192_s6 + $0x158] sm:$0xff]  ;;  %v4708_v48 = vcombine.low %v2255_v37, %v2259_v38 }
 0x5d3   : > { %3027 = vmatprep.subr.bf16.mxu1 %v4657_v51  ;;  %v2288_v51 = vld [vmem:[%s6192_s6 + $0x2a0] sm:$0xff]  ;;  %v2251_v46 = vld [vmem:[%s6192_s6 + $0x178] sm:$0xff] }
 0x5d4   : > { %v4735_v56 = vcombine.high %v2284_v50, %v2288_v51  ;;  %v4734_v61 = vcombine.low %v2284_v50, %v2288_v51  ;;  %v4701_v50 = vcombine.high %v2247_v45, %v2251_v46  ;;  %v2238_v51 = vld [vmem:[%s6192_s6 + $0x110] sm:$0xff] }
 0x5d5   : > { %2997 = vmatpush2.bf16.msra.mxu0 %v4742_v54  ;;  %v2243_v54 = vld [vmem:[%s6192_s6 + $0x138] sm:$0xff] }
 0x5d6   : > { %3028 = vmatpush1.bf16.msra.mxu1 %v4656_v57  ;;  %v4737_v57 = vcombine.high %v2285_v52, %v2289_v53  ;;  %2998 = vmatprep.subr.bf16.mxu0 %v4735_v56  ;;  %v2242_v52 = vld [vmem:[%s6192_s6 + $0x130] sm:$0xff]  ;;  %v2239_v53 = vld [vmem:[%s6192_s6 + $0x118] sm:$0xff]  ;;  %v4700_v56 = vcombine.low %v2247_v45, %v2251_v46 }
 0x5d7   : > { %3029 = vmatprep.subr.bf16.mxu1 %v4777_v59  ;;  %v2280_v59 = vld [vmem:[%s6192_s6 + $0x260] sm:$0xff] }
 0x5d8   : > { %v4727_v0 = vcombine.high %v2276_v58, %v2280_v59 }
 0x5d9   : > { %2999 = vmatpush2.bf16.msra.mxu0 %v4734_v61  ;;  %v2235_v61 = vld [vmem:[%s6192_s6 + $0xf8] sm:$0xff] }
 0x5da   : > { %3030 = vmatpush2.bf16.msra.mxu1 %v4776_v62  ;;  %v2281_v62 = vld [vmem:[%s6192_s6 + $0x268] sm:$0xff]  ;;  %3000 = vmatprep.subr.bf16.mxu0 %v4727_v0  ;;  %v4692_v0 = vcombine.low %v2239_v53, %v2243_v54 }
 0x5db   : > { %3031 = vmatprep.subr.bf16.mxu1 %v4769_v28 }
 0x5de   : > { %3032 = vmatpush2.bf16.msra.mxu1 %v4768_v27 }
 0x5df   : > { %3033 = vmatprep.subr.bf16.mxu1 %v4761_v35  ;;  %v2254_v35 = vld [vmem:[%s6192_s6 + $0x190] sm:$0xff] }
 0x5e0   : > { %v4707_v42 = vcombine.high %v2254_v35, %v2258_v36 }
 0x5e2   : > { %3034 = vmatpush2.bf16.msra.mxu1 %v4760_v34 }
 0x5e3   : > { %3035 = vmatprep.subr.bf16.mxu1 %v4753_v44  ;;  %v2250_v44 = vld [vmem:[%s6192_s6 + $0x170] sm:$0xff] }
 0x5e6   : > { %3036 = vmatpush2.bf16.msra.mxu1 %v4752_v47  ;;  %v4706_v47 = vcombine.low %v2254_v35, %v2258_v36  ;;  %v2331_v35 = vld [vmem:[%s6192_s6 + $0x3f8] sm:$0xff] }
 0x5e7   : > { %3037 = vmatprep.subr.bf16.mxu1 %v4745_v49  ;;  %v4699_v49 = vcombine.high %v2246_v41, %v2250_v44 }
 0x5ea   : > { %3038 = vmatpush2.bf16.msra.mxu1 %v4744_v55  ;;  %v4698_v55 = vcombine.low %v2246_v41, %v2250_v44  ;;  %v2318_v41 = vld [vmem:[%s6192_s6 + $0x390] sm:$0xff]  ;;  %v2323_v44 = vld [vmem:[%s6192_s6 + $0x3b8] sm:$0xff] }
 0x5eb   : > { %3039 = vmatprep.subr.bf16.mxu1 %v4737_v57  ;;  %v4691_v57 = vcombine.high %v2238_v51, %v2242_v52 }
 0x5ee   : > { %3040 = vmatpush2.bf16.msra.mxu1 %v4736_v63  ;;  %v4690_v63 = vcombine.low %v2238_v51, %v2242_v52  ;;  %v2311_v51 = vld [vmem:[%s6192_s6 + $0x358] sm:$0xff] }
 0x5ef   : > { %v2315_v52 = vld [vmem:[%s6192_s6 + $0x378] sm:$0xff] }
 0x679   : > { %v2136_v1 = vpop.f32.mrf.mxu1 }
 0x67b   : > { %v2138_v5 = vpop.f32.mrf.mxu1 }
 0x67c   : > { %v2145_v6 = vcombine.low %v2136_v1, %v2138_v5  ;;  %v4729_v1 = vcombine.high %v2277_v60, %v2281_v62  ;;  %v2268_v5 = vld [vmem:[%s6192_s6 + $0x200] sm:$0xff] }
 0x67d   : > { %v2140_v8 = vpop.f32.mrf.mxu1 }
 0x67e   : > { %v2152_v9 = vrot.slane %v2145_v6, %v6469_v4  ;;  %v2272_v6 = vld [vmem:[%s6192_s6 + $0x220] sm:$0xff]  ;;  %v2269_v8 = vld [vmem:[%s6192_s6 + $0x208] sm:$0xff]  ;;  %3041 = vmatprep.subr.bf16.mxu1 %v4729_v1 }
 0x67f   : > { %v2141_v10 = vpop.f32.mrf.mxu1 }
 0x680   : > { %v2159_v13 = vrot.slane %v2152_v9, %v6469_v4  ;;  %v2273_v9 = vld [vmem:[%s6192_s6 + $0x228] sm:$0xff]  ;;  %v4726_v10 = vcombine.low %v2276_v58, %v2280_v59  ;;  %v4693_v58 = vcombine.high %v2239_v53, %v2243_v54  ;;  %v2230_v59 = vld [vmem:[%s6192_s6 + $0xd0] sm:$0xff] }
 0x682   : > { %v6473_v15 = vadd.f32 %v5379_v14, %v2159_v13  ;;  %v4728_v13 = vcombine.low %v2277_v60, %v2281_v62  ;;  %v4719_v14 = vcombine.high %v2268_v5, %v2272_v6  ;;  %3001 = vmatpush2.bf16.msra.mxu0 %v4726_v10  ;;  %v2234_v60 = vld [vmem:[%s6192_s6 + $0xf0] sm:$0xff]  ;;  %v2231_v62 = vld [vmem:[%s6192_s6 + $0xd8] sm:$0xff] }
 0x683   : > { %v4683_v1 = vcombine.high %v2230_v59, %v2234_v60  ;;  %v2227_v10 = vld [vmem:[%s6192_s6 + $0xb8] sm:$0xff] }
 0x684   : > { %v2163_v16 = vmul.f32 %v6473_v15, %v6473_v15  ;;  %3042 = vmatpush2.bf16.msra.mxu1 %v4728_v13  ;;  %3002 = vmatprep.subr.bf16.mxu0 %v4719_v14  ;;  %v4682_v13 = vcombine.low %v2230_v59, %v2234_v60  ;;  %v4684_v14 = vcombine.low %v2231_v62, %v2235_v61  ;;  %v2303_v59 = vld [vmem:[%s6192_s6 + $0x318] sm:$0xff] }
 0x685   : > { %v2307_v60 = vld [vmem:[%s6192_s6 + $0x338] sm:$0xff] }
 0x686   : > { %v2168_v7 = vrot.slane %v2163_v16, %v6248_v11  ;;  %v2172_v17 = vrot.slane %v2163_v16, %v6251_v12  ;;  %v4721_v16 = vcombine.high %v2269_v8, %v2273_v9 }
 0x688   : > { %v2175_v18 = vsel %vm807_vm1, %v2168_v7, 0.0  ;;  %v2176_v19 = vsel %vm807_vm1, %v2172_v17, 0.0  ;;  %v4718_v7 = vcombine.low %v2268_v5, %v2272_v6  ;;  %v4720_v17 = vcombine.low %v2269_v8, %v2273_v9  ;;  %3043 = vmatprep.subr.bf16.mxu1 %v4721_v16  ;;  %v2222_v6 = vld [vmem:[%s6192_s6 + $0x90] sm:$0xff]  ;;  %v2223_v9 = vld [vmem:[%s6192_s6 + $0x98] sm:$0xff] }
 0x689   : > { %v2177_v20 = vadd.f32 %v2176_v19, %v2175_v18  ;;  %v2262_v18 = vld [vmem:[%s6192_s6 + $0x1d0] sm:$0xff]  ;;  %v4685_v5 = vcombine.high %v2231_v62, %v2235_v61  ;;  %v4764_v61 = vcombine.low %v2311_v51, %v2315_v52 }
 0x68a   : > { %3003 = vmatpush2.bf16.msra.mxu0 %v4718_v7  ;;  %v2266_v19 = vld [vmem:[%s6192_s6 + $0x1f0] sm:$0xff]  ;;  %3044 = vmatpush2.bf16.msra.mxu1 %v4720_v17  ;;  %v4677_v7 = vcombine.high %v2223_v9, %v2227_v10 }
 0x68b   : > { %2178 = vadd.xlane.f32.xlu1 %v2177_v20  ;;  %v2263_v20 = vld [vmem:[%s6192_s6 + $0x1d8] sm:$0xff]  ;;  %v4715_v21 = vcombine.high %v2262_v18, %v2266_v19  ;;  %v4714_v23 = vcombine.low %v2262_v18, %v2266_v19  ;;  %v2226_v8 = vld [vmem:[%s6192_s6 + $0xb0] sm:$0xff] }
 0x68c   : > { %v4716_v24 = vcombine.low %v2263_v20, %v2267_v22  ;;  %v4717_v25 = vcombine.high %v2263_v20, %v2267_v22  ;;  %v4675_v16 = vcombine.high %v2222_v6, %v2226_v8  ;;  %v2214_v17 = vld [vmem:[%s6192_s6 + $0x50] sm:$0xff]  ;;  %v2215_v19 = vld [vmem:[%s6192_s6 + $0x58] sm:$0xff]  ;;  %v4676_v22 = vcombine.low %v2223_v9, %v2227_v10 }
 0x68d   : > { %3054 = vmatprep.subr.bf16.mxu0 %v4715_v21  ;;  %v2218_v18 = vld [vmem:[%s6192_s6 + $0x70] sm:$0xff]  ;;  %v2219_v20 = vld [vmem:[%s6192_s6 + $0x78] sm:$0xff]  ;;  %v4674_v21 = vcombine.low %v2222_v6, %v2226_v8  ;;  %v4756_v10 = vcombine.low %v2303_v59, %v2307_v60 }
 0x68e   : > { %3095 = vmatprep.subr.bf16.mxu1 %v4717_v25  ;;  %v2206_v25 = vld [vmem:[%s6192_s6 + $0x10] sm:$0xff]  ;;  %v2295_v6 = vld [vmem:[%s6192_s6 + $0x2d8] sm:$0xff] }
 0x68f   : > { %v2299_v8 = vld [vmem:[%s6192_s6 + $0x2f8] sm:$0xff] }
 0x714   : > { %v2179_v26 = vpop.xlane.xlu1 %2178 }
 0x715   : > { %v2180_v27 = vmul.f32 0.00390625, %v2179_v26  ;;  %v2210_v26 = vld [vmem:[%s6192_s6 + $0x30] sm:$0xff] }
 0x716   : > { %v4658_v36 = vcombine.low %v2206_v25, %v2210_v26 }
 0x717   : > { %v2181_v28 = vadd.f32 1e-06, %v2180_v27  ;;  %v2207_v27 = vld [vmem:[%s6192_s6 + $0x18] sm:$0xff] }
 0x719   : > { %5361 = vrsqrt.f32 %v2181_v28  ;;  %v2211_v28 = vld [vmem:[%s6192_s6 + $0x38] sm:$0xff] }
 0x71a   : > { %v4660_v37 = vcombine.low %v2207_v27, %v2211_v28 }
 0x726   : > { %v5362_v29 = vpop.eup %5361 }
 0x727   : > { %v2187_v30 = vrot.slane %v5362_v29, %v6248_v11  ;;  %v4666_v29 = vcombine.low %v2214_v17, %v2218_v18 }
 0x729   : > { %v2189_v32 = vmul.f32 %v2187_v30, %v6473_v15  ;;  %v4668_v30 = vcombine.low %v2215_v19, %v2219_v20 }
 0x72b   : > { %v2190_v2 = vmul.f32 %v2189_v32, %v2162_v31  ;;  %v4659_v31 = vcombine.high %v2206_v25, %v2210_v26  ;;  %v4661_v32 = vcombine.high %v2207_v27, %v2211_v28  ;;  %v2279_v25 = vld [vmem:[%s6192_s6 + $0x258] sm:$0xff] }
 0x72c   : > { %v2283_v26 = vld [vmem:[%s6192_s6 + $0x278] sm:$0xff] }
 0x72d   : > { %v2199_v33 = vrot.slane %v2190_v2, %v6251_v12  ;;  %v2195_v34 = vrot.slane %v2190_v2, %v6248_v11  ;;  %v2326_v2 = vld [vmem:[%s6192_s6 + $0x3d0] sm:$0xff] }
 0x72f   : > { %v2203_v39 = vpack.c.bf16 %v2199_v33, %v2199_v33  ;;  %v6522_v40 = vpack.c.bf16 %v2195_v34, %v2195_v34  ;;  %v2330_v33 = vld [vmem:[%s6192_s6 + $0x3f0] sm:$0xff]  ;;  %v2327_v34 = vld [vmem:[%s6192_s6 + $0x3d8] sm:$0xff] }
 0x730   : > { %v4779_v38 = vcombine.high %v2326_v2, %v2330_v33  ;;  %v4778_v45 = vcombine.low %v2326_v2, %v2330_v33  ;;  %v4780_v46 = vcombine.low %v2327_v34, %v2331_v35  ;;  %v2271_v2 = vld [vmem:[%s6192_s6 + $0x218] sm:$0xff] }
 0x731   : > { %3004 = vmatprep.mubr.bf16.mxu0 %v2203_v39  ;;  %3045 = vmatprep.mubr.bf16.mxu1 %v2203_v39  ;;  %v2275_v33 = vld [vmem:[%s6192_s6 + $0x238] sm:$0xff] }
 0x732   : > { %3005 = vmatmul.mubr.bf16.vlgmr.msra.gmra.mxu0 %v6522_v40  ;;  %3046 = vmatmul.mubr.bf16.vlgmr.msra.gmra.mxu1 %v6522_v40 }
 0x733   : > { %3055 = vmatpush1.bf16.msra.mxu0 %v4714_v23  ;;  %3096 = vmatpush1.bf16.msra.mxu1 %v4716_v24  ;;  %v4667_v23 = vcombine.high %v2214_v17, %v2218_v18  ;;  %v4669_v24 = vcombine.high %v2215_v19, %v2219_v20  ;;  %v2287_v17 = vld [vmem:[%s6192_s6 + $0x298] sm:$0xff]  ;;  %v4748_v20 = vcombine.low %v2295_v6, %v2299_v8 }
 0x734   : > { %3086 = vmatprep.mubr.bf16.mxu0 %v2203_v39  ;;  %3127 = vmatprep.mubr.bf16.mxu1 %v2203_v39  ;;  %v4781_v39 = vcombine.high %v2327_v34, %v2331_v35  ;;  %v2291_v18 = vld [vmem:[%s6192_s6 + $0x2b8] sm:$0xff]  ;;  %v4732_v35 = vcombine.low %v2279_v25, %v2283_v26 }
 0x735   : > { %3056 = vmatprep.subr.bf16.mxu0 %v4707_v42  ;;  %3097 = vmatprep.subr.bf16.mxu1 %v4709_v43  ;;  %v2322_v42 = vld [vmem:[%s6192_s6 + $0x3b0] sm:$0xff]  ;;  %v2319_v43 = vld [vmem:[%s6192_s6 + $0x398] sm:$0xff]  ;;  %v4740_v28 = vcombine.low %v2287_v17, %v2291_v18 }
 0x736   : > { %v4770_v53 = vcombine.low %v2318_v41, %v2322_v42  ;;  %v4772_v54 = vcombine.low %v2319_v43, %v2323_v44 }
 0x737   : > { %3057 = vmatpush1.bf16.msra.mxu0 %v4706_v47  ;;  %3098 = vmatpush1.bf16.msra.mxu1 %v4708_v48  ;;  %v4771_v47 = vcombine.high %v2318_v41, %v2322_v42  ;;  %v4773_v48 = vcombine.high %v2319_v43, %v2323_v44  ;;  %v5257_v41 = vld [vmem:[%s6194_s26 + $0x74] ss:$8 sps:$4 sm:$0xff]   ;;  %v5255_v43 = vld [vmem:[%s6194_s26 + $0x70] ss:$8 sps:$4 sm:$0xff]  }
 0x738   : > { %3058 = vmatprep.subr.bf16.mxu0 %v4699_v49  ;;  %3099 = vmatprep.subr.bf16.mxu1 %v4701_v50  ;;  %v2310_v49 = vld [vmem:[%s6192_s6 + $0x350] sm:$0xff] }
 0x739   : > { %v2314_v50 = vld [vmem:[%s6192_s6 + $0x370] sm:$0xff] }
 0x73a   : > { %v4762_v62 = vcombine.low %v2310_v49, %v2314_v50  ;;  %v5260_v42 = vld [vmem:[%s6194_s26 + $0x174] ss:$8 sps:$4 sm:$0xff]   ;;  %v5258_v44 = vld [vmem:[%s6194_s26 + $0x170] ss:$8 sps:$4 sm:$0xff]  }
 0x73b   : > { %3059 = vmatpush1.bf16.msra.mxu0 %v4698_v55  ;;  %3100 = vmatpush1.bf16.msra.mxu1 %v4700_v56  ;;  %v4763_v55 = vcombine.high %v2310_v49, %v2314_v50  ;;  %v4765_v56 = vcombine.high %v2311_v51, %v2315_v52  ;;  %v5272_v49 = vld [vmem:[%s6194_s26 + $0x154] ss:$8 sps:$4 sm:$0xff]   ;;  %v5267_v50 = vld [vmem:[%s6194_s26 + $0x50] ss:$8 sps:$4 sm:$0xff]   ;;  %v5275_v52 = vld [vmem:[%s6194_s26 + $0x44] ss:$8 sps:$4 sm:$0xff]  }
 0x73c   : > { %3060 = vmatprep.subr.bf16.mxu0 %v4691_v57  ;;  %3101 = vmatprep.subr.bf16.mxu1 %v4693_v58  ;;  %v2302_v57 = vld [vmem:[%s6192_s6 + $0x310] sm:$0xff] }
 0x73d   : > { %v2306_v58 = vld [vmem:[%s6192_s6 + $0x330] sm:$0xff] }
 0x73e   : > { %v4754_v9 = vcombine.low %v2302_v57, %v2306_v58  ;;  %v5270_v51 = vld [vmem:[%s6194_s26 + $0x150] ss:$8 sps:$4 sm:$0xff]  }
 0x73f   : > { %3061 = vmatpush1.bf16.msra.mxu0 %v4690_v63  ;;  %3102 = vmatpush1.bf16.msra.mxu1 %v4692_v0  ;;  %v4755_v63 = vcombine.high %v2302_v57, %v2306_v58  ;;  %v4757_v0 = vcombine.high %v2303_v59, %v2307_v60  ;;  %v5284_v57 = vld [vmem:[%s6194_s26 + $0x134] ss:$8 sps:$4 sm:$0xff]   ;;  %v5279_v58 = vld [vmem:[%s6194_s26 + $0x30] ss:$8 sps:$4 sm:$0xff]   ;;  %v5287_v60 = vld [vmem:[%s6194_s26 + $0x24] ss:$8 sps:$4 sm:$0xff]  }
 0x740   : > { %3062 = vmatprep.subr.bf16.mxu0 %v4683_v1  ;;  %3103 = vmatprep.subr.bf16.mxu1 %v4685_v5  ;;  %v2294_v1 = vld [vmem:[%s6192_s6 + $0x2d0] sm:$0xff] }
 0x741   : > { %v2298_v5 = vld [vmem:[%s6192_s6 + $0x2f0] sm:$0xff] }
 0x742   : > { %v4746_v19 = vcombine.low %v2294_v1, %v2298_v5  ;;  %v5282_v59 = vld [vmem:[%s6194_s26 + $0x130] ss:$8 sps:$4 sm:$0xff]  }
 0x743   : > { %3063 = vmatpush1.bf16.msra.mxu0 %v4682_v13  ;;  %3104 = vmatpush1.bf16.msra.mxu1 %v4684_v14  ;;  %v4747_v13 = vcombine.high %v2294_v1, %v2298_v5  ;;  %v4749_v14 = vcombine.high %v2295_v6, %v2299_v8  ;;  %v5296_v1 = vld [vmem:[%s6194_s26 + $0x114] ss:$8 sps:$4 sm:$0xff]   ;;  %v5291_v5 = vld [vmem:[%s6194_s26 + $0x10] ss:$8 sps:$4 sm:$0xff]   ;;  %v5299_v8 = vld [vmem:[%s6194_s26 + $0x4] ss:$8 sps:$4 sm:$0xff]  }
 0x744   : > { %3064 = vmatprep.subr.bf16.mxu0 %v4675_v16  ;;  %3105 = vmatprep.subr.bf16.mxu1 %v4677_v7  ;;  %v2286_v16 = vld [vmem:[%s6192_s6 + $0x290] sm:$0xff] }
 0x745   : > { %v2290_v7 = vld [vmem:[%s6192_s6 + $0x2b0] sm:$0xff] }
 0x746   : > { %v4738_v27 = vcombine.low %v2286_v16, %v2290_v7  ;;  %v5294_v6 = vld [vmem:[%s6194_s26 + $0x110] ss:$8 sps:$4 sm:$0xff]  }
 0x747   : > { %3065 = vmatpush1.bf16.msra.mxu0 %v4674_v21  ;;  %3106 = vmatpush1.bf16.msra.mxu1 %v4676_v22  ;;  %v4739_v21 = vcombine.high %v2286_v16, %v2290_v7  ;;  %v4741_v22 = vcombine.high %v2287_v17, %v2291_v18  ;;  %v5303_v16 = vld [vmem:[%s6194_s26 + $0xf0] ss:$8 sps:$4 sm:$0xff]   ;;  %v5308_v17 = vld [vmem:[%s6194_s26 + $0x1f4] ss:$8 sps:$4 sm:$0xff]   ;;  %v5311_v18 = vld [vmem:[%s6194_s26 + $0xe4] ss:$8 sps:$4 sm:$0xff]  }
 0x748   : > { %3066 = vmatprep.subr.bf16.mxu0 %v4667_v23  ;;  %3107 = vmatprep.subr.bf16.mxu1 %v4669_v24  ;;  %v2278_v23 = vld [vmem:[%s6192_s6 + $0x250] sm:$0xff] }
 0x749   : > { %v2282_v24 = vld [vmem:[%s6192_s6 + $0x270] sm:$0xff] }
 0x74a   : > { %v4730_v34 = vcombine.low %v2278_v23, %v2282_v24  ;;  %v5306_v7 = vld [vmem:[%s6194_s26 + $0x1f0] ss:$8 sps:$4 sm:$0xff]  }
 0x74b   : > { %3067 = vmatpush1.bf16.msra.mxu0 %v4666_v29  ;;  %3108 = vmatpush1.bf16.msra.mxu1 %v4668_v30  ;;  %v4731_v29 = vcombine.high %v2278_v23, %v2282_v24  ;;  %v4733_v30 = vcombine.high %v2279_v25, %v2283_v26  ;;  %v5320_v23 = vld [vmem:[%s6194_s26 + $0x1d4] ss:$8 sps:$4 sm:$0xff]   ;;  %v5315_v24 = vld [vmem:[%s6194_s26 + $0xd0] ss:$8 sps:$4 sm:$0xff]   ;;  %v5323_v26 = vld [vmem:[%s6194_s26 + $0xc4] ss:$8 sps:$4 sm:$0xff]  }
 0x74c   : > { %3068 = vmatprep.subr.bf16.mxu0 %v4659_v31  ;;  %3109 = vmatprep.subr.bf16.mxu1 %v4661_v32  ;;  %v2270_v31 = vld [vmem:[%s6192_s6 + $0x210] sm:$0xff] }
 0x74d   : > { %v2274_v32 = vld [vmem:[%s6192_s6 + $0x230] sm:$0xff] }
 0x74e   : > { %v5318_v25 = vld [vmem:[%s6194_s26 + $0x1d0] ss:$8 sps:$4 sm:$0xff]  }
 0x74f   : > { %3069 = vmatpush1.bf16.msra.mxu0 %v4658_v36  ;;  %3110 = vmatpush1.bf16.msra.mxu1 %v4660_v37  ;;  %v4723_v36 = vcombine.high %v2270_v31, %v2274_v32  ;;  %v4725_v37 = vcombine.high %v2271_v2, %v2275_v33 }
 0x750   : > { %3070 = vmatprep.subr.bf16.mxu0 %v4779_v38  ;;  %3111 = vmatprep.subr.bf16.mxu1 %v4781_v39  ;;  %v4722_v38 = vcombine.low %v2270_v31, %v2274_v32  ;;  %v4724_v39 = vcombine.low %v2271_v2, %v2275_v33  ;;  %v5332_v31 = vld [vmem:[%s6194_s26 + $0x1b4] ss:$8 sps:$4 sm:$0xff]   ;;  %v5327_v32 = vld [vmem:[%s6194_s26 + $0xb0] ss:$8 sps:$4 sm:$0xff]   ;;  %v5335_v33 = vld [vmem:[%s6194_s26 + $0xa4] ss:$8 sps:$4 sm:$0xff]  }
 0x751   : > { %v5330_v2 = vld [vmem:[%s6194_s26 + $0x1b0] ss:$8 sps:$4 sm:$0xff]  }
 0x753   : > { %3071 = vmatpush2.bf16.msra.mxu0 %v4778_v45  ;;  %3112 = vmatpush2.bf16.msra.mxu1 %v4780_v46  ;;  %v5263_v45 = vld [vmem:[%s6194_s26 + $0x64] ss:$8 sps:$4 sm:$0xff]  }
 0x754   : > { %3072 = vmatprep.subr.bf16.mxu0 %v4771_v47  ;;  %3113 = vmatprep.subr.bf16.mxu1 %v4773_v48  ;;  %v5266_v46 = vld [vmem:[%s6194_s26 + $0x164] ss:$8 sps:$4 sm:$0xff]   ;;  %v5261_v47 = vld [vmem:[%s6194_s26 + $0x60] ss:$8 sps:$4 sm:$0xff]  }
 0x755   : > { %v5264_v48 = vld [vmem:[%s6194_s26 + $0x160] ss:$8 sps:$4 sm:$0xff]  }
 0x757   : > { %3073 = vmatpush2.bf16.msra.mxu0 %v4770_v53  ;;  %3114 = vmatpush2.bf16.msra.mxu1 %v4772_v54  ;;  %v5278_v53 = vld [vmem:[%s6194_s26 + $0x144] ss:$8 sps:$4 sm:$0xff]   ;;  %v5273_v54 = vld [vmem:[%s6194_s26 + $0x40] ss:$8 sps:$4 sm:$0xff]  }
 0x758   : > { %3074 = vmatprep.subr.bf16.mxu0 %v4763_v55  ;;  %3115 = vmatprep.subr.bf16.mxu1 %v4765_v56  ;;  %v5276_v55 = vld [vmem:[%s6194_s26 + $0x140] ss:$8 sps:$4 sm:$0xff]   ;;  %v5281_v56 = vld [vmem:[%s6194_s26 + $0x34] ss:$8 sps:$4 sm:$0xff]  }
 0x75b   : > { %3075 = vmatpush2.bf16.msra.mxu0 %v4762_v62  ;;  %3116 = vmatpush2.bf16.msra.mxu1 %v4764_v61  ;;  %v5290_v62 = vld [vmem:[%s6194_s26 + $0x124] ss:$8 sps:$4 sm:$0xff]   ;;  %v5285_v61 = vld [vmem:[%s6194_s26 + $0x20] ss:$8 sps:$4 sm:$0xff]  }
 0x75c   : > { %3076 = vmatprep.subr.bf16.mxu0 %v4755_v63  ;;  %3117 = vmatprep.subr.bf16.mxu1 %v4757_v0  ;;  %v5288_v63 = vld [vmem:[%s6194_s26 + $0x120] ss:$8 sps:$4 sm:$0xff]   ;;  %v5293_v0 = vld [vmem:[%s6194_s26 + $0x14] ss:$8 sps:$4 sm:$0xff]  }
 0x75f   : > { %3077 = vmatpush2.bf16.msra.mxu0 %v4754_v9  ;;  %3118 = vmatpush2.bf16.msra.mxu1 %v4756_v10  ;;  %v5302_v9 = vld [vmem:[%s6194_s26 + $0x104] ss:$8 sps:$4 sm:$0xff]   ;;  %v5297_v10 = vld [vmem:[%s6194_s26] ss:$8 sps:$4 sm:$0xff]  }
 0x760   : > { %3078 = vmatprep.subr.bf16.mxu0 %v4747_v13  ;;  %3119 = vmatprep.subr.bf16.mxu1 %v4749_v14  ;;  %v5300_v13 = vld [vmem:[%s6194_s26 + $0x100] ss:$8 sps:$4 sm:$0xff]   ;;  %v5305_v14 = vld [vmem:[%s6194_s26 + $0xf4] ss:$8 sps:$4 sm:$0xff]  }
 0x763   : > { %3079 = vmatpush2.bf16.msra.mxu0 %v4746_v19  ;;  %3120 = vmatpush2.bf16.msra.mxu1 %v4748_v20  ;;  %v5314_v19 = vld [vmem:[%s6194_s26 + $0x1e4] ss:$8 sps:$4 sm:$0xff]   ;;  %v5309_v20 = vld [vmem:[%s6194_s26 + $0xe0] ss:$8 sps:$4 sm:$0xff]  }
 0x764   : > { %3080 = vmatprep.subr.bf16.mxu0 %v4739_v21  ;;  %3121 = vmatprep.subr.bf16.mxu1 %v4741_v22  ;;  %v5312_v21 = vld [vmem:[%s6194_s26 + $0x1e0] ss:$8 sps:$4 sm:$0xff]   ;;  %v5317_v22 = vld [vmem:[%s6194_s26 + $0xd4] ss:$8 sps:$4 sm:$0xff]  }
 0x767   : > { %3081 = vmatpush2.bf16.msra.mxu0 %v4738_v27  ;;  %3122 = vmatpush2.bf16.msra.mxu1 %v4740_v28  ;;  %v5326_v27 = vld [vmem:[%s6194_s26 + $0x1c4] ss:$8 sps:$4 sm:$0xff]   ;;  %v5321_v28 = vld [vmem:[%s6194_s26 + $0xc0] ss:$8 sps:$4 sm:$0xff]  }
 0x768   : > { %3082 = vmatprep.subr.bf16.mxu0 %v4731_v29  ;;  %3123 = vmatprep.subr.bf16.mxu1 %v4733_v30  ;;  %v5324_v29 = vld [vmem:[%s6194_s26 + $0x1c0] ss:$8 sps:$4 sm:$0xff]   ;;  %v5329_v30 = vld [vmem:[%s6194_s26 + $0xb4] ss:$8 sps:$4 sm:$0xff]  }
 0x76b   : > { %3083 = vmatpush2.bf16.msra.mxu0 %v4730_v34  ;;  %3124 = vmatpush2.bf16.msra.mxu1 %v4732_v35  ;;  %v5338_v34 = vld [vmem:[%s6194_s26 + $0x1a4] ss:$8 sps:$4 sm:$0xff]   ;;  %v5333_v35 = vld [vmem:[%s6194_s26 + $0xa0] ss:$8 sps:$4 sm:$0xff]  }
 0x76c   : > { %3084 = vmatprep.subr.bf16.mxu0 %v4723_v36  ;;  %3125 = vmatprep.subr.bf16.mxu1 %v4725_v37  ;;  %v5336_v36 = vld [vmem:[%s6194_s26 + $0x1a0] ss:$8 sps:$4 sm:$0xff]   ;;  %v5341_v37 = vld [vmem:[%s6194_s26 + $0x94] ss:$8 sps:$4 sm:$0xff]  }
 0x76f   : > { %3085 = vmatpush2.bf16.msra.mxu0 %v4722_v38  ;;  %3126 = vmatpush2.bf16.msra.mxu1 %v4724_v39  ;;  %v5344_v38 = vld [vmem:[%s6194_s26 + $0x194] ss:$8 sps:$4 sm:$0xff]   ;;  %v5339_v39 = vld [vmem:[%s6194_s26 + $0x90] ss:$8 sps:$4 sm:$0xff]  }
 0x770   : > { %3556 = vmatprep.subr.bf16.mxu0 %v5257_v41  ;;  %3597 = vmatprep.subr.bf16.mxu1 %v5260_v42  ;;  %v5342_v41 = vld [vmem:[%s6194_s26 + $0x190] ss:$8 sps:$4 sm:$0xff]   ;;  %v5347_v42 = vld [vmem:[%s6194_s26 + $0x84] ss:$8 sps:$4 sm:$0xff]  }
 0x772   : > { %3087 = vmatmul.mubr.bf16.vlgmr.msra.gmra.mxu0 %v6522_v40  ;;  %3128 = vmatmul.mubr.bf16.vlgmr.msra.gmra.mxu1 %v6522_v40  ;;  %v5269_v40 = vld [vmem:[%s6194_s26 + $0x54] ss:$8 sps:$4 sm:$0xff]  }
 0x773   : > { %3557 = vmatpush1.bf16.msra.mxu0 %v5255_v43  ;;  %3598 = vmatpush1.bf16.msra.mxu1 %v5258_v44  ;;  %v5350_v43 = vld [vmem:[%s6194_s26 + $0x184] ss:$8 sps:$4 sm:$0xff]   ;;  %v5345_v44 = vld [vmem:[%s6194_s26 + $0x80] ss:$8 sps:$4 sm:$0xff]  }
 0x774   : > { %3558 = vmatprep.subr.bf16.mxu0 %v5263_v45  ;;  %3599 = vmatprep.subr.bf16.mxu1 %v5266_v46  ;;  %v5348_v45 = vld [vmem:[%s6194_s26 + $0x180] ss:$8 sps:$4 sm:$0xff]  }
 0x777   : > { %3559 = vmatpush1.bf16.msra.mxu0 %v5261_v47  ;;  %3600 = vmatpush1.bf16.msra.mxu1 %v5264_v48 }
 0x778   : > { %3560 = vmatprep.subr.bf16.mxu0 %v5269_v40  ;;  %3601 = vmatprep.subr.bf16.mxu1 %v5272_v49 }
 0x77b   : > { %3561 = vmatpush1.bf16.msra.mxu0 %v5267_v50  ;;  %3602 = vmatpush1.bf16.msra.mxu1 %v5270_v51 }
 0x77c   : > { %3562 = vmatprep.subr.bf16.mxu0 %v5275_v52  ;;  %3603 = vmatprep.subr.bf16.mxu1 %v5278_v53 }
 0x77f   : > { %3563 = vmatpush1.bf16.msra.mxu0 %v5273_v54  ;;  %3604 = vmatpush1.bf16.msra.mxu1 %v5276_v55 }
 0x780   : > { %3564 = vmatprep.subr.bf16.mxu0 %v5281_v56  ;;  %3605 = vmatprep.subr.bf16.mxu1 %v5284_v57 }
 0x783   : > { %3565 = vmatpush1.bf16.msra.mxu0 %v5279_v58  ;;  %3606 = vmatpush1.bf16.msra.mxu1 %v5282_v59 }
 0x784   : > { %3566 = vmatprep.subr.bf16.mxu0 %v5287_v60  ;;  %3607 = vmatprep.subr.bf16.mxu1 %v5290_v62 }
 0x787   : > { %3567 = vmatpush1.bf16.msra.mxu0 %v5285_v61  ;;  %3608 = vmatpush1.bf16.msra.mxu1 %v5288_v63 }
 0x788   : > { %3568 = vmatprep.subr.bf16.mxu0 %v5293_v0  ;;  %3609 = vmatprep.subr.bf16.mxu1 %v5296_v1 }
 0x78b   : > { %3569 = vmatpush1.bf16.msra.mxu0 %v5291_v5  ;;  %3610 = vmatpush1.bf16.msra.mxu1 %v5294_v6 }
 0x78c   : > { %3570 = vmatprep.subr.bf16.mxu0 %v5299_v8  ;;  %3611 = vmatprep.subr.bf16.mxu1 %v5302_v9 }
 0x78f   : > { %3571 = vmatpush1.bf16.msra.mxu0 %v5297_v10  ;;  %3612 = vmatpush1.bf16.msra.mxu1 %v5300_v13 }
 0x790   : > { %3572 = vmatprep.subr.bf16.mxu0 %v5305_v14  ;;  %3613 = vmatprep.subr.bf16.mxu1 %v5308_v17 }
 0x793   : > { %3573 = vmatpush2.bf16.msra.mxu0 %v5303_v16  ;;  %3614 = vmatpush2.bf16.msra.mxu1 %v5306_v7 }
 0x794   : > { %3574 = vmatprep.subr.bf16.mxu0 %v5311_v18  ;;  %3615 = vmatprep.subr.bf16.mxu1 %v5314_v19 }
 0x797   : > { %3575 = vmatpush2.bf16.msra.mxu0 %v5309_v20  ;;  %3616 = vmatpush2.bf16.msra.mxu1 %v5312_v21 }
 0x798   : > { %3576 = vmatprep.subr.bf16.mxu0 %v5317_v22  ;;  %3617 = vmatprep.subr.bf16.mxu1 %v5320_v23 }
 0x79b   : > { %3577 = vmatpush2.bf16.msra.mxu0 %v5315_v24  ;;  %3618 = vmatpush2.bf16.msra.mxu1 %v5318_v25 }
 0x79c   : > { %3578 = vmatprep.subr.bf16.mxu0 %v5323_v26  ;;  %3619 = vmatprep.subr.bf16.mxu1 %v5326_v27 }
 0x79f   : > { %3579 = vmatpush2.bf16.msra.mxu0 %v5321_v28  ;;  %3620 = vmatpush2.bf16.msra.mxu1 %v5324_v29 }
 0x7a0   : > { %3580 = vmatprep.subr.bf16.mxu0 %v5329_v30  ;;  %3621 = vmatprep.subr.bf16.mxu1 %v5332_v31 }
 0x7a3   : > { %3581 = vmatpush2.bf16.msra.mxu0 %v5327_v32  ;;  %3622 = vmatpush2.bf16.msra.mxu1 %v5330_v2 }
 0x7a4   : > { %3582 = vmatprep.subr.bf16.mxu0 %v5335_v33  ;;  %3623 = vmatprep.subr.bf16.mxu1 %v5338_v34 }
 0x7a7   : > { %3583 = vmatpush2.bf16.msra.mxu0 %v5333_v35  ;;  %3624 = vmatpush2.bf16.msra.mxu1 %v5336_v36 }
 0x7a8   : > { %3584 = vmatprep.subr.bf16.mxu0 %v5341_v37  ;;  %3625 = vmatprep.subr.bf16.mxu1 %v5344_v38 }
 0x7ab   : > { %3585 = vmatpush2.bf16.msra.mxu0 %v5339_v39  ;;  %3626 = vmatpush2.bf16.msra.mxu1 %v5342_v41 }
 0x7ac   : > { %3586 = vmatprep.subr.bf16.mxu0 %v5347_v42  ;;  %3627 = vmatprep.subr.bf16.mxu1 %v5350_v43 }
 0x7af   : > { %3587 = vmatpush2.bf16.msra.mxu0 %v5345_v44  ;;  %3628 = vmatpush2.bf16.msra.mxu1 %v5348_v45 }
 0x7f2   : > { %v3006_v46 = vpop.f32.mrf.mxu0  ;;  %v3047_v47 = vpop.f32.mrf.mxu1 }
 0x7f3   : > { %v4782_v53 = vmul.f32 -1.442695, %v3006_v46  ;;  %v4784_v54 = vmul.f32 -1.442695, %v3047_v47 }
 0x7f4   : > { %v3008_v48 = vpop.f32.mrf.mxu0  ;;  %v3049_v40 = vpop.f32.mrf.mxu1 }
 0x7f5   : > { %v4783_v55 = vmul.f32 -1.442695, %v3008_v48  ;;  %v4785_v56 = vmul.f32 -1.442695, %v3049_v40  ;;  %5363 = vpow2.f32 %v4782_v53 }
 0x7f6   : > { %v3010_v49 = vpop.f32.mrf.mxu0  ;;  %v3051_v50 = vpop.f32.mrf.mxu1  ;;  %5365 = vpow2.f32 %v4784_v54 }
 0x7f7   : > { %5367 = vpow2.f32 %v4783_v55 }
 0x7f8   : > { %v3011_v51 = vpop.f32.mrf.mxu0  ;;  %v3052_v52 = vpop.f32.mrf.mxu1  ;;  %5369 = vpow2.f32 %v4785_v56 }
 0x802   : > { %v5364_v57 = vpop.eup %5363 }
 0x803   : > { %v5366_v58 = vpop.eup %5365  ;;  %v3148_v62 = vadd.f32 1.0, %v5364_v57 }
 0x804   : > { %v5368_v59 = vpop.eup %5367  ;;  %v3150_v61 = vadd.f32 1.0, %v5366_v58 }
 0x805   : > { %v5370_v60 = vpop.eup %5369  ;;  %v3149_v63 = vadd.f32 1.0, %v5368_v59  ;;  %5371 = vrcp.f32 %v3148_v62 }
 0x806   : > { %v3151_v0 = vadd.f32 1.0, %v5370_v60  ;;  %5373 = vrcp.f32 %v3150_v61 }
 0x807   : > { %5375 = vrcp.f32 %v3149_v63 }
 0x808   : > { %5377 = vrcp.f32 %v3151_v0 }
 0x812   : > { %v5372_v1 = vpop.eup %5371 }
 0x813   : > { %v5374_v5 = vpop.eup %5373  ;;  %v3160_v9 = vmul.f32 %v5372_v1, %v3006_v46 }
 0x814   : > { %v5376_v6 = vpop.eup %5375  ;;  %v3162_v10 = vmul.f32 %v5374_v5, %v3047_v47 }
 0x815   : > { %v5378_v8 = vpop.eup %5377  ;;  %v3161_v16 = vmul.f32 %v5376_v6, %v3008_v48 }
 0x816   : > { %v3163_v7 = vmul.f32 %v5378_v8, %v3049_v40 }
 0x832   : > { %v3088_v13 = vpop.f32.mrf.mxu0  ;;  %v3129_v14 = vpop.f32.mrf.mxu1 }
 0x833   : > { %v3164_v17 = vmul.f32 %v3160_v9, %v3088_v13  ;;  %v3166_v18 = vmul.f32 %v3162_v10, %v3129_v14 }
 0x834   : > { %v3090_v19 = vpop.f32.mrf.mxu0  ;;  %v3131_v20 = vpop.f32.mrf.mxu1 }
 0x835   : > { %v3165_v21 = vmul.f32 %v3161_v16, %v3090_v19  ;;  %v3167_v22 = vmul.f32 %v3163_v7, %v3131_v20  ;;  %v3168_v27 = vpack.c.bf16 %v3164_v17, %v3164_v17  ;;  %v3170_v28 = vpack.c.bf16 %v3166_v18, %v3166_v18 }
 0x836   : > { %v3092_v23 = vpop.f32.mrf.mxu0  ;;  %v3133_v24 = vpop.f32.mrf.mxu1 }
 0x837   : > { %v3169_v25 = vpack.c.bf16 %v3165_v21, %v3165_v21  ;;  %v3171_v26 = vpack.c.bf16 %v3167_v22, %v3167_v22 }
 0x838   : > { %v3093_v29 = vpop.f32.mrf.mxu0  ;;  %v3134_v30 = vpop.f32.mrf.mxu1 }
 0x839   : > { %3588 = vmatprep.mubr.bf16.mxu0 %v3169_v25  ;;  %3629 = vmatprep.mubr.bf16.mxu1 %v3171_v26 }
 0x83a   : > { %3589 = vmatmul.mubr.bf16.vlgmr.msra.gmra.mxu0 %v3168_v27  ;;  %3630 = vmatmul.mubr.bf16.vlgmr.msra.gmra.mxu1 %v3170_v28 }
 0x8fa   : > { %v3590_v31 = vpop.f32.mrf.mxu0  ;;  %v3631_v32 = vpop.f32.mrf.mxu1 }
 0x8fb   : > { %v3632_v34 = vadd.f32 %v3631_v32, %v3590_v31 }
 0x8fc   : > { %v3592_v2 = vpop.f32.mrf.mxu0  ;;  %v3633_v33 = vpop.f32.mrf.mxu1 }
 0x8fd   : > { %v3634_v35 = vadd.f32 %v3633_v33, %v3592_v2 }
 0x8fe   : > { %v3594_v36 = vpop.f32.mrf.mxu0  ;;  %v3635_v37 = vpop.f32.mrf.mxu1 }
 0x8ff   : > { %v3640_v38 = vcombine.low %v3632_v34, %v3634_v35 }
 0x900   : > { %v3595_v39 = vpop.f32.mrf.mxu0  ;;  %v3636_v41 = vpop.f32.mrf.mxu1 }
 0x901   : > { %v3647_v42 = vrot.slane %v3640_v38, %v6469_v4 }
 0x903   : > { %v3654_v43 = vrot.slane %v3647_v42, %v6469_v4  ;;  %3665 = sbr.rel (%p4850_p10) target bundleno = 2690 (0xa82), region = 112 }
 0x905   : > { %v6652_v44 = vadd.f32 %v3654_v43, %v6473_v15 }
 0x907   : > { %3661 = vst.msk [vmem:[#allocation2] sm:$0x3] %vm3659_vm6, %v6652_v44 }
 0x908   : > { %v3667_v45 = vmul.f32 %v6652_v44, %v6652_v44  ;;  %v5380_v46 = vld [vmem:[#allocation15 + $0xe4] ss:$16 sps:$4 sm:$0xff]   ;;  %v5382_v47 = vld [vmem:[#allocation15 + $0xec] ss:$16 sps:$4 sm:$0xff]   ;;  %v5384_v49 = vld [vmem:[#allocation15 + $0xe0] ss:$16 sps:$4 sm:$0xff]  }
 0x909   : > { %4092 = vmatprep.subr.bf16.mxu0 %v5380_v46  ;;  %v5385_v50 = vld [vmem:[#allocation15 + $0xe8] ss:$16 sps:$4 sm:$0xff]   ;;  %4133 = vmatprep.subr.bf16.mxu1 %v5382_v47  ;;  %v5386_v15 = vld [vmem:[#allocation15 + $0xc4] ss:$16 sps:$4 sm:$0xff]   ;;  %v5388_v53 = vld [vmem:[#allocation15 + $0xcc] ss:$16 sps:$4 sm:$0xff]  }
 0x90a   : > { %v3672_v48 = vrot.slane %v3667_v45, %v6248_v11  ;;  %v3676_v40 = vrot.slane %v3667_v45, %v6251_v12  ;;  %4093 = vmatpush1.bf16.msra.mxu0 %v5384_v49  ;;  %4134 = vmatpush1.bf16.msra.mxu1 %v5385_v50  ;;  %v5390_v55 = vld [vmem:[#allocation15 + $0xc0] ss:$16 sps:$4 sm:$0xff]   ;;  %v5391_v56 = vld [vmem:[#allocation15 + $0xc8] ss:$16 sps:$4 sm:$0xff]   ;;  %v5392_v57 = vld [vmem:[#allocation15 + $0xa4] ss:$16 sps:$4 sm:$0xff]  }
 0x90b   : > { %4094 = vmatprep.subr.bf16.mxu0 %v5386_v15  ;;  %4135 = vmatprep.subr.bf16.mxu1 %v5388_v53  ;;  %v5394_v58 = vld [vmem:[#allocation15 + $0xac] ss:$16 sps:$4 sm:$0xff]   ;;  %v5396_v59 = vld [vmem:[#allocation15 + $0xa0] ss:$16 sps:$4 sm:$0xff]   ;;  %v5397_v60 = vld [vmem:[#allocation15 + $0xa8] ss:$16 sps:$4 sm:$0xff]  }
 0x90c   : > { %v3679_v51 = vsel %vm807_vm1, %v3672_v48, 0.0  ;;  %v3680_v52 = vsel %vm807_vm1, %v3676_v40, 0.0  ;;  %v5398_v62 = vld [vmem:[#allocation15 + $0x84] ss:$16 sps:$4 sm:$0xff]   ;;  %v5400_v61 = vld [vmem:[#allocation15 + $0x8c] ss:$16 sps:$4 sm:$0xff]  }
 0x90d   : > { %v3681_v54 = vadd.f32 %v3680_v52, %v3679_v51  ;;  %v5402_v63 = vld [vmem:[#allocation15 + $0x80] ss:$16 sps:$4 sm:$0xff]   ;;  %v5403_v0 = vld [vmem:[#allocation15 + $0x88] ss:$16 sps:$4 sm:$0xff]   ;;  %v5404_v1 = vld [vmem:[#allocation15 + $0x64] ss:$16 sps:$4 sm:$0xff]  }
 0x90e   : > { %4095 = vmatpush1.bf16.msra.mxu0 %v5390_v55  ;;  %4136 = vmatpush1.bf16.msra.mxu1 %v5391_v56  ;;  %v5406_v5 = vld [vmem:[#allocation15 + $0x6c] ss:$16 sps:$4 sm:$0xff]   ;;  %v5408_v6 = vld [vmem:[#allocation15 + $0x60] ss:$16 sps:$4 sm:$0xff]   ;;  %v5409_v8 = vld [vmem:[#allocation15 + $0x68] ss:$16 sps:$4 sm:$0xff]  }
 0x90f   : > { %3682 = vadd.xlane.f32.xlu0 %v3681_v54  ;;  %4096 = vmatprep.subr.bf16.mxu0 %v5392_v57  ;;  %v5410_v9 = vld [vmem:[#allocation15 + $0x44] ss:$16 sps:$4 sm:$0xff]   ;;  %v5412_v10 = vld [vmem:[#allocation15 + $0x4c] ss:$16 sps:$4 sm:$0xff]   ;;  %v5414_v13 = vld [vmem:[#allocation15 + $0x40] ss:$16 sps:$4 sm:$0xff]  }
 0x910   : > { %4137 = vmatprep.subr.bf16.mxu1 %v5394_v58  ;;  %v5415_v14 = vld [vmem:[#allocation15 + $0x48] ss:$16 sps:$4 sm:$0xff]   ;;  %v5416_v16 = vld [vmem:[#allocation15 + $0x24] ss:$16 sps:$4 sm:$0xff]   ;;  %v5418_v7 = vld [vmem:[#allocation15 + $0x2c] ss:$16 sps:$4 sm:$0xff]  }
 0x911   : > { %v5420_v17 = vld [vmem:[#allocation15 + $0x20] ss:$16 sps:$4 sm:$0xff]   ;;  %v5421_v18 = vld [vmem:[#allocation15 + $0x28] ss:$16 sps:$4 sm:$0xff]   ;;  %v5422_v19 = vld [vmem:[#allocation15 + $0x4] ss:$16 sps:$4 sm:$0xff]  }
 0x912   : > { %4097 = vmatpush1.bf16.msra.mxu0 %v5396_v59  ;;  %4138 = vmatpush1.bf16.msra.mxu1 %v5397_v60  ;;  %v5424_v20 = vld [vmem:[#allocation15 + $0xc] ss:$16 sps:$4 sm:$0xff]   ;;  %v5426_v21 = vld [vmem:[#allocation15] ss:$16 sps:$4 sm:$0xff]   ;;  %v5427_v22 = vld [vmem:[#allocation15 + $0x8] ss:$16 sps:$4 sm:$0xff]  }
 0x913   : > { %4098 = vmatprep.subr.bf16.mxu0 %v5398_v62  ;;  %4139 = vmatprep.subr.bf16.mxu1 %v5400_v61  ;;  %v5428_v23 = vld [vmem:[#allocation15 + $0x1e4] ss:$16 sps:$4 sm:$0xff]   ;;  %v5430_v24 = vld [vmem:[#allocation15 + $0x1ec] ss:$16 sps:$4 sm:$0xff]   ;;  %v5432_v25 = vld [vmem:[#allocation15 + $0x1e0] ss:$16 sps:$4 sm:$0xff]  }
 0x914   : > { %v5433_v26 = vld [vmem:[#allocation15 + $0x1e8] ss:$16 sps:$4 sm:$0xff]   ;;  %v5434_v27 = vld [vmem:[#allocation15 + $0x1c4] ss:$16 sps:$4 sm:$0xff]   ;;  %v5436_v28 = vld [vmem:[#allocation15 + $0x1cc] ss:$16 sps:$4 sm:$0xff]  }
 0x915   : > { %v5438_v29 = vld [vmem:[#allocation15 + $0x1c0] ss:$16 sps:$4 sm:$0xff]   ;;  %v5439_v30 = vld [vmem:[#allocation15 + $0x1c8] ss:$16 sps:$4 sm:$0xff]   ;;  %v5440_v31 = vld [vmem:[#allocation15 + $0x1a4] ss:$16 sps:$4 sm:$0xff]  }
 0x916   : > { %4099 = vmatpush1.bf16.msra.mxu0 %v5402_v63  ;;  %4140 = vmatpush1.bf16.msra.mxu1 %v5403_v0  ;;  %v5442_v32 = vld [vmem:[#allocation15 + $0x1ac] ss:$16 sps:$4 sm:$0xff]   ;;  %v5444_v2 = vld [vmem:[#allocation15 + $0x1a0] ss:$16 sps:$4 sm:$0xff]   ;;  %v5445_v33 = vld [vmem:[#allocation15 + $0x1a8] ss:$16 sps:$4 sm:$0xff]  }
 0x917   : > { %4100 = vmatprep.subr.bf16.mxu0 %v5404_v1  ;;  %4141 = vmatprep.subr.bf16.mxu1 %v5406_v5  ;;  %v5446_v34 = vld [vmem:[#allocation15 + $0x184] ss:$16 sps:$4 sm:$0xff]   ;;  %v5448_v35 = vld [vmem:[#allocation15 + $0x18c] ss:$16 sps:$4 sm:$0xff]   ;;  %v5450_v36 = vld [vmem:[#allocation15 + $0x180] ss:$16 sps:$4 sm:$0xff]  }
 0x918   : > { %v5451_v37 = vld [vmem:[#allocation15 + $0x188] ss:$16 sps:$4 sm:$0xff]   ;;  %v5452_v38 = vld [vmem:[#allocation15 + $0x164] ss:$16 sps:$4 sm:$0xff]   ;;  %v5454_v39 = vld [vmem:[#allocation15 + $0x16c] ss:$16 sps:$4 sm:$0xff]  }
 0x919   : > { %v5456_v41 = vld [vmem:[#allocation15 + $0x160] ss:$16 sps:$4 sm:$0xff]   ;;  %v5457_v42 = vld [vmem:[#allocation15 + $0x168] ss:$16 sps:$4 sm:$0xff]   ;;  %v5458_v43 = vld [vmem:[#allocation15 + $0x144] ss:$16 sps:$4 sm:$0xff]  }
 0x91a   : > { %4101 = vmatpush1.bf16.msra.mxu0 %v5408_v6  ;;  %4142 = vmatpush1.bf16.msra.mxu1 %v5409_v8  ;;  %v5460_v45 = vld [vmem:[#allocation15 + $0x14c] ss:$16 sps:$4 sm:$0xff]   ;;  %v5462_v46 = vld [vmem:[#allocation15 + $0x140] ss:$16 sps:$4 sm:$0xff]   ;;  %v5463_v47 = vld [vmem:[#allocation15 + $0x148] ss:$16 sps:$4 sm:$0xff]  }
 0x91b   : > { %4102 = vmatprep.subr.bf16.mxu0 %v5410_v9  ;;  %4143 = vmatprep.subr.bf16.mxu1 %v5412_v10  ;;  %v5464_v48 = vld [vmem:[#allocation15 + $0x124] ss:$16 sps:$4 sm:$0xff]   ;;  %v5466_v40 = vld [vmem:[#allocation15 + $0x12c] ss:$16 sps:$4 sm:$0xff]   ;;  %v5468_v49 = vld [vmem:[#allocation15 + $0x120] ss:$16 sps:$4 sm:$0xff]  }
 0x91c   : > { %v5469_v50 = vld [vmem:[#allocation15 + $0x128] ss:$16 sps:$4 sm:$0xff]   ;;  %v5470_v15 = vld [vmem:[#allocation15 + $0x104] ss:$16 sps:$4 sm:$0xff]   ;;  %v5472_v51 = vld [vmem:[#allocation15 + $0x10c] ss:$16 sps:$4 sm:$0xff]  }
 0x91d   : > { %v5474_v52 = vld [vmem:[#allocation15 + $0x100] ss:$16 sps:$4 sm:$0xff]   ;;  %v5475_v53 = vld [vmem:[#allocation15 + $0x108] ss:$16 sps:$4 sm:$0xff]   ;;  %v3666_v59 = vld [vmem:[#allocation14] sm:$0x3] }
 0x91e   : > { %4103 = vmatpush1.bf16.msra.mxu0 %v5414_v13  ;;  %4144 = vmatpush1.bf16.msra.mxu1 %v5415_v14  ;;  %vm4203_vm7 = vcmp.lt.s32.totalorder %v797_v3, 512 }
 0x91f   : > { %4104 = vmatprep.subr.bf16.mxu0 %v5416_v16  ;;  %4145 = vmatprep.subr.bf16.mxu1 %v5418_v7 }
 0x922   : > { %4105 = vmatpush1.bf16.msra.mxu0 %v5420_v17  ;;  %4146 = vmatpush1.bf16.msra.mxu1 %v5421_v18 }
 0x923   : > { %4106 = vmatprep.subr.bf16.mxu0 %v5422_v19  ;;  %4147 = vmatprep.subr.bf16.mxu1 %v5424_v20 }
 0x926   : > { %4107 = vmatpush1.bf16.msra.mxu0 %v5426_v21  ;;  %4148 = vmatpush1.bf16.msra.mxu1 %v5427_v22 }
 0x927   : > { %4108 = vmatprep.subr.bf16.mxu0 %v5428_v23  ;;  %4149 = vmatprep.subr.bf16.mxu1 %v5430_v24 }
 0x92a   : > { %4109 = vmatpush2.bf16.msra.mxu0 %v5432_v25  ;;  %4150 = vmatpush2.bf16.msra.mxu1 %v5433_v26 }
 0x92b   : > { %4110 = vmatprep.subr.bf16.mxu0 %v5434_v27  ;;  %4151 = vmatprep.subr.bf16.mxu1 %v5436_v28 }
 0x92e   : > { %4111 = vmatpush2.bf16.msra.mxu0 %v5438_v29  ;;  %4152 = vmatpush2.bf16.msra.mxu1 %v5439_v30 }
 0x92f   : > { %4112 = vmatprep.subr.bf16.mxu0 %v5440_v31  ;;  %4153 = vmatprep.subr.bf16.mxu1 %v5442_v32 }
 0x932   : > { %4113 = vmatpush2.bf16.msra.mxu0 %v5444_v2  ;;  %4154 = vmatpush2.bf16.msra.mxu1 %v5445_v33 }
 0x933   : > { %4114 = vmatprep.subr.bf16.mxu0 %v5446_v34  ;;  %4155 = vmatprep.subr.bf16.mxu1 %v5448_v35 }
 0x936   : > { %4115 = vmatpush2.bf16.msra.mxu0 %v5450_v36  ;;  %4156 = vmatpush2.bf16.msra.mxu1 %v5451_v37 }
 0x937   : > { %4116 = vmatprep.subr.bf16.mxu0 %v5452_v38  ;;  %4157 = vmatprep.subr.bf16.mxu1 %v5454_v39 }
 0x93a   : > { %4117 = vmatpush2.bf16.msra.mxu0 %v5456_v41  ;;  %4158 = vmatpush2.bf16.msra.mxu1 %v5457_v42 }
 0x93b   : > { %4118 = vmatprep.subr.bf16.mxu0 %v5458_v43  ;;  %4159 = vmatprep.subr.bf16.mxu1 %v5460_v45 }
 0x93e   : > { %4119 = vmatpush2.bf16.msra.mxu0 %v5462_v46  ;;  %4160 = vmatpush2.bf16.msra.mxu1 %v5463_v47 }
 0x93f   : > { %4120 = vmatprep.subr.bf16.mxu0 %v5464_v48  ;;  %4161 = vmatprep.subr.bf16.mxu1 %v5466_v40 }
 0x942   : > { %4121 = vmatpush2.bf16.msra.mxu0 %v5468_v49  ;;  %4162 = vmatpush2.bf16.msra.mxu1 %v5469_v50 }
 0x943   : > { %4122 = vmatprep.subr.bf16.mxu0 %v5470_v15  ;;  %4163 = vmatprep.subr.bf16.mxu1 %v5472_v51 }
 0x946   : > { %4123 = vmatpush2.bf16.msra.mxu0 %v5474_v52  ;;  %4164 = vmatpush2.bf16.msra.mxu1 %v5475_v53 }
 0x998   : > { %v3683_v54 = vpop.xlane.xlu0 %3682 }
 0x999   : > { %v3684_v55 = vmul.f32 0.00390625, %v3683_v54 }
 0x99b   : > { %v3685_v56 = vadd.f32 1e-06, %v3684_v55 }
 0x99d   : > { %5476 = vrsqrt.f32 %v3685_v56 }
 0x9aa   : > { %v5477_v57 = vpop.eup %5476 }
 0x9ab   : > { %v3691_v58 = vrot.slane %v5477_v57, %v6248_v11 }
 0x9ad   : > { %v3693_v60 = vmul.f32 %v3691_v58, %v6652_v44 }
 0x9af   : > { %v3694_v62 = vmul.f32 %v3693_v60, %v3666_v59 }
 0x9b1   : > { %v3703_v61 = vrot.slane %v3694_v62, %v6251_v12  ;;  %v3699_v63 = vrot.slane %v3694_v62, %v6248_v11 }
 0x9b3   : > { %v3707_v0 = vpack.c.bf16 %v3703_v61, %v3703_v61  ;;  %v3706_v1 = vpack.c.bf16 %v3699_v63, %v3699_v63 }
 0x9b5   : > { %4124 = vmatprep.mubr.bf16.mxu0 %v3707_v0  ;;  %4165 = vmatprep.mubr.bf16.mxu1 %v3707_v0 }
 0x9b6   : > { %4125 = vmatmul.mubr.bf16.vlgmr.msra.gmra.mxu0 %v3706_v1  ;;  %4166 = vmatmul.mubr.bf16.vlgmr.msra.gmra.mxu1 %v3706_v1 }
 0xa76   : > { %v4126_v5 = vpop.f32.mrf.mxu0  ;;  %v4167_v6 = vpop.f32.mrf.mxu1 }
 0xa78   : > { %v4128_v8 = vpop.f32.mrf.mxu0  ;;  %v4169_v9 = vpop.f32.mrf.mxu1 }
 0xa79   : > { %v4178_v10 = vcombine.low %v4126_v5, %v4128_v8  ;;  %v4179_v13 = vcombine.low %v4167_v6, %v4169_v9 }
 0xa7a   : > { %v4130_v14 = vpop.f32.mrf.mxu0  ;;  %v4171_v16 = vpop.f32.mrf.mxu1 }
 0xa7b   : > { %v4186_v44 = vrot.slane %v4178_v10, %v6469_v4  ;;  %v4193_v12 = vrot.slane %v4179_v13, %v6469_v4 }
 0xa7c   : > { %v4131_v7 = vpop.f32.mrf.mxu0  ;;  %v4172_v11 = vpop.f32.mrf.mxu1 }
 0xa7d   : > { %v4194_v17 = vcombine.low %v4186_v44, %v4193_v12 }
 0xa7f   : > { %v4201_v18 = vrot.slane %v4194_v17, %v6469_v4 }
 0xa81   : > { %4205 = vst.msk [vmem:[#allocation17] sm:$0xf] %vm4203_vm7, %v4201_v18 }
 0xa82 PF: > { %p5014_p13 = scmp.eq.s32.totalorder %s5902_s22, 31  ;;  %s5802_s1 = smov [#allocation17]  }
 0xa83   : > { %s4223_s17 = sshll.u32 %s5802_s1, 4  ;;  %s4224_s17 = int_to_ptr.vmem [resolvable:$true] %s4223_s17 }
 0xa84   : > { %s5698_s6 = scalar_lea.vmem %s4224_s17, 64  ;;  %p5705_p3 = scmp.lt.s32.totalorder %s4224_s17, %s4224_s17 }
 0xa85   : > { %p5699_p1 = scmp.ne.s32.totalorder %s4224_s17, %s5698_s6  ;;  %p5706_p5 = scmp.lt.s32.totalorder %s5698_s6, %s5698_s6 }
 0xa87   : > { %p5700_p12 = pnand %p5699_p1, %p5014_p13  ;;  %p5707_p6 = por %p5706_p5, %p5705_p3 }
 0xa89   : > { %p5701_p2 = pneg %p5700_p12 }
 0xa8b   : > { %p5708_p0 = pnand %p5707_p6, %p5701_p2 }
 0xa8d   : > { %5711 = shalt.err (!%p5708_p0)
}
 0xa8e   : > { %s6769_s15 = sld [smem:[#allocation35_spill]] }
 0xa94   : > { %4980 = dma.vmem_to_hbm [thread:$0]  (%p5014_p13), %s4224_s17, 64, %s6769_s15, [#allocation5]  }
 0xa95   : > { %5763 = dma.done.wait (%p5014_p13), [#allocation5], 64  }
 0xa96   : > { %5765 = vsyncadd (%p5014_p13), [#allocation5], 4294967232 }
 0xa97 PF: > { %s6770_s21 = sld [smem:[#allocation26_spill]]  ;;  %s6773_s18 = smov %s5772_s19 }
 0xa98   : > { %s6771_s2 = sld [smem:[#allocation25_spill]] }
 0xa99   : > { %s6772_s20 = sld [smem:[#allocation27_spill]] }
 0xa9d   : > { %p37_p7 = scmp.ge.s32.totalorder %s6770_s21, 34  }
 0xa9e   : > { %s6774_s19 = smov %s6771_s2 }
 0xa9f   :  { %39 = sbr.rel (!%p37_p7) target bundleno = 22 (0x16), region = 220 }
 0xaa4   :  { %4258 = vsyncpa [#allocation4], 1 }
 0xaa5   :  { %4260 = vsyncpa [#allocation4 + $0x1], 1 }
 0xaa6   :  { %4261 = vsyncpa [#allocation7], 1 }
 0xaa7   :  { %4263 = vsyncpa [#allocation7 + $0x1], 1 }
 0xaa8   :  { %4264 = vsyncpa [#allocation10], 1 }
 0xaa9   :  { %4266 = vsyncpa [#allocation10 + $0x1], 1 }
 0xaaa   :  { %4267 = vsyncpa [#allocation13], 1 }
 0xaab   :  { %4269 = vsyncpa [#allocation13 + $0x1], 1 }
 0xaac   :  { %4270 = vsyncpa [#allocation16], 1 }
 0xaad   :  { %4271 = vsyncpa [#allocation5], 1 }
 0xaae   :  { %4273 = vsyncpa [#allocation5 + $0x1], 1 }

</bundles_post_ra>
